<compile_context>
chip_gen: v7x
topology: tpu7x:2x2x1
jax: 0.10.0
libtpu: 0.0.40
codegen_flags: <defaults>
</compile_context>

<pallas_src>
import numpy as np
import jax
import jax.numpy as jnp
from jax import lax
from jax.experimental import pallas as pl
from jax.experimental.pallas import tpu as pltpu

N, C, H, W = 2, 3, 16, 16
EPS = 1e-5

# Packed-frame geometry.
R = 32              # frame rows (multiple of 8); data rows RO .. RO+H-1
RO = 8              # data row offset (tile-aligned; zero rows above and below)
BW = W + 2          # 18: per-plane lane block (1 zero halo column each side)
NPLANES = 2 * N     # 4 planes: (x0,n0) (x0,n1) (x1,n0) (x1,n1)
LANES = 128
HALF = N * BW       # 36: lane offset from branch-0 planes to branch-1 planes

# Flat-parameter offsets (single SMEM array).
W1_OFF, B1_OFF = 0, 81
W2_OFF, B2_OFF = 84, 165
G_OFF, BE_OFF = 168, 171
W3_OFF, B3_OFF = 174, 177
NPARAMS = 178

INV_CNT = 1.0 / float(N * H * W)   # 1/512 (BN count per branch and L1 mean divisor)


def _conv_bn_loss_kernel(p_ref, x_ref, loss_ref, act_ref):
    # x_ref channels: 0..2 packed x planes, 3 packed target, 4 data mask, 5 branch-0 mask.
    mask_d = x_ref[C + 1, RO:RO + H, :]        # (H,128): 1.0 at every valid data cell
    b0m = x_ref[C + 2, RO:RO + H, :]           # branch-0 (x0) cells only
    b1m = mask_d - b0m                         # branch-1 (x1) cells

    def conv3x3(load_shifted, w_off, b_off):
        # Hoist all scalar weights/biases out of the accumulation loops.
        wts = [p_ref[w_off + i] for i in range(C * C * 9)]
        outs = [jnp.full((H, LANES), p_ref[b_off + co], jnp.float32)
                for co in range(C)]
        for ci in range(C):
            for ky in range(3):
                base = load_shifted(ci, ky)    # (H,128), rows shifted by ky-1, zero OOB
                for kx in range(3):
                    # tap[r, c] = input[r+ky-1, c+kx-1]; lane wrap brings in zero halos.
                    tap = base if kx == 1 else pltpu.roll(base, (1 - kx) % LANES, axis=1)
                    for co in range(C):
                        w = wts[((co * C + ci) * 3 + ky) * 3 + kx]
                        outs[co] = outs[co] + w * tap
        # Re-zero halo / dead lanes so the next stage sees clean zero padding.
        return [o * mask_d for o in outs]

    # ---- conv1: row-shifted slices come straight from the packed input frame ----
    def in1(ci, ky):
        return x_ref[ci, RO - 1 + ky:RO - 1 + ky + H, :]

    y1 = conv3x3(in1, W1_OFF, B1_OFF)

    # Stage conv1 output once in a zero-bordered frame so conv2 can re-slice rows.
    # Data rows RO..RO+H-1 are tile-aligned -> unmasked full-tile stores.
    act_ref[...] = jnp.zeros_like(act_ref)
    for co in range(C):
        act_ref[co, RO:RO + H, :] = y1[co]

    # ---- conv2 ----
    def in2(ci, ky):
        return act_ref[ci, RO - 1 + ky:RO - 1 + ky + H, :]

    y2 = conv3x3(in2, W2_OFF, B2_OFF)

    # ---- BatchNorm2d (training mode): per-channel, per-branch batch statistics ----
    ybn = []
    for c in range(C):
        y = y2[c]                               # zero outside valid data cells
        s0 = jnp.sum(y * b0m)
        s_all = jnp.sum(y)
        m0 = s0 * INV_CNT
        m1 = (s_all - s0) * INV_CNT
        mean_vec = m0 * b0m + m1 * b1m          # zero outside data cells
        d = y - mean_vec                        # exact deviations; zero outside data
        d2 = d * d
        v0s = jnp.sum(d2 * b0m)
        v_all = jnp.sum(d2)
        inv0 = lax.rsqrt(v0s * INV_CNT + EPS)
        inv1 = lax.rsqrt((v_all - v0s) * INV_CNT + EPS)
        g = p_ref[G_OFF + c]
        scale_vec = (g * inv0) * b0m + (g * inv1) * b1m
        ybn.append(d * scale_vec + p_ref[BE_OFF + c])

    # ---- final 1x1 conv: 3 -> 1 channels ----
    z = jnp.full((H, LANES), p_ref[B3_OFF], jnp.float32)
    for c in range(C):
        z = z + p_ref[W3_OFF + c] * ybn[c]

    # ---- combine branches (lane roll by HALF) + L1 mean loss ----
    z_other = pltpu.roll(z, LANES - HALF, axis=1)   # z_other[:, c] = z[:, c + HALF]
    t_val = x_ref[C, RO:RO + H, :]
    diff = jnp.abs(z + z_other - t_val)
    loss_ref[0] = jnp.sum(diff * b0m) * INV_CNT


@jax.jit
def conv_bn_and_loss(x0, x1, t, params):
    f32 = jnp.float32

    # All parameters -> one flat SMEM array (static offsets in-kernel).
    flat = jnp.concatenate([
        params["w1"].reshape(-1), params["b1"],
        params["w2"].reshape(-1), params["b2"],
        params["gamma"], params["beta"],
        params["w3"].reshape(-1), params["b3"],
    ]).astype(f32)

    # Pack the 4 (branch, batch) planes of every channel along the lane axis, each in an
    # 18-wide block with zero halo columns; 32-row frame with data at rows 8..23.
    planes = jnp.concatenate([x0, x1], axis=0).astype(f32)                   # (4,C,H,W)
    planes = jnp.pad(planes, ((0, 0), (0, 0), (RO, R - RO - H), (1, 1)))     # (4,C,R,BW)
    xpk = jnp.transpose(planes, (1, 2, 0, 3)).reshape(C, R, NPLANES * BW)
    xpk = jnp.pad(xpk, ((0, 0), (0, 0), (0, LANES - NPLANES * BW)))          # (C,R,128)

    tpl = jnp.pad(t[:, 0].astype(f32), ((0, 0), (RO, R - RO - H), (1, 1)))   # (N,R,BW)
    tpk = jnp.transpose(tpl, (1, 0, 2)).reshape(R, N * BW)
    tpk = jnp.pad(tpk, ((0, 0), (0, LANES - N * BW)))[None]                  # (1,R,128)

    # Constant masks (built at trace time): valid data cells, and branch-0 cells only.
    mask = np.zeros((R, LANES), np.float32)
    for p in range(NPLANES):
        mask[RO:RO + H, p * BW + 1:p * BW + 1 + W] = 1.0
    b0 = np.zeros((R, LANES), np.float32)
    b0[:, :HALF] = mask[:, :HALF]
    masks = jnp.asarray(np.stack([mask, b0]))                                # (2,R,128)

    packed = jnp.concatenate([xpk, tpk, masks], axis=0)                      # (C+3,R,128)

    loss = pl.pallas_call(
        _conv_bn_loss_kernel,
        out_shape=jax.ShapeDtypeStruct((1,), jnp.float32),
        in_specs=[pl.BlockSpec(memory_space=pltpu.MemorySpace.SMEM),
                  pl.BlockSpec(memory_space=pltpu.MemorySpace.VMEM)],
        out_specs=pl.BlockSpec(memory_space=pltpu.MemorySpace.SMEM),
        scratch_shapes=[pltpu.VMEM((C, R, LANES), jnp.float32)],
    )(flat, packed)
    return loss[0]


def reference(x0, x1, t, p):
    """Pure-JAX reference (same math as the PyTorch module in train mode)."""
    def conv(x, w, b, pad):
        y = lax.conv_general_dilated(
            x, w, window_strides=(1, 1), padding=((pad, pad), (pad, pad)),
            dimension_numbers=("NCHW", "OIHW", "NCHW"))
        return y + b[None, :, None, None]

    def branch(x):
        y = conv(x, p["w1"], p["b1"], 1)
        y = conv(y, p["w2"], p["b2"], 1)
        m = jnp.mean(y, axis=(0, 2, 3), keepdims=True)
        v = jnp.mean((y - m) ** 2, axis=(0, 2, 3), keepdims=True)
        y = (y - m) * lax.rsqrt(v + EPS)
        y = y * p["gamma"][None, :, None, None] + p["beta"][None, :, None, None]
        return conv(y, p["w3"], p["b3"], 0)

    out = branch(x0) + branch(x1)
    return jnp.mean(jnp.abs(out - t))


if __name__ == "__main__":
    key = jax.random.PRNGKey(0)
    ks = jax.random.split(key, 9)

    def uinit(k, shape, fan_in):
        bound = 1.0 / np.sqrt(fan_in)
        return jax.random.uniform(k, shape, jnp.float32, -bound, bound)

    params = {
        "w1": uinit(ks[0], (3, 3, 3, 3), 3 * 9), "b1": uinit(ks[1], (3,), 3 * 9),
        "w2": uinit(ks[2], (3, 3, 3, 3), 3 * 9), "b2": uinit(ks[3], (3,), 3 * 9),
        "gamma": jnp.ones((3,), jnp.float32),    "beta": jnp.zeros((3,), jnp.float32),
        "w3": uinit(ks[4], (1, 3, 1, 1), 3),     "b3": uinit(ks[5], (1,), 3),
    }
    x0 = jax.random.normal(ks[6], (N, C, H, W), jnp.float32)
    x1 = jax.random.normal(ks[7], (N, C, H, W), jnp.float32)
    t = jax.random.normal(ks[8], (N, 1, H, W), jnp.float32)

    loss = conv_bn_and_loss(x0, x1, t, params)
    jax.block_until_ready(loss)

    ref = reference(x0, x1, t, params)
    assert np.allclose(np.asarray(loss), np.asarray(ref), rtol=1e-3, atol=1e-5), (loss, ref)
    print("KERNEL_OK")
</pallas_src>

<mosaic_0001>
module attributes {stable_mosaic.version = 11 : i64} {
  func.func @_conv_bn_loss_kernel(%arg0: memref<178xf32, #tpu.memory_space<smem>>, %arg1: memref<6x32x128xf32, #tpu.memory_space<vmem>>, %arg2: memref<1xf32, #tpu.memory_space<smem>>, %arg3: memref<3x32x128xf32, #tpu.memory_space<vmem>>) attributes {dimension_semantics = [], scalar_prefetch = 0 : i64, scratch_operands = 1 : i64, tpu.core_type = #tpu.core_type<tc>} {
    %c4 = arith.constant 4 : index
    %c8 = arith.constant 8 : index
    %c0 = arith.constant 0 : index
    %0 = vector.load %arg1[%c4, %c8, %c0] : memref<6x32x128xf32, #tpu.memory_space<vmem>>, vector<1x16x128xf32>
    %1 = vector.shape_cast %0 : vector<1x16x128xf32> to vector<16x128xf32>
    %c5 = arith.constant 5 : index
    %c8_0 = arith.constant 8 : index
    %c0_1 = arith.constant 0 : index
    %2 = vector.load %arg1[%c5, %c8_0, %c0_1] : memref<6x32x128xf32, #tpu.memory_space<vmem>>, vector<1x16x128xf32>
    %3 = vector.shape_cast %2 : vector<1x16x128xf32> to vector<16x128xf32>
    %4 = arith.subf %1, %3 : vector<16x128xf32>
    %c0_2 = arith.constant 0 : index
    %5 = memref.load %arg0[%c0_2] : memref<178xf32, #tpu.memory_space<smem>>
    %c1 = arith.constant 1 : index
    %6 = memref.load %arg0[%c1] : memref<178xf32, #tpu.memory_space<smem>>
    %c2 = arith.constant 2 : index
    %7 = memref.load %arg0[%c2] : memref<178xf32, #tpu.memory_space<smem>>
    %c3 = arith.constant 3 : index
    %8 = memref.load %arg0[%c3] : memref<178xf32, #tpu.memory_space<smem>>
    %c4_3 = arith.constant 4 : index
    %9 = memref.load %arg0[%c4_3] : memref<178xf32, #tpu.memory_space<smem>>
    %c5_4 = arith.constant 5 : index
    %10 = memref.load %arg0[%c5_4] : memref<178xf32, #tpu.memory_space<smem>>
    %c6 = arith.constant 6 : index
    %11 = memref.load %arg0[%c6] : memref<178xf32, #tpu.memory_space<smem>>
    %c7 = arith.constant 7 : index
    %12 = memref.load %arg0[%c7] : memref<178xf32, #tpu.memory_space<smem>>
    %c8_5 = arith.constant 8 : index
    %13 = memref.load %arg0[%c8_5] : memref<178xf32, #tpu.memory_space<smem>>
    %c9 = arith.constant 9 : index
    %14 = memref.load %arg0[%c9] : memref<178xf32, #tpu.memory_space<smem>>
    %c10 = arith.constant 10 : index
    %15 = memref.load %arg0[%c10] : memref<178xf32, #tpu.memory_space<smem>>
    %c11 = arith.constant 11 : index
    %16 = memref.load %arg0[%c11] : memref<178xf32, #tpu.memory_space<smem>>
    %c12 = arith.constant 12 : index
    %17 = memref.load %arg0[%c12] : memref<178xf32, #tpu.memory_space<smem>>
    %c13 = arith.constant 13 : index
    %18 = memref.load %arg0[%c13] : memref<178xf32, #tpu.memory_space<smem>>
    %c14 = arith.constant 14 : index
    %19 = memref.load %arg0[%c14] : memref<178xf32, #tpu.memory_space<smem>>
    %c15 = arith.constant 15 : index
    %20 = memref.load %arg0[%c15] : memref<178xf32, #tpu.memory_space<smem>>
    %c16 = arith.constant 16 : index
    %21 = memref.load %arg0[%c16] : memref<178xf32, #tpu.memory_space<smem>>
    %c17 = arith.constant 17 : index
    %22 = memref.load %arg0[%c17] : memref<178xf32, #tpu.memory_space<smem>>
    %c18 = arith.constant 18 : index
    %23 = memref.load %arg0[%c18] : memref<178xf32, #tpu.memory_space<smem>>
    %c19 = arith.constant 19 : index
    %24 = memref.load %arg0[%c19] : memref<178xf32, #tpu.memory_space<smem>>
    %c20 = arith.constant 20 : index
    %25 = memref.load %arg0[%c20] : memref<178xf32, #tpu.memory_space<smem>>
    %c21 = arith.constant 21 : index
    %26 = memref.load %arg0[%c21] : memref<178xf32, #tpu.memory_space<smem>>
    %c22 = arith.constant 22 : index
    %27 = memref.load %arg0[%c22] : memref<178xf32, #tpu.memory_space<smem>>
    %c23 = arith.constant 23 : index
    %28 = memref.load %arg0[%c23] : memref<178xf32, #tpu.memory_space<smem>>
    %c24 = arith.constant 24 : index
    %29 = memref.load %arg0[%c24] : memref<178xf32, #tpu.memory_space<smem>>
    %c25 = arith.constant 25 : index
    %30 = memref.load %arg0[%c25] : memref<178xf32, #tpu.memory_space<smem>>
    %c26 = arith.constant 26 : index
    %31 = memref.load %arg0[%c26] : memref<178xf32, #tpu.memory_space<smem>>
    %c27 = arith.constant 27 : index
    %32 = memref.load %arg0[%c27] : memref<178xf32, #tpu.memory_space<smem>>
    %c28 = arith.constant 28 : index
    %33 = memref.load %arg0[%c28] : memref<178xf32, #tpu.memory_space<smem>>
    %c29 = arith.constant 29 : index
    %34 = memref.load %arg0[%c29] : memref<178xf32, #tpu.memory_space<smem>>
    %c30 = arith.constant 30 : index
    %35 = memref.load %arg0[%c30] : memref<178xf32, #tpu.memory_space<smem>>
    %c31 = arith.constant 31 : index
    %36 = memref.load %arg0[%c31] : memref<178xf32, #tpu.memory_space<smem>>
    %c32 = arith.constant 32 : index
    %37 = memref.load %arg0[%c32] : memref<178xf32, #tpu.memory_space<smem>>
    %c33 = arith.constant 33 : index
    %38 = memref.load %arg0[%c33] : memref<178xf32, #tpu.memory_space<smem>>
    %c34 = arith.constant 34 : index
    %39 = memref.load %arg0[%c34] : memref<178xf32, #tpu.memory_space<smem>>
    %c35 = arith.constant 35 : index
    %40 = memref.load %arg0[%c35] : memref<178xf32, #tpu.memory_space<smem>>
    %c36 = arith.constant 36 : index
    %41 = memref.load %arg0[%c36] : memref<178xf32, #tpu.memory_space<smem>>
    %c37 = arith.constant 37 : index
    %42 = memref.load %arg0[%c37] : memref<178xf32, #tpu.memory_space<smem>>
    %c38 = arith.constant 38 : index
    %43 = memref.load %arg0[%c38] : memref<178xf32, #tpu.memory_space<smem>>
    %c39 = arith.constant 39 : index
    %44 = memref.load %arg0[%c39] : memref<178xf32, #tpu.memory_space<smem>>
    %c40 = arith.constant 40 : index
    %45 = memref.load %arg0[%c40] : memref<178xf32, #tpu.memory_space<smem>>
    %c41 = arith.constant 41 : index
    %46 = memref.load %arg0[%c41] : memref<178xf32, #tpu.memory_space<smem>>
    %c42 = arith.constant 42 : index
    %47 = memref.load %arg0[%c42] : memref<178xf32, #tpu.memory_space<smem>>
    %c43 = arith.constant 43 : index
    %48 = memref.load %arg0[%c43] : memref<178xf32, #tpu.memory_space<smem>>
    %c44 = arith.constant 44 : index
    %49 = memref.load %arg0[%c44] : memref<178xf32, #tpu.memory_space<smem>>
    %c45 = arith.constant 45 : index
    %50 = memref.load %arg0[%c45] : memref<178xf32, #tpu.memory_space<smem>>
    %c46 = arith.constant 46 : index
    %51 = memref.load %arg0[%c46] : memref<178xf32, #tpu.memory_space<smem>>
    %c47 = arith.constant 47 : index
    %52 = memref.load %arg0[%c47] : memref<178xf32, #tpu.memory_space<smem>>
    %c48 = arith.constant 48 : index
    %53 = memref.load %arg0[%c48] : memref<178xf32, #tpu.memory_space<smem>>
    %c49 = arith.constant 49 : index
    %54 = memref.load %arg0[%c49] : memref<178xf32, #tpu.memory_space<smem>>
    %c50 = arith.constant 50 : index
    %55 = memref.load %arg0[%c50] : memref<178xf32, #tpu.memory_space<smem>>
    %c51 = arith.constant 51 : index
    %56 = memref.load %arg0[%c51] : memref<178xf32, #tpu.memory_space<smem>>
    %c52 = arith.constant 52 : index
    %57 = memref.load %arg0[%c52] : memref<178xf32, #tpu.memory_space<smem>>
    %c53 = arith.constant 53 : index
    %58 = memref.load %arg0[%c53] : memref<178xf32, #tpu.memory_space<smem>>
    %c54 = arith.constant 54 : index
    %59 = memref.load %arg0[%c54] : memref<178xf32, #tpu.memory_space<smem>>
    %c55 = arith.constant 55 : index
    %60 = memref.load %arg0[%c55] : memref<178xf32, #tpu.memory_space<smem>>
    %c56 = arith.constant 56 : index
    %61 = memref.load %arg0[%c56] : memref<178xf32, #tpu.memory_space<smem>>
    %c57 = arith.constant 57 : index
    %62 = memref.load %arg0[%c57] : memref<178xf32, #tpu.memory_space<smem>>
    %c58 = arith.constant 58 : index
    %63 = memref.load %arg0[%c58] : memref<178xf32, #tpu.memory_space<smem>>
    %c59 = arith.constant 59 : index
    %64 = memref.load %arg0[%c59] : memref<178xf32, #tpu.memory_space<smem>>
    %c60 = arith.constant 60 : index
    %65 = memref.load %arg0[%c60] : memref<178xf32, #tpu.memory_space<smem>>
    %c61 = arith.constant 61 : index
    %66 = memref.load %arg0[%c61] : memref<178xf32, #tpu.memory_space<smem>>
    %c62 = arith.constant 62 : index
    %67 = memref.load %arg0[%c62] : memref<178xf32, #tpu.memory_space<smem>>
    %c63 = arith.constant 63 : index
    %68 = memref.load %arg0[%c63] : memref<178xf32, #tpu.memory_space<smem>>
    %c64 = arith.constant 64 : index
    %69 = memref.load %arg0[%c64] : memref<178xf32, #tpu.memory_space<smem>>
    %c65 = arith.constant 65 : index
    %70 = memref.load %arg0[%c65] : memref<178xf32, #tpu.memory_space<smem>>
    %c66 = arith.constant 66 : index
    %71 = memref.load %arg0[%c66] : memref<178xf32, #tpu.memory_space<smem>>
    %c67 = arith.constant 67 : index
    %72 = memref.load %arg0[%c67] : memref<178xf32, #tpu.memory_space<smem>>
    %c68 = arith.constant 68 : index
    %73 = memref.load %arg0[%c68] : memref<178xf32, #tpu.memory_space<smem>>
    %c69 = arith.constant 69 : index
    %74 = memref.load %arg0[%c69] : memref<178xf32, #tpu.memory_space<smem>>
    %c70 = arith.constant 70 : index
    %75 = memref.load %arg0[%c70] : memref<178xf32, #tpu.memory_space<smem>>
    %c71 = arith.constant 71 : index
    %76 = memref.load %arg0[%c71] : memref<178xf32, #tpu.memory_space<smem>>
    %c72 = arith.constant 72 : index
    %77 = memref.load %arg0[%c72] : memref<178xf32, #tpu.memory_space<smem>>
    %c73 = arith.constant 73 : index
    %78 = memref.load %arg0[%c73] : memref<178xf32, #tpu.memory_space<smem>>
    %c74 = arith.constant 74 : index
    %79 = memref.load %arg0[%c74] : memref<178xf32, #tpu.memory_space<smem>>
    %c75 = arith.constant 75 : index
    %80 = memref.load %arg0[%c75] : memref<178xf32, #tpu.memory_space<smem>>
    %c76 = arith.constant 76 : index
    %81 = memref.load %arg0[%c76] : memref<178xf32, #tpu.memory_space<smem>>
    %c77 = arith.constant 77 : index
    %82 = memref.load %arg0[%c77] : memref<178xf32, #tpu.memory_space<smem>>
    %c78 = arith.constant 78 : index
    %83 = memref.load %arg0[%c78] : memref<178xf32, #tpu.memory_space<smem>>
    %c79 = arith.constant 79 : index
    %84 = memref.load %arg0[%c79] : memref<178xf32, #tpu.memory_space<smem>>
    %c80 = arith.constant 80 : index
    %85 = memref.load %arg0[%c80] : memref<178xf32, #tpu.memory_space<smem>>
    %c81 = arith.constant 81 : index
    %86 = memref.load %arg0[%c81] : memref<178xf32, #tpu.memory_space<smem>>
    %87 = vector.broadcast %86 : f32 to vector<16x128xf32>
    %c82 = arith.constant 82 : index
    %88 = memref.load %arg0[%c82] : memref<178xf32, #tpu.memory_space<smem>>
    %89 = vector.broadcast %88 : f32 to vector<16x128xf32>
    %c83 = arith.constant 83 : index
    %90 = memref.load %arg0[%c83] : memref<178xf32, #tpu.memory_space<smem>>
    %91 = vector.broadcast %90 : f32 to vector<16x128xf32>
    %c0_6 = arith.constant 0 : index
    %c7_7 = arith.constant 7 : index
    %c0_8 = arith.constant 0 : index
    %92 = vector.load %arg1[%c0_6, %c7_7, %c0_8] : memref<6x32x128xf32, #tpu.memory_space<vmem>>, vector<1x16x128xf32>
    %93 = vector.shape_cast %92 : vector<1x16x128xf32> to vector<16x128xf32>
    %c1_i32 = arith.constant 1 : i32
    %94 = tpu.dynamic_rotate %93 by %c1_i32 dim 1 : vector<16x128xf32>, i32 -> vector<16x128xf32>
    %95 = vector.broadcast %5 : f32 to vector<16x128xf32>
    %96 = arith.mulf %95, %94 : vector<16x128xf32>
    %97 = arith.addf %87, %96 : vector<16x128xf32>
    %98 = vector.broadcast %32 : f32 to vector<16x128xf32>
    %99 = arith.mulf %98, %94 : vector<16x128xf32>
    %100 = arith.addf %89, %99 : vector<16x128xf32>
    %101 = vector.broadcast %59 : f32 to vector<16x128xf32>
    %102 = arith.mulf %101, %94 : vector<16x128xf32>
    %103 = arith.addf %91, %102 : vector<16x128xf32>
    %104 = vector.broadcast %6 : f32 to vector<16x128xf32>
    %105 = arith.mulf %104, %93 : vector<16x128xf32>
    %106 = arith.addf %97, %105 : vector<16x128xf32>
    %107 = vector.broadcast %33 : f32 to vector<16x128xf32>
    %108 = arith.mulf %107, %93 : vector<16x128xf32>
    %109 = arith.addf %100, %108 : vector<16x128xf32>
    %110 = vector.broadcast %60 : f32 to vector<16x128xf32>
    %111 = arith.mulf %110, %93 : vector<16x128xf32>
    %112 = arith.addf %103, %111 : vector<16x128xf32>
    %c127_i32 = arith.constant 127 : i32
    %113 = tpu.dynamic_rotate %93 by %c127_i32 dim 1 : vector<16x128xf32>, i32 -> vector<16x128xf32>
    %114 = vector.broadcast %7 : f32 to vector<16x128xf32>
    %115 = arith.mulf %114, %113 : vector<16x128xf32>
    %116 = arith.addf %106, %115 : vector<16x128xf32>
    %117 = vector.broadcast %34 : f32 to vector<16x128xf32>
    %118 = arith.mulf %117, %113 : vector<16x128xf32>
    %119 = arith.addf %109, %118 : vector<16x128xf32>
    %120 = vector.broadcast %61 : f32 to vector<16x128xf32>
    %121 = arith.mulf %120, %113 : vector<16x128xf32>
    %122 = arith.addf %112, %121 : vector<16x128xf32>
    %c0_9 = arith.constant 0 : index
    %c8_10 = arith.constant 8 : index
    %c0_11 = arith.constant 0 : index
    %123 = vector.load %arg1[%c0_9, %c8_10, %c0_11] : memref<6x32x128xf32, #tpu.memory_space<vmem>>, vector<1x16x128xf32>
    %124 = vector.shape_cast %123 : vector<1x16x128xf32> to vector<16x128xf32>
    %c1_i32_12 = arith.constant 1 : i32
    %125 = tpu.dynamic_rotate %124 by %c1_i32_12 dim 1 : vector<16x128xf32>, i32 -> vector<16x128xf32>
    %126 = vector.broadcast %8 : f32 to vector<16x128xf32>
    %127 = arith.mulf %126, %125 : vector<16x128xf32>
    %128 = arith.addf %116, %127 : vector<16x128xf32>
    %129 = vector.broadcast %35 : f32 to vector<16x128xf32>
    %130 = arith.mulf %129, %125 : vector<16x128xf32>
    %131 = arith.addf %119, %130 : vector<16x128xf32>
    %132 = vector.broadcast %62 : f32 to vector<16x128xf32>
    %133 = arith.mulf %132, %125 : vector<16x128xf32>
    %134 = arith.addf %122, %133 : vector<16x128xf32>
    %135 = vector.broadcast %9 : f32 to vector<16x128xf32>
    %136 = arith.mulf %135, %124 : vector<16x128xf32>
    %137 = arith.addf %128, %136 : vector<16x128xf32>
    %138 = vector.broadcast %36 : f32 to vector<16x128xf32>
    %139 = arith.mulf %138, %124 : vector<16x128xf32>
    %140 = arith.addf %131, %139 : vector<16x128xf32>
    %141 = vector.broadcast %63 : f32 to vector<16x128xf32>
    %142 = arith.mulf %141, %124 : vector<16x128xf32>
    %143 = arith.addf %134, %142 : vector<16x128xf32>
    %c127_i32_13 = arith.constant 127 : i32
    %144 = tpu.dynamic_rotate %124 by %c127_i32_13 dim 1 : vector<16x128xf32>, i32 -> vector<16x128xf32>
    %145 = vector.broadcast %10 : f32 to vector<16x128xf32>
    %146 = arith.mulf %145, %144 : vector<16x128xf32>
    %147 = arith.addf %137, %146 : vector<16x128xf32>
    %148 = vector.broadcast %37 : f32 to vector<16x128xf32>
    %149 = arith.mulf %148, %144 : vector<16x128xf32>
    %150 = arith.addf %140, %149 : vector<16x128xf32>
    %151 = vector.broadcast %64 : f32 to vector<16x128xf32>
    %152 = arith.mulf %151, %144 : vector<16x128xf32>
    %153 = arith.addf %143, %152 : vector<16x128xf32>
    %c0_14 = arith.constant 0 : index
    %c9_15 = arith.constant 9 : index
    %c0_16 = arith.constant 0 : index
    %154 = vector.load %arg1[%c0_14, %c9_15, %c0_16] : memref<6x32x128xf32, #tpu.memory_space<vmem>>, vector<1x16x128xf32>
    %155 = vector.shape_cast %154 : vector<1x16x128xf32> to vector<16x128xf32>
    %c1_i32_17 = arith.constant 1 : i32
    %156 = tpu.dynamic_rotate %155 by %c1_i32_17 dim 1 : vector<16x128xf32>, i32 -> vector<16x128xf32>
    %157 = vector.broadcast %11 : f32 to vector<16x128xf32>
    %158 = arith.mulf %157, %156 : vector<16x128xf32>
    %159 = arith.addf %147, %158 : vector<16x128xf32>
    %160 = vector.broadcast %38 : f32 to vector<16x128xf32>
    %161 = arith.mulf %160, %156 : vector<16x128xf32>
    %162 = arith.addf %150, %161 : vector<16x128xf32>
    %163 = vector.broadcast %65 : f32 to vector<16x128xf32>
    %164 = arith.mulf %163, %156 : vector<16x128xf32>
    %165 = arith.addf %153, %164 : vector<16x128xf32>
    %166 = vector.broadcast %12 : f32 to vector<16x128xf32>
    %167 = arith.mulf %166, %155 : vector<16x128xf32>
    %168 = arith.addf %159, %167 : vector<16x128xf32>
    %169 = vector.broadcast %39 : f32 to vector<16x128xf32>
    %170 = arith.mulf %169, %155 : vector<16x128xf32>
    %171 = arith.addf %162, %170 : vector<16x128xf32>
    %172 = vector.broadcast %66 : f32 to vector<16x128xf32>
    %173 = arith.mulf %172, %155 : vector<16x128xf32>
    %174 = arith.addf %165, %173 : vector<16x128xf32>
    %c127_i32_18 = arith.constant 127 : i32
    %175 = tpu.dynamic_rotate %155 by %c127_i32_18 dim 1 : vector<16x128xf32>, i32 -> vector<16x128xf32>
    %176 = vector.broadcast %13 : f32 to vector<16x128xf32>
    %177 = arith.mulf %176, %175 : vector<16x128xf32>
    %178 = arith.addf %168, %177 : vector<16x128xf32>
    %179 = vector.broadcast %40 : f32 to vector<16x128xf32>
    %180 = arith.mulf %179, %175 : vector<16x128xf32>
    %181 = arith.addf %171, %180 : vector<16x128xf32>
    %182 = vector.broadcast %67 : f32 to vector<16x128xf32>
    %183 = arith.mulf %182, %175 : vector<16x128xf32>
    %184 = arith.addf %174, %183 : vector<16x128xf32>
    %c1_19 = arith.constant 1 : index
    %c7_20 = arith.constant 7 : index
    %c0_21 = arith.constant 0 : index
    %185 = vector.load %arg1[%c1_19, %c7_20, %c0_21] : memref<6x32x128xf32, #tpu.memory_space<vmem>>, vector<1x16x128xf32>
    %186 = vector.shape_cast %185 : vector<1x16x128xf32> to vector<16x128xf32>
    %c1_i32_22 = arith.constant 1 : i32
    %187 = tpu.dynamic_rotate %186 by %c1_i32_22 dim 1 : vector<16x128xf32>, i32 -> vector<16x128xf32>
    %188 = vector.broadcast %14 : f32 to vector<16x128xf32>
    %189 = arith.mulf %188, %187 : vector<16x128xf32>
    %190 = arith.addf %178, %189 : vector<16x128xf32>
    %191 = vector.broadcast %41 : f32 to vector<16x128xf32>
    %192 = arith.mulf %191, %187 : vector<16x128xf32>
    %193 = arith.addf %181, %192 : vector<16x128xf32>
    %194 = vector.broadcast %68 : f32 to vector<16x128xf32>
    %195 = arith.mulf %194, %187 : vector<16x128xf32>
    %196 = arith.addf %184, %195 : vector<16x128xf32>
    %197 = vector.broadcast %15 : f32 to vector<16x128xf32>
    %198 = arith.mulf %197, %186 : vector<16x128xf32>
    %199 = arith.addf %190, %198 : vector<16x128xf32>
    %200 = vector.broadcast %42 : f32 to vector<16x128xf32>
    %201 = arith.mulf %200, %186 : vector<16x128xf32>
    %202 = arith.addf %193, %201 : vector<16x128xf32>
    %203 = vector.broadcast %69 : f32 to vector<16x128xf32>
    %204 = arith.mulf %203, %186 : vector<16x128xf32>
    %205 = arith.addf %196, %204 : vector<16x128xf32>
    %c127_i32_23 = arith.constant 127 : i32
    %206 = tpu.dynamic_rotate %186 by %c127_i32_23 dim 1 : vector<16x128xf32>, i32 -> vector<16x128xf32>
    %207 = vector.broadcast %16 : f32 to vector<16x128xf32>
    %208 = arith.mulf %207, %206 : vector<16x128xf32>
    %209 = arith.addf %199, %208 : vector<16x128xf32>
    %210 = vector.broadcast %43 : f32 to vector<16x128xf32>
    %211 = arith.mulf %210, %206 : vector<16x128xf32>
    %212 = arith.addf %202, %211 : vector<16x128xf32>
    %213 = vector.broadcast %70 : f32 to vector<16x128xf32>
    %214 = arith.mulf %213, %206 : vector<16x128xf32>
    %215 = arith.addf %205, %214 : vector<16x128xf32>
    %c1_24 = arith.constant 1 : index
    %c8_25 = arith.constant 8 : index
    %c0_26 = arith.constant 0 : index
    %216 = vector.load %arg1[%c1_24, %c8_25, %c0_26] : memref<6x32x128xf32, #tpu.memory_space<vmem>>, vector<1x16x128xf32>
    %217 = vector.shape_cast %216 : vector<1x16x128xf32> to vector<16x128xf32>
    %c1_i32_27 = arith.constant 1 : i32
    %218 = tpu.dynamic_rotate %217 by %c1_i32_27 dim 1 : vector<16x128xf32>, i32 -> vector<16x128xf32>
    %219 = vector.broadcast %17 : f32 to vector<16x128xf32>
    %220 = arith.mulf %219, %218 : vector<16x128xf32>
    %221 = arith.addf %209, %220 : vector<16x128xf32>
    %222 = vector.broadcast %44 : f32 to vector<16x128xf32>
    %223 = arith.mulf %222, %218 : vector<16x128xf32>
    %224 = arith.addf %212, %223 : vector<16x128xf32>
    %225 = vector.broadcast %71 : f32 to vector<16x128xf32>
    %226 = arith.mulf %225, %218 : vector<16x128xf32>
    %227 = arith.addf %215, %226 : vector<16x128xf32>
    %228 = vector.broadcast %18 : f32 to vector<16x128xf32>
    %229 = arith.mulf %228, %217 : vector<16x128xf32>
    %230 = arith.addf %221, %229 : vector<16x128xf32>
    %231 = vector.broadcast %45 : f32 to vector<16x128xf32>
    %232 = arith.mulf %231, %217 : vector<16x128xf32>
    %233 = arith.addf %224, %232 : vector<16x128xf32>
    %234 = vector.broadcast %72 : f32 to vector<16x128xf32>
    %235 = arith.mulf %234, %217 : vector<16x128xf32>
    %236 = arith.addf %227, %235 : vector<16x128xf32>
    %c127_i32_28 = arith.constant 127 : i32
    %237 = tpu.dynamic_rotate %217 by %c127_i32_28 dim 1 : vector<16x128xf32>, i32 -> vector<16x128xf32>
    %238 = vector.broadcast %19 : f32 to vector<16x128xf32>
    %239 = arith.mulf %238, %237 : vector<16x128xf32>
    %240 = arith.addf %230, %239 : vector<16x128xf32>
    %241 = vector.broadcast %46 : f32 to vector<16x128xf32>
    %242 = arith.mulf %241, %237 : vector<16x128xf32>
    %243 = arith.addf %233, %242 : vector<16x128xf32>
    %244 = vector.broadcast %73 : f32 to vector<16x128xf32>
    %245 = arith.mulf %244, %237 : vector<16x128xf32>
    %246 = arith.addf %236, %245 : vector<16x128xf32>
    %c1_29 = arith.constant 1 : index
    %c9_30 = arith.constant 9 : index
    %c0_31 = arith.constant 0 : index
    %247 = vector.load %arg1[%c1_29, %c9_30, %c0_31] : memref<6x32x128xf32, #tpu.memory_space<vmem>>, vector<1x16x128xf32>
    %248 = vector.shape_cast %247 : vector<1x16x128xf32> to vector<16x128xf32>
    %c1_i32_32 = arith.constant 1 : i32
    %249 = tpu.dynamic_rotate %248 by %c1_i32_32 dim 1 : vector<16x128xf32>, i32 -> vector<16x128xf32>
    %250 = vector.broadcast %20 : f32 to vector<16x128xf32>
    %251 = arith.mulf %250, %249 : vector<16x128xf32>
    %252 = arith.addf %240, %251 : vector<16x128xf32>
    %253 = vector.broadcast %47 : f32 to vector<16x128xf32>
    %254 = arith.mulf %253, %249 : vector<16x128xf32>
    %255 = arith.addf %243, %254 : vector<16x128xf32>
    %256 = vector.broadcast %74 : f32 to vector<16x128xf32>
    %257 = arith.mulf %256, %249 : vector<16x128xf32>
    %258 = arith.addf %246, %257 : vector<16x128xf32>
    %259 = vector.broadcast %21 : f32 to vector<16x128xf32>
    %260 = arith.mulf %259, %248 : vector<16x128xf32>
    %261 = arith.addf %252, %260 : vector<16x128xf32>
    %262 = vector.broadcast %48 : f32 to vector<16x128xf32>
    %263 = arith.mulf %262, %248 : vector<16x128xf32>
    %264 = arith.addf %255, %263 : vector<16x128xf32>
    %265 = vector.broadcast %75 : f32 to vector<16x128xf32>
    %266 = arith.mulf %265, %248 : vector<16x128xf32>
    %267 = arith.addf %258, %266 : vector<16x128xf32>
    %c127_i32_33 = arith.constant 127 : i32
    %268 = tpu.dynamic_rotate %248 by %c127_i32_33 dim 1 : vector<16x128xf32>, i32 -> vector<16x128xf32>
    %269 = vector.broadcast %22 : f32 to vector<16x128xf32>
    %270 = arith.mulf %269, %268 : vector<16x128xf32>
    %271 = arith.addf %261, %270 : vector<16x128xf32>
    %272 = vector.broadcast %49 : f32 to vector<16x128xf32>
    %273 = arith.mulf %272, %268 : vector<16x128xf32>
    %274 = arith.addf %264, %273 : vector<16x128xf32>
    %275 = vector.broadcast %76 : f32 to vector<16x128xf32>
    %276 = arith.mulf %275, %268 : vector<16x128xf32>
    %277 = arith.addf %267, %276 : vector<16x128xf32>
    %c2_34 = arith.constant 2 : index
    %c7_35 = arith.constant 7 : index
    %c0_36 = arith.constant 0 : index
    %278 = vector.load %arg1[%c2_34, %c7_35, %c0_36] : memref<6x32x128xf32, #tpu.memory_space<vmem>>, vector<1x16x128xf32>
    %279 = vector.shape_cast %278 : vector<1x16x128xf32> to vector<16x128xf32>
    %c1_i32_37 = arith.constant 1 : i32
    %280 = tpu.dynamic_rotate %279 by %c1_i32_37 dim 1 : vector<16x128xf32>, i32 -> vector<16x128xf32>
    %281 = vector.broadcast %23 : f32 to vector<16x128xf32>
    %282 = arith.mulf %281, %280 : vector<16x128xf32>
    %283 = arith.addf %271, %282 : vector<16x128xf32>
    %284 = vector.broadcast %50 : f32 to vector<16x128xf32>
    %285 = arith.mulf %284, %280 : vector<16x128xf32>
    %286 = arith.addf %274, %285 : vector<16x128xf32>
    %287 = vector.broadcast %77 : f32 to vector<16x128xf32>
    %288 = arith.mulf %287, %280 : vector<16x128xf32>
    %289 = arith.addf %277, %288 : vector<16x128xf32>
    %290 = vector.broadcast %24 : f32 to vector<16x128xf32>
    %291 = arith.mulf %290, %279 : vector<16x128xf32>
    %292 = arith.addf %283, %291 : vector<16x128xf32>
    %293 = vector.broadcast %51 : f32 to vector<16x128xf32>
    %294 = arith.mulf %293, %279 : vector<16x128xf32>
    %295 = arith.addf %286, %294 : vector<16x128xf32>
    %296 = vector.broadcast %78 : f32 to vector<16x128xf32>
    %297 = arith.mulf %296, %279 : vector<16x128xf32>
    %298 = arith.addf %289, %297 : vector<16x128xf32>
    %c127_i32_38 = arith.constant 127 : i32
    %299 = tpu.dynamic_rotate %279 by %c127_i32_38 dim 1 : vector<16x128xf32>, i32 -> vector<16x128xf32>
    %300 = vector.broadcast %25 : f32 to vector<16x128xf32>
    %301 = arith.mulf %300, %299 : vector<16x128xf32>
    %302 = arith.addf %292, %301 : vector<16x128xf32>
    %303 = vector.broadcast %52 : f32 to vector<16x128xf32>
    %304 = arith.mulf %303, %299 : vector<16x128xf32>
    %305 = arith.addf %295, %304 : vector<16x128xf32>
    %306 = vector.broadcast %79 : f32 to vector<16x128xf32>
    %307 = arith.mulf %306, %299 : vector<16x128xf32>
    %308 = arith.addf %298, %307 : vector<16x128xf32>
    %c2_39 = arith.constant 2 : index
    %c8_40 = arith.constant 8 : index
    %c0_41 = arith.constant 0 : index
    %309 = vector.load %arg1[%c2_39, %c8_40, %c0_41] : memref<6x32x128xf32, #tpu.memory_space<vmem>>, vector<1x16x128xf32>
    %310 = vector.shape_cast %309 : vector<1x16x128xf32> to vector<16x128xf32>
    %c1_i32_42 = arith.constant 1 : i32
    %311 = tpu.dynamic_rotate %310 by %c1_i32_42 dim 1 : vector<16x128xf32>, i32 -> vector<16x128xf32>
    %312 = vector.broadcast %26 : f32 to vector<16x128xf32>
    %313 = arith.mulf %312, %311 : vector<16x128xf32>
    %314 = arith.addf %302, %313 : vector<16x128xf32>
    %315 = vector.broadcast %53 : f32 to vector<16x128xf32>
    %316 = arith.mulf %315, %311 : vector<16x128xf32>
    %317 = arith.addf %305, %316 : vector<16x128xf32>
    %318 = vector.broadcast %80 : f32 to vector<16x128xf32>
    %319 = arith.mulf %318, %311 : vector<16x128xf32>
    %320 = arith.addf %308, %319 : vector<16x128xf32>
    %321 = vector.broadcast %27 : f32 to vector<16x128xf32>
    %322 = arith.mulf %321, %310 : vector<16x128xf32>
    %323 = arith.addf %314, %322 : vector<16x128xf32>
    %324 = vector.broadcast %54 : f32 to vector<16x128xf32>
    %325 = arith.mulf %324, %310 : vector<16x128xf32>
    %326 = arith.addf %317, %325 : vector<16x128xf32>
    %327 = vector.broadcast %81 : f32 to vector<16x128xf32>
    %328 = arith.mulf %327, %310 : vector<16x128xf32>
    %329 = arith.addf %320, %328 : vector<16x128xf32>
    %c127_i32_43 = arith.constant 127 : i32
    %330 = tpu.dynamic_rotate %310 by %c127_i32_43 dim 1 : vector<16x128xf32>, i32 -> vector<16x128xf32>
    %331 = vector.broadcast %28 : f32 to vector<16x128xf32>
    %332 = arith.mulf %331, %330 : vector<16x128xf32>
    %333 = arith.addf %323, %332 : vector<16x128xf32>
    %334 = vector.broadcast %55 : f32 to vector<16x128xf32>
    %335 = arith.mulf %334, %330 : vector<16x128xf32>
    %336 = arith.addf %326, %335 : vector<16x128xf32>
    %337 = vector.broadcast %82 : f32 to vector<16x128xf32>
    %338 = arith.mulf %337, %330 : vector<16x128xf32>
    %339 = arith.addf %329, %338 : vector<16x128xf32>
    %c2_44 = arith.constant 2 : index
    %c9_45 = arith.constant 9 : index
    %c0_46 = arith.constant 0 : index
    %340 = vector.load %arg1[%c2_44, %c9_45, %c0_46] : memref<6x32x128xf32, #tpu.memory_space<vmem>>, vector<1x16x128xf32>
    %341 = vector.shape_cast %340 : vector<1x16x128xf32> to vector<16x128xf32>
    %c1_i32_47 = arith.constant 1 : i32
    %342 = tpu.dynamic_rotate %341 by %c1_i32_47 dim 1 : vector<16x128xf32>, i32 -> vector<16x128xf32>
    %343 = vector.broadcast %29 : f32 to vector<16x128xf32>
    %344 = arith.mulf %343, %342 : vector<16x128xf32>
    %345 = arith.addf %333, %344 : vector<16x128xf32>
    %346 = vector.broadcast %56 : f32 to vector<16x128xf32>
    %347 = arith.mulf %346, %342 : vector<16x128xf32>
    %348 = arith.addf %336, %347 : vector<16x128xf32>
    %349 = vector.broadcast %83 : f32 to vector<16x128xf32>
    %350 = arith.mulf %349, %342 : vector<16x128xf32>
    %351 = arith.addf %339, %350 : vector<16x128xf32>
    %352 = vector.broadcast %30 : f32 to vector<16x128xf32>
    %353 = arith.mulf %352, %341 : vector<16x128xf32>
    %354 = arith.addf %345, %353 : vector<16x128xf32>
    %355 = vector.broadcast %57 : f32 to vector<16x128xf32>
    %356 = arith.mulf %355, %341 : vector<16x128xf32>
    %357 = arith.addf %348, %356 : vector<16x128xf32>
    %358 = vector.broadcast %84 : f32 to vector<16x128xf32>
    %359 = arith.mulf %358, %341 : vector<16x128xf32>
    %360 = arith.addf %351, %359 : vector<16x128xf32>
    %c127_i32_48 = arith.constant 127 : i32
    %361 = tpu.dynamic_rotate %341 by %c127_i32_48 dim 1 : vector<16x128xf32>, i32 -> vector<16x128xf32>
    %362 = vector.broadcast %31 : f32 to vector<16x128xf32>
    %363 = arith.mulf %362, %361 : vector<16x128xf32>
    %364 = arith.addf %354, %363 : vector<16x128xf32>
    %365 = vector.broadcast %58 : f32 to vector<16x128xf32>
    %366 = arith.mulf %365, %361 : vector<16x128xf32>
    %367 = arith.addf %357, %366 : vector<16x128xf32>
    %368 = vector.broadcast %85 : f32 to vector<16x128xf32>
    %369 = arith.mulf %368, %361 : vector<16x128xf32>
    %370 = arith.addf %360, %369 : vector<16x128xf32>
    %371 = arith.mulf %364, %1 : vector<16x128xf32>
    %372 = arith.mulf %367, %1 : vector<16x128xf32>
    %373 = arith.mulf %370, %1 : vector<16x128xf32>
    %cst = arith.constant 0.000000e+00 : f32
    %374 = vector.broadcast %cst : f32 to vector<3x32x128xf32>
    %c0_49 = arith.constant 0 : index
    %c0_50 = arith.constant 0 : index
    %c0_51 = arith.constant 0 : index
    %375 = vector.load %arg3[%c0_49, %c0_50, %c0_51] : memref<3x32x128xf32, #tpu.memory_space<vmem>>, vector<3x32x128xf32>
    tpu.vector_store %arg3[%c0_49, %c0_50, %c0_51], %374 {strides = array<i32>} : memref<3x32x128xf32, #tpu.memory_space<vmem>>, vector<3x32x128xf32>,
    %c0_52 = arith.constant 0 : index
    %c8_53 = arith.constant 8 : index
    %c0_54 = arith.constant 0 : index
    %376 = vector.load %arg3[%c0_52, %c8_53, %c0_54] : memref<3x32x128xf32, #tpu.memory_space<vmem>>, vector<1x16x128xf32>
    %377 = vector.shape_cast %376 : vector<1x16x128xf32> to vector<16x128xf32>
    %378 = vector.shape_cast %371 : vector<16x128xf32> to vector<1x16x128xf32>
    tpu.vector_store %arg3[%c0_52, %c8_53, %c0_54], %378 {strides = array<i32>} : memref<3x32x128xf32, #tpu.memory_space<vmem>>, vector<1x16x128xf32>,
    %c1_55 = arith.constant 1 : index
    %c8_56 = arith.constant 8 : index
    %c0_57 = arith.constant 0 : index
    %379 = vector.load %arg3[%c1_55, %c8_56, %c0_57] : memref<3x32x128xf32, #tpu.memory_space<vmem>>, vector<1x16x128xf32>
    %380 = vector.shape_cast %379 : vector<1x16x128xf32> to vector<16x128xf32>
    %381 = vector.shape_cast %372 : vector<16x128xf32> to vector<1x16x128xf32>
    tpu.vector_store %arg3[%c1_55, %c8_56, %c0_57], %381 {strides = array<i32>} : memref<3x32x128xf32, #tpu.memory_space<vmem>>, vector<1x16x128xf32>,
    %c2_58 = arith.constant 2 : index
    %c8_59 = arith.constant 8 : index
    %c0_60 = arith.constant 0 : index
    %382 = vector.load %arg3[%c2_58, %c8_59, %c0_60] : memref<3x32x128xf32, #tpu.memory_space<vmem>>, vector<1x16x128xf32>
    %383 = vector.shape_cast %382 : vector<1x16x128xf32> to vector<16x128xf32>
    %384 = vector.shape_cast %373 : vector<16x128xf32> to vector<1x16x128xf32>
    tpu.vector_store %arg3[%c2_58, %c8_59, %c0_60], %384 {strides = array<i32>} : memref<3x32x128xf32, #tpu.memory_space<vmem>>, vector<1x16x128xf32>,
    %c84 = arith.constant 84 : index
    %385 = memref.load %arg0[%c84] : memref<178xf32, #tpu.memory_space<smem>>
    %c85 = arith.constant 85 : index
    %386 = memref.load %arg0[%c85] : memref<178xf32, #tpu.memory_space<smem>>
    %c86 = arith.constant 86 : index
    %387 = memref.load %arg0[%c86] : memref<178xf32, #tpu.memory_space<smem>>
    %c87 = arith.constant 87 : index
    %388 = memref.load %arg0[%c87] : memref<178xf32, #tpu.memory_space<smem>>
    %c88 = arith.constant 88 : index
    %389 = memref.load %arg0[%c88] : memref<178xf32, #tpu.memory_space<smem>>
    %c89 = arith.constant 89 : index
    %390 = memref.load %arg0[%c89] : memref<178xf32, #tpu.memory_space<smem>>
    %c90 = arith.constant 90 : index
    %391 = memref.load %arg0[%c90] : memref<178xf32, #tpu.memory_space<smem>>
    %c91 = arith.constant 91 : index
    %392 = memref.load %arg0[%c91] : memref<178xf32, #tpu.memory_space<smem>>
    %c92 = arith.constant 92 : index
    %393 = memref.load %arg0[%c92] : memref<178xf32, #tpu.memory_space<smem>>
    %c93 = arith.constant 93 : index
    %394 = memref.load %arg0[%c93] : memref<178xf32, #tpu.memory_space<smem>>
    %c94 = arith.constant 94 : index
    %395 = memref.load %arg0[%c94] : memref<178xf32, #tpu.memory_space<smem>>
    %c95 = arith.constant 95 : index
    %396 = memref.load %arg0[%c95] : memref<178xf32, #tpu.memory_space<smem>>
    %c96 = arith.constant 96 : index
    %397 = memref.load %arg0[%c96] : memref<178xf32, #tpu.memory_space<smem>>
    %c97 = arith.constant 97 : index
    %398 = memref.load %arg0[%c97] : memref<178xf32, #tpu.memory_space<smem>>
    %c98 = arith.constant 98 : index
    %399 = memref.load %arg0[%c98] : memref<178xf32, #tpu.memory_space<smem>>
    %c99 = arith.constant 99 : index
    %400 = memref.load %arg0[%c99] : memref<178xf32, #tpu.memory_space<smem>>
    %c100 = arith.constant 100 : index
    %401 = memref.load %arg0[%c100] : memref<178xf32, #tpu.memory_space<smem>>
    %c101 = arith.constant 101 : index
    %402 = memref.load %arg0[%c101] : memref<178xf32, #tpu.memory_space<smem>>
    %c102 = arith.constant 102 : index
    %403 = memref.load %arg0[%c102] : memref<178xf32, #tpu.memory_space<smem>>
    %c103 = arith.constant 103 : index
    %404 = memref.load %arg0[%c103] : memref<178xf32, #tpu.memory_space<smem>>
    %c104 = arith.constant 104 : index
    %405 = memref.load %arg0[%c104] : memref<178xf32, #tpu.memory_space<smem>>
    %c105 = arith.constant 105 : index
    %406 = memref.load %arg0[%c105] : memref<178xf32, #tpu.memory_space<smem>>
    %c106 = arith.constant 106 : index
    %407 = memref.load %arg0[%c106] : memref<178xf32, #tpu.memory_space<smem>>
    %c107 = arith.constant 107 : index
    %408 = memref.load %arg0[%c107] : memref<178xf32, #tpu.memory_space<smem>>
    %c108 = arith.constant 108 : index
    %409 = memref.load %arg0[%c108] : memref<178xf32, #tpu.memory_space<smem>>
    %c109 = arith.constant 109 : index
    %410 = memref.load %arg0[%c109] : memref<178xf32, #tpu.memory_space<smem>>
    %c110 = arith.constant 110 : index
    %411 = memref.load %arg0[%c110] : memref<178xf32, #tpu.memory_space<smem>>
    %c111 = arith.constant 111 : index
    %412 = memref.load %arg0[%c111] : memref<178xf32, #tpu.memory_space<smem>>
    %c112 = arith.constant 112 : index
    %413 = memref.load %arg0[%c112] : memref<178xf32, #tpu.memory_space<smem>>
    %c113 = arith.constant 113 : index
    %414 = memref.load %arg0[%c113] : memref<178xf32, #tpu.memory_space<smem>>
    %c114 = arith.constant 114 : index
    %415 = memref.load %arg0[%c114] : memref<178xf32, #tpu.memory_space<smem>>
    %c115 = arith.constant 115 : index
    %416 = memref.load %arg0[%c115] : memref<178xf32, #tpu.memory_space<smem>>
    %c116 = arith.constant 116 : index
    %417 = memref.load %arg0[%c116] : memref<178xf32, #tpu.memory_space<smem>>
    %c117 = arith.constant 117 : index
    %418 = memref.load %arg0[%c117] : memref<178xf32, #tpu.memory_space<smem>>
    %c118 = arith.constant 118 : index
    %419 = memref.load %arg0[%c118] : memref<178xf32, #tpu.memory_space<smem>>
    %c119 = arith.constant 119 : index
    %420 = memref.load %arg0[%c119] : memref<178xf32, #tpu.memory_space<smem>>
    %c120 = arith.constant 120 : index
    %421 = memref.load %arg0[%c120] : memref<178xf32, #tpu.memory_space<smem>>
    %c121 = arith.constant 121 : index
    %422 = memref.load %arg0[%c121] : memref<178xf32, #tpu.memory_space<smem>>
    %c122 = arith.constant 122 : index
    %423 = memref.load %arg0[%c122] : memref<178xf32, #tpu.memory_space<smem>>
    %c123 = arith.constant 123 : index
    %424 = memref.load %arg0[%c123] : memref<178xf32, #tpu.memory_space<smem>>
    %c124 = arith.constant 124 : index
    %425 = memref.load %arg0[%c124] : memref<178xf32, #tpu.memory_space<smem>>
    %c125 = arith.constant 125 : index
    %426 = memref.load %arg0[%c125] : memref<178xf32, #tpu.memory_space<smem>>
    %c126 = arith.constant 126 : index
    %427 = memref.load %arg0[%c126] : memref<178xf32, #tpu.memory_space<smem>>
    %c127 = arith.constant 127 : index
    %428 = memref.load %arg0[%c127] : memref<178xf32, #tpu.memory_space<smem>>
    %c128 = arith.constant 128 : index
    %429 = memref.load %arg0[%c128] : memref<178xf32, #tpu.memory_space<smem>>
    %c129 = arith.constant 129 : index
    %430 = memref.load %arg0[%c129] : memref<178xf32, #tpu.memory_space<smem>>
    %c130 = arith.constant 130 : index
    %431 = memref.load %arg0[%c130] : memref<178xf32, #tpu.memory_space<smem>>
    %c131 = arith.constant 131 : index
    %432 = memref.load %arg0[%c131] : memref<178xf32, #tpu.memory_space<smem>>
    %c132 = arith.constant 132 : index
    %433 = memref.load %arg0[%c132] : memref<178xf32, #tpu.memory_space<smem>>
    %c133 = arith.constant 133 : index
    %434 = memref.load %arg0[%c133] : memref<178xf32, #tpu.memory_space<smem>>
    %c134 = arith.constant 134 : index
    %435 = memref.load %arg0[%c134] : memref<178xf32, #tpu.memory_space<smem>>
    %c135 = arith.constant 135 : index
    %436 = memref.load %arg0[%c135] : memref<178xf32, #tpu.memory_space<smem>>
    %c136 = arith.constant 136 : index
    %437 = memref.load %arg0[%c136] : memref<178xf32, #tpu.memory_space<smem>>
    %c137 = arith.constant 137 : index
    %438 = memref.load %arg0[%c137] : memref<178xf32, #tpu.memory_space<smem>>
    %c138 = arith.constant 138 : index
    %439 = memref.load %arg0[%c138] : memref<178xf32, #tpu.memory_space<smem>>
    %c139 = arith.constant 139 : index
    %440 = memref.load %arg0[%c139] : memref<178xf32, #tpu.memory_space<smem>>
    %c140 = arith.constant 140 : index
    %441 = memref.load %arg0[%c140] : memref<178xf32, #tpu.memory_space<smem>>
    %c141 = arith.constant 141 : index
    %442 = memref.load %arg0[%c141] : memref<178xf32, #tpu.memory_space<smem>>
    %c142 = arith.constant 142 : index
    %443 = memref.load %arg0[%c142] : memref<178xf32, #tpu.memory_space<smem>>
    %c143 = arith.constant 143 : index
    %444 = memref.load %arg0[%c143] : memref<178xf32, #tpu.memory_space<smem>>
    %c144 = arith.constant 144 : index
    %445 = memref.load %arg0[%c144] : memref<178xf32, #tpu.memory_space<smem>>
    %c145 = arith.constant 145 : index
    %446 = memref.load %arg0[%c145] : memref<178xf32, #tpu.memory_space<smem>>
    %c146 = arith.constant 146 : index
    %447 = memref.load %arg0[%c146] : memref<178xf32, #tpu.memory_space<smem>>
    %c147 = arith.constant 147 : index
    %448 = memref.load %arg0[%c147] : memref<178xf32, #tpu.memory_space<smem>>
    %c148 = arith.constant 148 : index
    %449 = memref.load %arg0[%c148] : memref<178xf32, #tpu.memory_space<smem>>
    %c149 = arith.constant 149 : index
    %450 = memref.load %arg0[%c149] : memref<178xf32, #tpu.memory_space<smem>>
    %c150 = arith.constant 150 : index
    %451 = memref.load %arg0[%c150] : memref<178xf32, #tpu.memory_space<smem>>
    %c151 = arith.constant 151 : index
    %452 = memref.load %arg0[%c151] : memref<178xf32, #tpu.memory_space<smem>>
    %c152 = arith.constant 152 : index
    %453 = memref.load %arg0[%c152] : memref<178xf32, #tpu.memory_space<smem>>
    %c153 = arith.constant 153 : index
    %454 = memref.load %arg0[%c153] : memref<178xf32, #tpu.memory_space<smem>>
    %c154 = arith.constant 154 : index
    %455 = memref.load %arg0[%c154] : memref<178xf32, #tpu.memory_space<smem>>
    %c155 = arith.constant 155 : index
    %456 = memref.load %arg0[%c155] : memref<178xf32, #tpu.memory_space<smem>>
    %c156 = arith.constant 156 : index
    %457 = memref.load %arg0[%c156] : memref<178xf32, #tpu.memory_space<smem>>
    %c157 = arith.constant 157 : index
    %458 = memref.load %arg0[%c157] : memref<178xf32, #tpu.memory_space<smem>>
    %c158 = arith.constant 158 : index
    %459 = memref.load %arg0[%c158] : memref<178xf32, #tpu.memory_space<smem>>
    %c159 = arith.constant 159 : index
    %460 = memref.load %arg0[%c159] : memref<178xf32, #tpu.memory_space<smem>>
    %c160 = arith.constant 160 : index
    %461 = memref.load %arg0[%c160] : memref<178xf32, #tpu.memory_space<smem>>
    %c161 = arith.constant 161 : index
    %462 = memref.load %arg0[%c161] : memref<178xf32, #tpu.memory_space<smem>>
    %c162 = arith.constant 162 : index
    %463 = memref.load %arg0[%c162] : memref<178xf32, #tpu.memory_space<smem>>
    %c163 = arith.constant 163 : index
    %464 = memref.load %arg0[%c163] : memref<178xf32, #tpu.memory_space<smem>>
    %c164 = arith.constant 164 : index
    %465 = memref.load %arg0[%c164] : memref<178xf32, #tpu.memory_space<smem>>
    %c165 = arith.constant 165 : index
    %466 = memref.load %arg0[%c165] : memref<178xf32, #tpu.memory_space<smem>>
    %467 = vector.broadcast %466 : f32 to vector<16x128xf32>
    %c166 = arith.constant 166 : index
    %468 = memref.load %arg0[%c166] : memref<178xf32, #tpu.memory_space<smem>>
    %469 = vector.broadcast %468 : f32 to vector<16x128xf32>
    %c167 = arith.constant 167 : index
    %470 = memref.load %arg0[%c167] : memref<178xf32, #tpu.memory_space<smem>>
    %471 = vector.broadcast %470 : f32 to vector<16x128xf32>
    %c0_61 = arith.constant 0 : index
    %c7_62 = arith.constant 7 : index
    %c0_63 = arith.constant 0 : index
    %472 = vector.load %arg3[%c0_61, %c7_62, %c0_63] : memref<3x32x128xf32, #tpu.memory_space<vmem>>, vector<1x16x128xf32>
    %473 = vector.shape_cast %472 : vector<1x16x128xf32> to vector<16x128xf32>
    %c1_i32_64 = arith.constant 1 : i32
    %474 = tpu.dynamic_rotate %473 by %c1_i32_64 dim 1 : vector<16x128xf32>, i32 -> vector<16x128xf32>
    %475 = vector.broadcast %385 : f32 to vector<16x128xf32>
    %476 = arith.mulf %475, %474 : vector<16x128xf32>
    %477 = arith.addf %467, %476 : vector<16x128xf32>
    %478 = vector.broadcast %412 : f32 to vector<16x128xf32>
    %479 = arith.mulf %478, %474 : vector<16x128xf32>
    %480 = arith.addf %469, %479 : vector<16x128xf32>
    %481 = vector.broadcast %439 : f32 to vector<16x128xf32>
    %482 = arith.mulf %481, %474 : vector<16x128xf32>
    %483 = arith.addf %471, %482 : vector<16x128xf32>
    %484 = vector.broadcast %386 : f32 to vector<16x128xf32>
    %485 = arith.mulf %484, %473 : vector<16x128xf32>
    %486 = arith.addf %477, %485 : vector<16x128xf32>
    %487 = vector.broadcast %413 : f32 to vector<16x128xf32>
    %488 = arith.mulf %487, %473 : vector<16x128xf32>
    %489 = arith.addf %480, %488 : vector<16x128xf32>
    %490 = vector.broadcast %440 : f32 to vector<16x128xf32>
    %491 = arith.mulf %490, %473 : vector<16x128xf32>
    %492 = arith.addf %483, %491 : vector<16x128xf32>
    %c127_i32_65 = arith.constant 127 : i32
    %493 = tpu.dynamic_rotate %473 by %c127_i32_65 dim 1 : vector<16x128xf32>, i32 -> vector<16x128xf32>
    %494 = vector.broadcast %387 : f32 to vector<16x128xf32>
    %495 = arith.mulf %494, %493 : vector<16x128xf32>
    %496 = arith.addf %486, %495 : vector<16x128xf32>
    %497 = vector.broadcast %414 : f32 to vector<16x128xf32>
    %498 = arith.mulf %497, %493 : vector<16x128xf32>
    %499 = arith.addf %489, %498 : vector<16x128xf32>
    %500 = vector.broadcast %441 : f32 to vector<16x128xf32>
    %501 = arith.mulf %500, %493 : vector<16x128xf32>
    %502 = arith.addf %492, %501 : vector<16x128xf32>
    %c0_66 = arith.constant 0 : index
    %c8_67 = arith.constant 8 : index
    %c0_68 = arith.constant 0 : index
    %503 = vector.load %arg3[%c0_66, %c8_67, %c0_68] : memref<3x32x128xf32, #tpu.memory_space<vmem>>, vector<1x16x128xf32>
    %504 = vector.shape_cast %503 : vector<1x16x128xf32> to vector<16x128xf32>
    %c1_i32_69 = arith.constant 1 : i32
    %505 = tpu.dynamic_rotate %504 by %c1_i32_69 dim 1 : vector<16x128xf32>, i32 -> vector<16x128xf32>
    %506 = vector.broadcast %388 : f32 to vector<16x128xf32>
    %507 = arith.mulf %506, %505 : vector<16x128xf32>
    %508 = arith.addf %496, %507 : vector<16x128xf32>
    %509 = vector.broadcast %415 : f32 to vector<16x128xf32>
    %510 = arith.mulf %509, %505 : vector<16x128xf32>
    %511 = arith.addf %499, %510 : vector<16x128xf32>
    %512 = vector.broadcast %442 : f32 to vector<16x128xf32>
    %513 = arith.mulf %512, %505 : vector<16x128xf32>
    %514 = arith.addf %502, %513 : vector<16x128xf32>
    %515 = vector.broadcast %389 : f32 to vector<16x128xf32>
    %516 = arith.mulf %515, %504 : vector<16x128xf32>
    %517 = arith.addf %508, %516 : vector<16x128xf32>
    %518 = vector.broadcast %416 : f32 to vector<16x128xf32>
    %519 = arith.mulf %518, %504 : vector<16x128xf32>
    %520 = arith.addf %511, %519 : vector<16x128xf32>
    %521 = vector.broadcast %443 : f32 to vector<16x128xf32>
    %522 = arith.mulf %521, %504 : vector<16x128xf32>
    %523 = arith.addf %514, %522 : vector<16x128xf32>
    %c127_i32_70 = arith.constant 127 : i32
    %524 = tpu.dynamic_rotate %504 by %c127_i32_70 dim 1 : vector<16x128xf32>, i32 -> vector<16x128xf32>
    %525 = vector.broadcast %390 : f32 to vector<16x128xf32>
    %526 = arith.mulf %525, %524 : vector<16x128xf32>
    %527 = arith.addf %517, %526 : vector<16x128xf32>
    %528 = vector.broadcast %417 : f32 to vector<16x128xf32>
    %529 = arith.mulf %528, %524 : vector<16x128xf32>
    %530 = arith.addf %520, %529 : vector<16x128xf32>
    %531 = vector.broadcast %444 : f32 to vector<16x128xf32>
    %532 = arith.mulf %531, %524 : vector<16x128xf32>
    %533 = arith.addf %523, %532 : vector<16x128xf32>
    %c0_71 = arith.constant 0 : index
    %c9_72 = arith.constant 9 : index
    %c0_73 = arith.constant 0 : index
    %534 = vector.load %arg3[%c0_71, %c9_72, %c0_73] : memref<3x32x128xf32, #tpu.memory_space<vmem>>, vector<1x16x128xf32>
    %535 = vector.shape_cast %534 : vector<1x16x128xf32> to vector<16x128xf32>
    %c1_i32_74 = arith.constant 1 : i32
    %536 = tpu.dynamic_rotate %535 by %c1_i32_74 dim 1 : vector<16x128xf32>, i32 -> vector<16x128xf32>
    %537 = vector.broadcast %391 : f32 to vector<16x128xf32>
    %538 = arith.mulf %537, %536 : vector<16x128xf32>
    %539 = arith.addf %527, %538 : vector<16x128xf32>
    %540 = vector.broadcast %418 : f32 to vector<16x128xf32>
    %541 = arith.mulf %540, %536 : vector<16x128xf32>
    %542 = arith.addf %530, %541 : vector<16x128xf32>
    %543 = vector.broadcast %445 : f32 to vector<16x128xf32>
    %544 = arith.mulf %543, %536 : vector<16x128xf32>
    %545 = arith.addf %533, %544 : vector<16x128xf32>
    %546 = vector.broadcast %392 : f32 to vector<16x128xf32>
    %547 = arith.mulf %546, %535 : vector<16x128xf32>
    %548 = arith.addf %539, %547 : vector<16x128xf32>
    %549 = vector.broadcast %419 : f32 to vector<16x128xf32>
    %550 = arith.mulf %549, %535 : vector<16x128xf32>
    %551 = arith.addf %542, %550 : vector<16x128xf32>
    %552 = vector.broadcast %446 : f32 to vector<16x128xf32>
    %553 = arith.mulf %552, %535 : vector<16x128xf32>
    %554 = arith.addf %545, %553 : vector<16x128xf32>
    %c127_i32_75 = arith.constant 127 : i32
    %555 = tpu.dynamic_rotate %535 by %c127_i32_75 dim 1 : vector<16x128xf32>, i32 -> vector<16x128xf32>
    %556 = vector.broadcast %393 : f32 to vector<16x128xf32>
    %557 = arith.mulf %556, %555 : vector<16x128xf32>
    %558 = arith.addf %548, %557 : vector<16x128xf32>
    %559 = vector.broadcast %420 : f32 to vector<16x128xf32>
    %560 = arith.mulf %559, %555 : vector<16x128xf32>
    %561 = arith.addf %551, %560 : vector<16x128xf32>
    %562 = vector.broadcast %447 : f32 to vector<16x128xf32>
    %563 = arith.mulf %562, %555 : vector<16x128xf32>
    %564 = arith.addf %554, %563 : vector<16x128xf32>
    %c1_76 = arith.constant 1 : index
    %c7_77 = arith.constant 7 : index
    %c0_78 = arith.constant 0 : index
    %565 = vector.load %arg3[%c1_76, %c7_77, %c0_78] : memref<3x32x128xf32, #tpu.memory_space<vmem>>, vector<1x16x128xf32>
    %566 = vector.shape_cast %565 : vector<1x16x128xf32> to vector<16x128xf32>
    %c1_i32_79 = arith.constant 1 : i32
    %567 = tpu.dynamic_rotate %566 by %c1_i32_79 dim 1 : vector<16x128xf32>, i32 -> vector<16x128xf32>
    %568 = vector.broadcast %394 : f32 to vector<16x128xf32>
    %569 = arith.mulf %568, %567 : vector<16x128xf32>
    %570 = arith.addf %558, %569 : vector<16x128xf32>
    %571 = vector.broadcast %421 : f32 to vector<16x128xf32>
    %572 = arith.mulf %571, %567 : vector<16x128xf32>
    %573 = arith.addf %561, %572 : vector<16x128xf32>
    %574 = vector.broadcast %448 : f32 to vector<16x128xf32>
    %575 = arith.mulf %574, %567 : vector<16x128xf32>
    %576 = arith.addf %564, %575 : vector<16x128xf32>
    %577 = vector.broadcast %395 : f32 to vector<16x128xf32>
    %578 = arith.mulf %577, %566 : vector<16x128xf32>
    %579 = arith.addf %570, %578 : vector<16x128xf32>
    %580 = vector.broadcast %422 : f32 to vector<16x128xf32>
    %581 = arith.mulf %580, %566 : vector<16x128xf32>
    %582 = arith.addf %573, %581 : vector<16x128xf32>
    %583 = vector.broadcast %449 : f32 to vector<16x128xf32>
    %584 = arith.mulf %583, %566 : vector<16x128xf32>
    %585 = arith.addf %576, %584 : vector<16x128xf32>
    %c127_i32_80 = arith.constant 127 : i32
    %586 = tpu.dynamic_rotate %566 by %c127_i32_80 dim 1 : vector<16x128xf32>, i32 -> vector<16x128xf32>
    %587 = vector.broadcast %396 : f32 to vector<16x128xf32>
    %588 = arith.mulf %587, %586 : vector<16x128xf32>
    %589 = arith.addf %579, %588 : vector<16x128xf32>
    %590 = vector.broadcast %423 : f32 to vector<16x128xf32>
    %591 = arith.mulf %590, %586 : vector<16x128xf32>
    %592 = arith.addf %582, %591 : vector<16x128xf32>
    %593 = vector.broadcast %450 : f32 to vector<16x128xf32>
    %594 = arith.mulf %593, %586 : vector<16x128xf32>
    %595 = arith.addf %585, %594 : vector<16x128xf32>
    %c1_81 = arith.constant 1 : index
    %c8_82 = arith.constant 8 : index
    %c0_83 = arith.constant 0 : index
    %596 = vector.load %arg3[%c1_81, %c8_82, %c0_83] : memref<3x32x128xf32, #tpu.memory_space<vmem>>, vector<1x16x128xf32>
    %597 = vector.shape_cast %596 : vector<1x16x128xf32> to vector<16x128xf32>
    %c1_i32_84 = arith.constant 1 : i32
    %598 = tpu.dynamic_rotate %597 by %c1_i32_84 dim 1 : vector<16x128xf32>, i32 -> vector<16x128xf32>
    %599 = vector.broadcast %397 : f32 to vector<16x128xf32>
    %600 = arith.mulf %599, %598 : vector<16x128xf32>
    %601 = arith.addf %589, %600 : vector<16x128xf32>
    %602 = vector.broadcast %424 : f32 to vector<16x128xf32>
    %603 = arith.mulf %602, %598 : vector<16x128xf32>
    %604 = arith.addf %592, %603 : vector<16x128xf32>
    %605 = vector.broadcast %451 : f32 to vector<16x128xf32>
    %606 = arith.mulf %605, %598 : vector<16x128xf32>
    %607 = arith.addf %595, %606 : vector<16x128xf32>
    %608 = vector.broadcast %398 : f32 to vector<16x128xf32>
    %609 = arith.mulf %608, %597 : vector<16x128xf32>
    %610 = arith.addf %601, %609 : vector<16x128xf32>
    %611 = vector.broadcast %425 : f32 to vector<16x128xf32>
    %612 = arith.mulf %611, %597 : vector<16x128xf32>
    %613 = arith.addf %604, %612 : vector<16x128xf32>
    %614 = vector.broadcast %452 : f32 to vector<16x128xf32>
    %615 = arith.mulf %614, %597 : vector<16x128xf32>
    %616 = arith.addf %607, %615 : vector<16x128xf32>
    %c127_i32_85 = arith.constant 127 : i32
    %617 = tpu.dynamic_rotate %597 by %c127_i32_85 dim 1 : vector<16x128xf32>, i32 -> vector<16x128xf32>
    %618 = vector.broadcast %399 : f32 to vector<16x128xf32>
    %619 = arith.mulf %618, %617 : vector<16x128xf32>
    %620 = arith.addf %610, %619 : vector<16x128xf32>
    %621 = vector.broadcast %426 : f32 to vector<16x128xf32>
    %622 = arith.mulf %621, %617 : vector<16x128xf32>
    %623 = arith.addf %613, %622 : vector<16x128xf32>
    %624 = vector.broadcast %453 : f32 to vector<16x128xf32>
    %625 = arith.mulf %624, %617 : vector<16x128xf32>
    %626 = arith.addf %616, %625 : vector<16x128xf32>
    %c1_86 = arith.constant 1 : index
    %c9_87 = arith.constant 9 : index
    %c0_88 = arith.constant 0 : index
    %627 = vector.load %arg3[%c1_86, %c9_87, %c0_88] : memref<3x32x128xf32, #tpu.memory_space<vmem>>, vector<1x16x128xf32>
    %628 = vector.shape_cast %627 : vector<1x16x128xf32> to vector<16x128xf32>
    %c1_i32_89 = arith.constant 1 : i32
    %629 = tpu.dynamic_rotate %628 by %c1_i32_89 dim 1 : vector<16x128xf32>, i32 -> vector<16x128xf32>
    %630 = vector.broadcast %400 : f32 to vector<16x128xf32>
    %631 = arith.mulf %630, %629 : vector<16x128xf32>
    %632 = arith.addf %620, %631 : vector<16x128xf32>
    %633 = vector.broadcast %427 : f32 to vector<16x128xf32>
    %634 = arith.mulf %633, %629 : vector<16x128xf32>
    %635 = arith.addf %623, %634 : vector<16x128xf32>
    %636 = vector.broadcast %454 : f32 to vector<16x128xf32>
    %637 = arith.mulf %636, %629 : vector<16x128xf32>
    %638 = arith.addf %626, %637 : vector<16x128xf32>
    %639 = vector.broadcast %401 : f32 to vector<16x128xf32>
    %640 = arith.mulf %639, %628 : vector<16x128xf32>
    %641 = arith.addf %632, %640 : vector<16x128xf32>
    %642 = vector.broadcast %428 : f32 to vector<16x128xf32>
    %643 = arith.mulf %642, %628 : vector<16x128xf32>
    %644 = arith.addf %635, %643 : vector<16x128xf32>
    %645 = vector.broadcast %455 : f32 to vector<16x128xf32>
    %646 = arith.mulf %645, %628 : vector<16x128xf32>
    %647 = arith.addf %638, %646 : vector<16x128xf32>
    %c127_i32_90 = arith.constant 127 : i32
    %648 = tpu.dynamic_rotate %628 by %c127_i32_90 dim 1 : vector<16x128xf32>, i32 -> vector<16x128xf32>
    %649 = vector.broadcast %402 : f32 to vector<16x128xf32>
    %650 = arith.mulf %649, %648 : vector<16x128xf32>
    %651 = arith.addf %641, %650 : vector<16x128xf32>
    %652 = vector.broadcast %429 : f32 to vector<16x128xf32>
    %653 = arith.mulf %652, %648 : vector<16x128xf32>
    %654 = arith.addf %644, %653 : vector<16x128xf32>
    %655 = vector.broadcast %456 : f32 to vector<16x128xf32>
    %656 = arith.mulf %655, %648 : vector<16x128xf32>
    %657 = arith.addf %647, %656 : vector<16x128xf32>
    %c2_91 = arith.constant 2 : index
    %c7_92 = arith.constant 7 : index
    %c0_93 = arith.constant 0 : index
    %658 = vector.load %arg3[%c2_91, %c7_92, %c0_93] : memref<3x32x128xf32, #tpu.memory_space<vmem>>, vector<1x16x128xf32>
    %659 = vector.shape_cast %658 : vector<1x16x128xf32> to vector<16x128xf32>
    %c1_i32_94 = arith.constant 1 : i32
    %660 = tpu.dynamic_rotate %659 by %c1_i32_94 dim 1 : vector<16x128xf32>, i32 -> vector<16x128xf32>
    %661 = vector.broadcast %403 : f32 to vector<16x128xf32>
    %662 = arith.mulf %661, %660 : vector<16x128xf32>
    %663 = arith.addf %651, %662 : vector<16x128xf32>
    %664 = vector.broadcast %430 : f32 to vector<16x128xf32>
    %665 = arith.mulf %664, %660 : vector<16x128xf32>
    %666 = arith.addf %654, %665 : vector<16x128xf32>
    %667 = vector.broadcast %457 : f32 to vector<16x128xf32>
    %668 = arith.mulf %667, %660 : vector<16x128xf32>
    %669 = arith.addf %657, %668 : vector<16x128xf32>
    %670 = vector.broadcast %404 : f32 to vector<16x128xf32>
    %671 = arith.mulf %670, %659 : vector<16x128xf32>
    %672 = arith.addf %663, %671 : vector<16x128xf32>
    %673 = vector.broadcast %431 : f32 to vector<16x128xf32>
    %674 = arith.mulf %673, %659 : vector<16x128xf32>
    %675 = arith.addf %666, %674 : vector<16x128xf32>
    %676 = vector.broadcast %458 : f32 to vector<16x128xf32>
    %677 = arith.mulf %676, %659 : vector<16x128xf32>
    %678 = arith.addf %669, %677 : vector<16x128xf32>
    %c127_i32_95 = arith.constant 127 : i32
    %679 = tpu.dynamic_rotate %659 by %c127_i32_95 dim 1 : vector<16x128xf32>, i32 -> vector<16x128xf32>
    %680 = vector.broadcast %405 : f32 to vector<16x128xf32>
    %681 = arith.mulf %680, %679 : vector<16x128xf32>
    %682 = arith.addf %672, %681 : vector<16x128xf32>
    %683 = vector.broadcast %432 : f32 to vector<16x128xf32>
    %684 = arith.mulf %683, %679 : vector<16x128xf32>
    %685 = arith.addf %675, %684 : vector<16x128xf32>
    %686 = vector.broadcast %459 : f32 to vector<16x128xf32>
    %687 = arith.mulf %686, %679 : vector<16x128xf32>
    %688 = arith.addf %678, %687 : vector<16x128xf32>
    %c2_96 = arith.constant 2 : index
    %c8_97 = arith.constant 8 : index
    %c0_98 = arith.constant 0 : index
    %689 = vector.load %arg3[%c2_96, %c8_97, %c0_98] : memref<3x32x128xf32, #tpu.memory_space<vmem>>, vector<1x16x128xf32>
    %690 = vector.shape_cast %689 : vector<1x16x128xf32> to vector<16x128xf32>
    %c1_i32_99 = arith.constant 1 : i32
    %691 = tpu.dynamic_rotate %690 by %c1_i32_99 dim 1 : vector<16x128xf32>, i32 -> vector<16x128xf32>
    %692 = vector.broadcast %406 : f32 to vector<16x128xf32>
    %693 = arith.mulf %692, %691 : vector<16x128xf32>
    %694 = arith.addf %682, %693 : vector<16x128xf32>
    %695 = vector.broadcast %433 : f32 to vector<16x128xf32>
    %696 = arith.mulf %695, %691 : vector<16x128xf32>
    %697 = arith.addf %685, %696 : vector<16x128xf32>
    %698 = vector.broadcast %460 : f32 to vector<16x128xf32>
    %699 = arith.mulf %698, %691 : vector<16x128xf32>
    %700 = arith.addf %688, %699 : vector<16x128xf32>
    %701 = vector.broadcast %407 : f32 to vector<16x128xf32>
    %702 = arith.mulf %701, %690 : vector<16x128xf32>
    %703 = arith.addf %694, %702 : vector<16x128xf32>
    %704 = vector.broadcast %434 : f32 to vector<16x128xf32>
    %705 = arith.mulf %704, %690 : vector<16x128xf32>
    %706 = arith.addf %697, %705 : vector<16x128xf32>
    %707 = vector.broadcast %461 : f32 to vector<16x128xf32>
    %708 = arith.mulf %707, %690 : vector<16x128xf32>
    %709 = arith.addf %700, %708 : vector<16x128xf32>
    %c127_i32_100 = arith.constant 127 : i32
    %710 = tpu.dynamic_rotate %690 by %c127_i32_100 dim 1 : vector<16x128xf32>, i32 -> vector<16x128xf32>
    %711 = vector.broadcast %408 : f32 to vector<16x128xf32>
    %712 = arith.mulf %711, %710 : vector<16x128xf32>
    %713 = arith.addf %703, %712 : vector<16x128xf32>
    %714 = vector.broadcast %435 : f32 to vector<16x128xf32>
    %715 = arith.mulf %714, %710 : vector<16x128xf32>
    %716 = arith.addf %706, %715 : vector<16x128xf32>
    %717 = vector.broadcast %462 : f32 to vector<16x128xf32>
    %718 = arith.mulf %717, %710 : vector<16x128xf32>
    %719 = arith.addf %709, %718 : vector<16x128xf32>
    %c2_101 = arith.constant 2 : index
    %c9_102 = arith.constant 9 : index
    %c0_103 = arith.constant 0 : index
    %720 = vector.load %arg3[%c2_101, %c9_102, %c0_103] : memref<3x32x128xf32, #tpu.memory_space<vmem>>, vector<1x16x128xf32>
    %721 = vector.shape_cast %720 : vector<1x16x128xf32> to vector<16x128xf32>
    %c1_i32_104 = arith.constant 1 : i32
    %722 = tpu.dynamic_rotate %721 by %c1_i32_104 dim 1 : vector<16x128xf32>, i32 -> vector<16x128xf32>
    %723 = vector.broadcast %409 : f32 to vector<16x128xf32>
    %724 = arith.mulf %723, %722 : vector<16x128xf32>
    %725 = arith.addf %713, %724 : vector<16x128xf32>
    %726 = vector.broadcast %436 : f32 to vector<16x128xf32>
    %727 = arith.mulf %726, %722 : vector<16x128xf32>
    %728 = arith.addf %716, %727 : vector<16x128xf32>
    %729 = vector.broadcast %463 : f32 to vector<16x128xf32>
    %730 = arith.mulf %729, %722 : vector<16x128xf32>
    %731 = arith.addf %719, %730 : vector<16x128xf32>
    %732 = vector.broadcast %410 : f32 to vector<16x128xf32>
    %733 = arith.mulf %732, %721 : vector<16x128xf32>
    %734 = arith.addf %725, %733 : vector<16x128xf32>
    %735 = vector.broadcast %437 : f32 to vector<16x128xf32>
    %736 = arith.mulf %735, %721 : vector<16x128xf32>
    %737 = arith.addf %728, %736 : vector<16x128xf32>
    %738 = vector.broadcast %464 : f32 to vector<16x128xf32>
    %739 = arith.mulf %738, %721 : vector<16x128xf32>
    %740 = arith.addf %731, %739 : vector<16x128xf32>
    %c127_i32_105 = arith.constant 127 : i32
    %741 = tpu.dynamic_rotate %721 by %c127_i32_105 dim 1 : vector<16x128xf32>, i32 -> vector<16x128xf32>
    %742 = vector.broadcast %411 : f32 to vector<16x128xf32>
    %743 = arith.mulf %742, %741 : vector<16x128xf32>
    %744 = arith.addf %734, %743 : vector<16x128xf32>
    %745 = vector.broadcast %438 : f32 to vector<16x128xf32>
    %746 = arith.mulf %745, %741 : vector<16x128xf32>
    %747 = arith.addf %737, %746 : vector<16x128xf32>
    %748 = vector.broadcast %465 : f32 to vector<16x128xf32>
    %749 = arith.mulf %748, %741 : vector<16x128xf32>
    %750 = arith.addf %740, %749 : vector<16x128xf32>
    %751 = arith.mulf %744, %1 : vector<16x128xf32>
    %752 = arith.mulf %747, %1 : vector<16x128xf32>
    %753 = arith.mulf %750, %1 : vector<16x128xf32>
    %754 = arith.mulf %751, %3 : vector<16x128xf32>
    %755 = vector.shape_cast %754 : vector<16x128xf32> to vector<1x16x128xf32>
    %cst_106 = arith.constant dense<0.000000e+00> : vector<1xf32>
    %756 = vector.multi_reduction <add>, %755, %cst_106 [1, 2] : vector<1x16x128xf32> to vector<1xf32>
    %757 = vector.shape_cast %756 : vector<1xf32> to vector<1x1x1xf32>
    %758 = vector.extract %757[0, 0, 0] : f32 from vector<1x1x1xf32>
    %759 = vector.shape_cast %751 : vector<16x128xf32> to vector<1x16x128xf32>
    %cst_107 = arith.constant dense<0.000000e+00> : vector<1xf32>
    %760 = vector.multi_reduction <add>, %759, %cst_107 [1, 2] : vector<1x16x128xf32> to vector<1xf32>
    %761 = vector.shape_cast %760 : vector<1xf32> to vector<1x1x1xf32>
    %762 = vector.extract %761[0, 0, 0] : f32 from vector<1x1x1xf32>
    %cst_108 = arith.constant 0.001953125 : f32
    %763 = arith.mulf %758, %cst_108 : f32
    %764 = arith.subf %762, %758 : f32
    %cst_109 = arith.constant 0.001953125 : f32
    %765 = arith.mulf %764, %cst_109 : f32
    %766 = vector.broadcast %763 : f32 to vector<16x128xf32>
    %767 = arith.mulf %766, %3 : vector<16x128xf32>
    %768 = vector.broadcast %765 : f32 to vector<16x128xf32>
    %769 = arith.mulf %768, %4 : vector<16x128xf32>
    %770 = arith.addf %767, %769 : vector<16x128xf32>
    %771 = arith.subf %751, %770 : vector<16x128xf32>
    %772 = arith.mulf %771, %771 : vector<16x128xf32>
    %773 = arith.mulf %772, %3 : vector<16x128xf32>
    %774 = vector.shape_cast %773 : vector<16x128xf32> to vector<1x16x128xf32>
    %cst_110 = arith.constant dense<0.000000e+00> : vector<1xf32>
    %775 = vector.multi_reduction <add>, %774, %cst_110 [1, 2] : vector<1x16x128xf32> to vector<1xf32>
    %776 = vector.shape_cast %775 : vector<1xf32> to vector<1x1x1xf32>
    %777 = vector.extract %776[0, 0, 0] : f32 from vector<1x1x1xf32>
    %778 = vector.shape_cast %772 : vector<16x128xf32> to vector<1x16x128xf32>
    %cst_111 = arith.constant dense<0.000000e+00> : vector<1xf32>
    %779 = vector.multi_reduction <add>, %778, %cst_111 [1, 2] : vector<1x16x128xf32> to vector<1xf32>
    %780 = vector.shape_cast %779 : vector<1xf32> to vector<1x1x1xf32>
    %781 = vector.extract %780[0, 0, 0] : f32 from vector<1x1x1xf32>
    %cst_112 = arith.constant 0.001953125 : f32
    %782 = arith.mulf %777, %cst_112 : f32
    %cst_113 = arith.constant 9.99999974E-6 : f32
    %783 = arith.addf %782, %cst_113 : f32
    %784 = math.rsqrt %783 : f32
    %785 = arith.subf %781, %777 : f32
    %cst_114 = arith.constant 0.001953125 : f32
    %786 = arith.mulf %785, %cst_114 : f32
    %cst_115 = arith.constant 9.99999974E-6 : f32
    %787 = arith.addf %786, %cst_115 : f32
    %788 = math.rsqrt %787 : f32
    %c168 = arith.constant 168 : index
    %789 = memref.load %arg0[%c168] : memref<178xf32, #tpu.memory_space<smem>>
    %790 = arith.mulf %789, %784 : f32
    %791 = vector.broadcast %790 : f32 to vector<16x128xf32>
    %792 = arith.mulf %791, %3 : vector<16x128xf32>
    %793 = arith.mulf %789, %788 : f32
    %794 = vector.broadcast %793 : f32 to vector<16x128xf32>
    %795 = arith.mulf %794, %4 : vector<16x128xf32>
    %796 = arith.addf %792, %795 : vector<16x128xf32>
    %797 = arith.mulf %771, %796 : vector<16x128xf32>
    %c171 = arith.constant 171 : index
    %798 = memref.load %arg0[%c171] : memref<178xf32, #tpu.memory_space<smem>>
    %799 = vector.broadcast %798 : f32 to vector<16x128xf32>
    %800 = arith.addf %797, %799 : vector<16x128xf32>
    %801 = arith.mulf %752, %3 : vector<16x128xf32>
    %802 = vector.shape_cast %801 : vector<16x128xf32> to vector<1x16x128xf32>
    %cst_116 = arith.constant dense<0.000000e+00> : vector<1xf32>
    %803 = vector.multi_reduction <add>, %802, %cst_116 [1, 2] : vector<1x16x128xf32> to vector<1xf32>
    %804 = vector.shape_cast %803 : vector<1xf32> to vector<1x1x1xf32>
    %805 = vector.extract %804[0, 0, 0] : f32 from vector<1x1x1xf32>
    %806 = vector.shape_cast %752 : vector<16x128xf32> to vector<1x16x128xf32>
    %cst_117 = arith.constant dense<0.000000e+00> : vector<1xf32>
    %807 = vector.multi_reduction <add>, %806, %cst_117 [1, 2] : vector<1x16x128xf32> to vector<1xf32>
    %808 = vector.shape_cast %807 : vector<1xf32> to vector<1x1x1xf32>
    %809 = vector.extract %808[0, 0, 0] : f32 from vector<1x1x1xf32>
    %cst_118 = arith.constant 0.001953125 : f32
    %810 = arith.mulf %805, %cst_118 : f32
    %811 = arith.subf %809, %805 : f32
    %cst_119 = arith.constant 0.001953125 : f32
    %812 = arith.mulf %811, %cst_119 : f32
    %813 = vector.broadcast %810 : f32 to vector<16x128xf32>
    %814 = arith.mulf %813, %3 : vector<16x128xf32>
    %815 = vector.broadcast %812 : f32 to vector<16x128xf32>
    %816 = arith.mulf %815, %4 : vector<16x128xf32>
    %817 = arith.addf %814, %816 : vector<16x128xf32>
    %818 = arith.subf %752, %817 : vector<16x128xf32>
    %819 = arith.mulf %818, %818 : vector<16x128xf32>
    %820 = arith.mulf %819, %3 : vector<16x128xf32>
    %821 = vector.shape_cast %820 : vector<16x128xf32> to vector<1x16x128xf32>
    %cst_120 = arith.constant dense<0.000000e+00> : vector<1xf32>
    %822 = vector.multi_reduction <add>, %821, %cst_120 [1, 2] : vector<1x16x128xf32> to vector<1xf32>
    %823 = vector.shape_cast %822 : vector<1xf32> to vector<1x1x1xf32>
    %824 = vector.extract %823[0, 0, 0] : f32 from vector<1x1x1xf32>
    %825 = vector.shape_cast %819 : vector<16x128xf32> to vector<1x16x128xf32>
    %cst_121 = arith.constant dense<0.000000e+00> : vector<1xf32>
    %826 = vector.multi_reduction <add>, %825, %cst_121 [1, 2] : vector<1x16x128xf32> to vector<1xf32>
    %827 = vector.shape_cast %826 : vector<1xf32> to vector<1x1x1xf32>
    %828 = vector.extract %827[0, 0, 0] : f32 from vector<1x1x1xf32>
    %cst_122 = arith.constant 0.001953125 : f32
    %829 = arith.mulf %824, %cst_122 : f32
    %cst_123 = arith.constant 9.99999974E-6 : f32
    %830 = arith.addf %829, %cst_123 : f32
    %831 = math.rsqrt %830 : f32
    %832 = arith.subf %828, %824 : f32
    %cst_124 = arith.constant 0.001953125 : f32
    %833 = arith.mulf %832, %cst_124 : f32
    %cst_125 = arith.constant 9.99999974E-6 : f32
    %834 = arith.addf %833, %cst_125 : f32
    %835 = math.rsqrt %834 : f32
    %c169 = arith.constant 169 : index
    %836 = memref.load %arg0[%c169] : memref<178xf32, #tpu.memory_space<smem>>
    %837 = arith.mulf %836, %831 : f32
    %838 = vector.broadcast %837 : f32 to vector<16x128xf32>
    %839 = arith.mulf %838, %3 : vector<16x128xf32>
    %840 = arith.mulf %836, %835 : f32
    %841 = vector.broadcast %840 : f32 to vector<16x128xf32>
    %842 = arith.mulf %841, %4 : vector<16x128xf32>
    %843 = arith.addf %839, %842 : vector<16x128xf32>
    %844 = arith.mulf %818, %843 : vector<16x128xf32>
    %c172 = arith.constant 172 : index
    %845 = memref.load %arg0[%c172] : memref<178xf32, #tpu.memory_space<smem>>
    %846 = vector.broadcast %845 : f32 to vector<16x128xf32>
    %847 = arith.addf %844, %846 : vector<16x128xf32>
    %848 = arith.mulf %753, %3 : vector<16x128xf32>
    %849 = vector.shape_cast %848 : vector<16x128xf32> to vector<1x16x128xf32>
    %cst_126 = arith.constant dense<0.000000e+00> : vector<1xf32>
    %850 = vector.multi_reduction <add>, %849, %cst_126 [1, 2] : vector<1x16x128xf32> to vector<1xf32>
    %851 = vector.shape_cast %850 : vector<1xf32> to vector<1x1x1xf32>
    %852 = vector.extract %851[0, 0, 0] : f32 from vector<1x1x1xf32>
    %853 = vector.shape_cast %753 : vector<16x128xf32> to vector<1x16x128xf32>
    %cst_127 = arith.constant dense<0.000000e+00> : vector<1xf32>
    %854 = vector.multi_reduction <add>, %853, %cst_127 [1, 2] : vector<1x16x128xf32> to vector<1xf32>
    %855 = vector.shape_cast %854 : vector<1xf32> to vector<1x1x1xf32>
    %856 = vector.extract %855[0, 0, 0] : f32 from vector<1x1x1xf32>
    %cst_128 = arith.constant 0.001953125 : f32
    %857 = arith.mulf %852, %cst_128 : f32
    %858 = arith.subf %856, %852 : f32
    %cst_129 = arith.constant 0.001953125 : f32
    %859 = arith.mulf %858, %cst_129 : f32
    %860 = vector.broadcast %857 : f32 to vector<16x128xf32>
    %861 = arith.mulf %860, %3 : vector<16x128xf32>
    %862 = vector.broadcast %859 : f32 to vector<16x128xf32>
    %863 = arith.mulf %862, %4 : vector<16x128xf32>
    %864 = arith.addf %861, %863 : vector<16x128xf32>
    %865 = arith.subf %753, %864 : vector<16x128xf32>
    %866 = arith.mulf %865, %865 : vector<16x128xf32>
    %867 = arith.mulf %866, %3 : vector<16x128xf32>
    %868 = vector.shape_cast %867 : vector<16x128xf32> to vector<1x16x128xf32>
    %cst_130 = arith.constant dense<0.000000e+00> : vector<1xf32>
    %869 = vector.multi_reduction <add>, %868, %cst_130 [1, 2] : vector<1x16x128xf32> to vector<1xf32>
    %870 = vector.shape_cast %869 : vector<1xf32> to vector<1x1x1xf32>
    %871 = vector.extract %870[0, 0, 0] : f32 from vector<1x1x1xf32>
    %872 = vector.shape_cast %866 : vector<16x128xf32> to vector<1x16x128xf32>
    %cst_131 = arith.constant dense<0.000000e+00> : vector<1xf32>
    %873 = vector.multi_reduction <add>, %872, %cst_131 [1, 2] : vector<1x16x128xf32> to vector<1xf32>
    %874 = vector.shape_cast %873 : vector<1xf32> to vector<1x1x1xf32>
    %875 = vector.extract %874[0, 0, 0] : f32 from vector<1x1x1xf32>
    %cst_132 = arith.constant 0.001953125 : f32
    %876 = arith.mulf %871, %cst_132 : f32
    %cst_133 = arith.constant 9.99999974E-6 : f32
    %877 = arith.addf %876, %cst_133 : f32
    %878 = math.rsqrt %877 : f32
    %879 = arith.subf %875, %871 : f32
    %cst_134 = arith.constant 0.001953125 : f32
    %880 = arith.mulf %879, %cst_134 : f32
    %cst_135 = arith.constant 9.99999974E-6 : f32
    %881 = arith.addf %880, %cst_135 : f32
    %882 = math.rsqrt %881 : f32
    %c170 = arith.constant 170 : index
    %883 = memref.load %arg0[%c170] : memref<178xf32, #tpu.memory_space<smem>>
    %884 = arith.mulf %883, %878 : f32
    %885 = vector.broadcast %884 : f32 to vector<16x128xf32>
    %886 = arith.mulf %885, %3 : vector<16x128xf32>
    %887 = arith.mulf %883, %882 : f32
    %888 = vector.broadcast %887 : f32 to vector<16x128xf32>
    %889 = arith.mulf %888, %4 : vector<16x128xf32>
    %890 = arith.addf %886, %889 : vector<16x128xf32>
    %891 = arith.mulf %865, %890 : vector<16x128xf32>
    %c173 = arith.constant 173 : index
    %892 = memref.load %arg0[%c173] : memref<178xf32, #tpu.memory_space<smem>>
    %893 = vector.broadcast %892 : f32 to vector<16x128xf32>
    %894 = arith.addf %891, %893 : vector<16x128xf32>
    %c177 = arith.constant 177 : index
    %895 = memref.load %arg0[%c177] : memref<178xf32, #tpu.memory_space<smem>>
    %896 = vector.broadcast %895 : f32 to vector<16x128xf32>
    %c174 = arith.constant 174 : index
    %897 = memref.load %arg0[%c174] : memref<178xf32, #tpu.memory_space<smem>>
    %898 = vector.broadcast %897 : f32 to vector<16x128xf32>
    %899 = arith.mulf %898, %800 : vector<16x128xf32>
    %900 = arith.addf %896, %899 : vector<16x128xf32>
    %c175 = arith.constant 175 : index
    %901 = memref.load %arg0[%c175] : memref<178xf32, #tpu.memory_space<smem>>
    %902 = vector.broadcast %901 : f32 to vector<16x128xf32>
    %903 = arith.mulf %902, %847 : vector<16x128xf32>
    %904 = arith.addf %900, %903 : vector<16x128xf32>
    %c176 = arith.constant 176 : index
    %905 = memref.load %arg0[%c176] : memref<178xf32, #tpu.memory_space<smem>>
    %906 = vector.broadcast %905 : f32 to vector<16x128xf32>
    %907 = arith.mulf %906, %894 : vector<16x128xf32>
    %908 = arith.addf %904, %907 : vector<16x128xf32>
    %c92_i32 = arith.constant 92 : i32
    %909 = tpu.dynamic_rotate %908 by %c92_i32 dim 1 : vector<16x128xf32>, i32 -> vector<16x128xf32>
    %c3_136 = arith.constant 3 : index
    %c8_137 = arith.constant 8 : index
    %c0_138 = arith.constant 0 : index
    %910 = vector.load %arg1[%c3_136, %c8_137, %c0_138] : memref<6x32x128xf32, #tpu.memory_space<vmem>>, vector<1x16x128xf32>
    %911 = vector.shape_cast %910 : vector<1x16x128xf32> to vector<16x128xf32>
    %912 = arith.addf %908, %909 : vector<16x128xf32>
    %913 = arith.subf %912, %911 : vector<16x128xf32>
    %914 = math.absf %913 : vector<16x128xf32>
    %915 = arith.mulf %914, %3 : vector<16x128xf32>
    %916 = vector.shape_cast %915 : vector<16x128xf32> to vector<1x16x128xf32>
    %cst_139 = arith.constant dense<0.000000e+00> : vector<1xf32>
    %917 = vector.multi_reduction <add>, %916, %cst_139 [1, 2] : vector<1x16x128xf32> to vector<1xf32>
    %918 = vector.shape_cast %917 : vector<1xf32> to vector<1x1x1xf32>
    %919 = vector.extract %918[0, 0, 0] : f32 from vector<1x1x1xf32>
    %cst_140 = arith.constant 0.001953125 : f32
    %920 = arith.mulf %919, %cst_140 : f32
    %c0_141 = arith.constant 0 : index
    %921 = memref.load %arg2[%c0_141] : memref<1xf32, #tpu.memory_space<smem>>
    memref.store %920, %arg2[%c0_141] : memref<1xf32, #tpu.memory_space<smem>>
    return
  }
}

</mosaic_0001>

<bundles_post_ra>
// kernel: conv_bn_and_loss.1
= control target key start
LH: loop header
LB: loop body
LE: loop exit
PB: predicated region body
PF: predicated region fallthrough
CT: control target
= control target key end

     0   :  { %s3739_s0 = inlined_call_operand.vmem [shape: f32[178], index: 0, kind: input, shape index: {}]   ;;  %s3740_s1 = inlined_call_operand.vmem [shape: f32[6,32,128], index: 1, kind: input, shape index: {}]   ;;  %s3741_s2 = inlined_call_operand.hbm [shape: f32[1], index: 2, kind: output, shape index: {}]  }
   0x1   :  { %3870 = sst [smem:[#allocation56_spill]] %s3740_s1 }
   0x2   :  { %3871 = sst [smem:[#allocation57_spill]] %s3741_s2 }
   0x3   :  { %7 = vsyncpa [#allocation5], 0 }
   0x4   :  { %8 = vsyncpa [#allocation4], 0  ;;  %s15_s11 = sshll.u32 %s3739_s0, 4  ;;  %s16_s11 = int_to_ptr.vmem [resolvable:$true] %s15_s11 }
   0x5   :  { %s1809_s12 = scalar_lea.vmem %s16_s11, 32  ;;  %p1814_p1 = scmp.lt.s32.totalorder %s16_s11, %s16_s11 }
   0x6   :  { %p1810_p0 = scmp.ne.s32.totalorder %s16_s11, %s1809_s12  ;;  %p1815_p2 = scmp.lt.s32.totalorder %s1809_s12, %s1809_s12 }
   0x8   :  { %p1816_p3 = por %p1815_p2, %p1814_p1 }
   0xa   :  { %p1817_p4 = pnand %p1816_p3, %p1810_p0 }
   0xc   :  { %1820 = shalt.err (!%p1817_p4)
}
   0xd   :  { %s1835_s13 = smov [#allocation3]  }
   0xe   :  { %18 = dma.vmem_to_smem %s16_s11, 32, %s1835_s13, [#allocation5]  }
   0xf   :  { %1831 = dma.done.wait [#allocation5], 32  }
  0x10   :  { %1832 = vsyncadd [#allocation5], 4294967264 }
  0x11   :  { %24 = sfence }
  0x12   :  { %v1862_v0 = vld [vmem:[%s3740_s1 + $0x7] sm:$0xff]  ;;  %s3742_s16 = smov 127   ;;  %s3744_s0 = smov 1   ;;  %v1871_v1 = vld [vmem:[%s3740_s1 + $0xf] sm:$0xff]  ;;  %v1838_v16 = vmov 0.0  }
  0x13   :  { %156 = vrot.lane.b32.xlu1 %v1862_v0, %s3742_s16  ;;  %122 = vrot.lane.b32.xlu0 %v1862_v0, %s3744_s0  ;;  %v1880_v2 = vld [vmem:[%s3740_s1 + $0x10] sm:$0xff]  ;;  %v1885_v3 = vld [vmem:[%s3740_s1 + $0x8] sm:$0xff]  ;;  %623 = vst [vmem:[#allocation2] sm:$0xff] %v1838_v16  ;;  %626 = vst [vmem:[#allocation2 + $0x18] sm:$0xff] %v1838_v16  ;;  %s2021_s24 = sld [smem:[#allocation3 + $0x2]]  ;;  %s2023_s25 = sld [smem:[#allocation3 + $0x1d]] }
  0x14   :  { %v1898_v4 = vld [vmem:[%s3740_s1 + $0x11] sm:$0xff]  ;;  %v1903_v5 = vld [vmem:[%s3740_s1 + $0x9] sm:$0xff]  ;;  %627 = vst [vmem:[#allocation2 + $0x20] sm:$0xff] %v1838_v16  ;;  %630 = vst [vmem:[#allocation2 + $0x38] sm:$0xff] %v1838_v16  ;;  %s2025_s26 = sld [smem:[#allocation3 + $0x38]]  ;;  %s2029_s28 = sld [smem:[#allocation3 + $0x1]] }
  0x15   :  { %v1916_v6 = vld [vmem:[%s3740_s1 + $0x2f] sm:$0xff]  ;;  %v1921_v7 = vld [vmem:[%s3740_s1 + $0x27] sm:$0xff]  ;;  %631 = vst [vmem:[#allocation2 + $0x40] sm:$0xff] %v1838_v16  ;;  %634 = vst [vmem:[#allocation2 + $0x58] sm:$0xff] %v1838_v16  ;;  %s2027_s27 = sld [smem:[#allocation3]]  ;;  %s2031_s29 = sld [smem:[#allocation3 + $0x1b]] }
  0x16   :  { %v1934_v8 = vld [vmem:[%s3740_s1 + $0x30] sm:$0xff]  ;;  %v1939_v9 = vld [vmem:[%s3740_s1 + $0x28] sm:$0xff]  ;;  %s2033_s30 = sld [smem:[#allocation3 + $0x1c]]  ;;  %s2035_s3 = sld [smem:[#allocation3 + $0x36]] }
  0x17   :  { %158 = vrot.lane.b32.xlu1 %v1871_v1, %s3742_s16  ;;  %124 = vrot.lane.b32.xlu0 %v1871_v1, %s3744_s0  ;;  %v1952_v10 = vld [vmem:[%s3740_s1 + $0x31] sm:$0xff]  ;;  %v1957_v11 = vld [vmem:[%s3740_s1 + $0x29] sm:$0xff]  ;;  %s2037_s4 = sld [smem:[#allocation3 + $0x37]]  ;;  %s2039_s5 = sld [smem:[#allocation3 + $0x51]] }
  0x18   :  { %v1970_v12 = vld [vmem:[%s3740_s1 + $0x4f] sm:$0xff]  ;;  %v1975_v13 = vld [vmem:[%s3740_s1 + $0x47] sm:$0xff]  ;;  %s2041_s6 = sld [smem:[#allocation3 + $0x52]]  ;;  %s2043_s7 = sld [smem:[#allocation3 + $0x53]] }
  0x19   :  { %v1988_v14 = vld [vmem:[%s3740_s1 + $0x50] sm:$0xff]  ;;  %v1993_v15 = vld [vmem:[%s3740_s1 + $0x48] sm:$0xff]  ;;  %3872 = sst [smem:[#allocation9_spill]] %s2021_s24  ;;  %s2045_s8 = sld [smem:[#allocation3 + $0x3]] }
  0x1a   :  { %v2006_v17 = vld [vmem:[%s3740_s1 + $0x51] sm:$0xff]  ;;  %v2011_v18 = vld [vmem:[%s3740_s1 + $0x49] sm:$0xff]  ;;  %3873 = sst [smem:[#allocation10_spill]] %s2023_s25  ;;  %s2047_s9 = sld [smem:[#allocation3 + $0x1e]]  ;;  %v141_v19 = vstv %s2029_s28 }
  0x1b   :  { %179 = vrot.lane.b32.xlu1 %v1880_v2, %s3744_s0  ;;  %177 = vrot.lane.b32.xlu0 %v1885_v3, %s3744_s0  ;;  %3874 = sst [smem:[#allocation11_spill]] %s2025_s26  ;;  %s2049_s10 = sld [smem:[#allocation3 + $0x39]]  ;;  %v3804_v25 = vstv %s2027_s27  ;;  %v3809_v26 = vstv %s2031_s29  ;;  %v2098_v27 = vmul.f32 %v141_v19, %v1862_v0  ;;  %v2101_v28 = vmul.f32 %v141_v19, %v1871_v1 }
  0x1c   :  { %s2051_s11 = sld [smem:[#allocation3 + $0x4]]  ;;  %s2053_s12 = sld [smem:[#allocation3 + $0x5]]  ;;  %v146_v20 = vstv %s2033_s30  ;;  %v3810_v30 = vstv %s2035_s3 }
  0x1d   :  { %3875 = sst [smem:[#allocation12_spill]] %s2039_s5  ;;  %s2055_s13 = sld [smem:[#allocation3 + $0x1f]]  ;;  %v151_v24 = vstv %s2037_s4  ;;  %v2110_v31 = vmul.f32 %v146_v20, %v1862_v0  ;;  %v2113_v32 = vmul.f32 %v146_v20, %v1871_v1 }
  0x1e   :  { %3876 = sst [smem:[#allocation13_spill]] %s2041_s6  ;;  %s2057_s14 = sld [smem:[#allocation3 + $0x20]]  ;;  %v2121_v34 = vmul.f32 %v151_v24, %v1862_v0  ;;  %v2124_v35 = vmul.f32 %v151_v24, %v1871_v1 }
  0x1f   :  { %213 = vrot.lane.b32.xlu1 %v1880_v2, %s3742_s16  ;;  %211 = vrot.lane.b32.xlu0 %v1885_v3, %s3742_s16  ;;  %3877 = sst [smem:[#allocation14_spill]] %s2043_s7  ;;  %s2059_s15 = sld [smem:[#allocation3 + $0x3a]] }
  0x20   :  { %3878 = sst [smem:[#allocation15_spill]] %s2045_s8  ;;  %s2061_s17 = sld [smem:[#allocation3 + $0x3b]] }
  0x21   :  { %3879 = sst [smem:[#allocation16_spill]] %s2047_s9  ;;  %s2063_s18 = sld [smem:[#allocation3 + $0x6]] }
  0x22   :  { %3880 = sst [smem:[#allocation17_spill]] %s2049_s10  ;;  %s2065_s19 = sld [smem:[#allocation3 + $0x21]]  ;;  %v196_v36 = vstv %s2051_s11 }
  0x23   :  { %234 = vrot.lane.b32.xlu1 %v1898_v4, %s3744_s0  ;;  %232 = vrot.lane.b32.xlu0 %v1903_v5, %s3744_s0  ;;  %3881 = sst [smem:[#allocation18_spill]] %s2053_s12  ;;  %s2067_s20 = sld [smem:[#allocation3 + $0x3c]]  ;;  %v201_v40 = vstv %s2055_s13  ;;  %v2141_v42 = vmul.f32 %v196_v36, %v1880_v2  ;;  %v2154_v47 = vmul.f32 %v196_v36, %v1885_v3 }
  0x24   :  { %3882 = sst [smem:[#allocation19_spill]] %s2057_s14  ;;  %s2069_s21 = sld [smem:[#allocation3 + $0x7]]  ;;  %v2150_v45 = vmul.f32 %v201_v40, %v1880_v2  ;;  %v2166_v51 = vmul.f32 %v201_v40, %v1885_v3 }
  0x25   :  { %s2071_s22 = sld [smem:[#allocation3 + $0x8]]  ;;  %s2073_s23 = sld [smem:[#allocation3 + $0x22]]  ;;  %v206_v43 = vstv %s2059_s15 }
  0x26   :  { %3883 = sst [smem:[#allocation20_spill]] %s2061_s17  ;;  %s2080_s2 = sld [smem:[#allocation3 + $0x3e]]  ;;  %v2162_v49 = vmul.f32 %v206_v43, %v1880_v2  ;;  %v2174_v53 = vmul.f32 %v206_v43, %v1885_v3 }
  0x27   :  { %268 = vrot.lane.b32.xlu1 %v1898_v4, %s3742_s16  ;;  %266 = vrot.lane.b32.xlu0 %v1903_v5, %s3742_s16  ;;  %3884 = sst [smem:[#allocation21_spill]] %s2063_s18  ;;  %s2083_s1 = sld [smem:[#allocation3 + $0x9]] }
  0x28   :  { %3885 = sst [smem:[#allocation22_spill]] %s2065_s19  ;;  %s2103_s28 = sld [smem:[#allocation3 + $0xb]] }
  0x29   :  { %3886 = sst [smem:[#allocation23_spill]] %s2067_s20  ;;  %s2085_s20 = sld [smem:[#allocation3 + $0x24]] }
  0x2a   :  { %s2105_s30 = sld [smem:[#allocation3 + $0x25]]  ;;  %s2115_s4 = sld [smem:[#allocation3 + $0x26]]  ;;  %v251_v48 = vstv %s2069_s21 }
  0x2b   :  { %290 = vrot.lane.b32.xlu1 %v1916_v6, %s3744_s0  ;;  %288 = vrot.lane.b32.xlu0 %v1921_v7, %s3744_s0  ;;  %3887 = sst [smem:[#allocation24_spill]] %s2071_s22  ;;  %s2117_s26 = sld [smem:[#allocation3 + $0x40]]  ;;  %v256_v52 = vstv %s2073_s23  ;;  %v2185_v58 = vmul.f32 %v251_v48, %v1898_v4  ;;  %v2189_v60 = vmul.f32 %v251_v48, %v1903_v5 }
  0x2c   :  { %s2091_s22 = sld [smem:[#allocation3 + $0x3f]]  ;;  %s2127_s25 = sld [smem:[#allocation3 + $0x41]]  ;;  %v2196_v61 = vmul.f32 %v256_v52, %v1898_v4  ;;  %v2200_v63 = vmul.f32 %v256_v52, %v1903_v5 }
  0x2d   :  { %s2129_s24 = sld [smem:[#allocation3 + $0xc]]  ;;  %s2135_s5 = sld [smem:[#allocation3 + $0x27]] }
  0x2e   :  { %3891 = sst [smem:[#allocation28_spill]] %s2103_s28  ;;  %s2137_s6 = sld [smem:[#allocation3 + $0x42]] }
  0x2f   :  { %324 = vrot.lane.b32.xlu1 %v1916_v6, %s3742_s16  ;;  %322 = vrot.lane.b32.xlu0 %v1921_v7, %s3742_s16  ;;  %3889 = sst [smem:[#allocation26_spill]] %s2085_s20  ;;  %s2145_s11 = sld [smem:[#allocation3 + $0xd]] }
  0x30   :  { %3892 = sst [smem:[#allocation29_spill]] %s2115_s4  ;;  %s2147_s7 = sld [smem:[#allocation3 + $0xe]]  ;;  %v312_v16 = vstv %s2105_s30 }
  0x31   :  { %s2157_s10 = sld [smem:[#allocation3 + $0x28]]  ;;  %s2159_s12 = sld [smem:[#allocation3 + $0x29]]  ;;  %v317_v36 = vstv %s2117_s26  ;;  %v2238_v48 = vmul.f32 %v1916_v6, %v312_v16  ;;  %v2245_v24 = vmul.f32 %v1921_v7, %v312_v16 }
  0x32   :  { %3890 = sst [smem:[#allocation27_spill]] %s2091_s22  ;;  %s2169_s14 = sld [smem:[#allocation3 + $0x43]]  ;;  %v2252_v40 = vmul.f32 %v1916_v6, %v317_v36 }
  0x33   :  { %345 = vrot.lane.b32.xlu1 %v1934_v8, %s3744_s0  ;;  %343 = vrot.lane.b32.xlu0 %v1939_v9, %s3744_s0  ;;  %3893 = sst [smem:[#allocation30_spill]] %s2127_s25  ;;  %s2171_s8 = sld [smem:[#allocation3 + $0x44]] }
  0x34   :  { %s2179_s21 = sld [smem:[#allocation3 + $0xf]]  ;;  %s2181_s17 = sld [smem:[#allocation3 + $0x2a]] }
  0x35   :  { %s2191_s23 = sld [smem:[#allocation3 + $0x10]]  ;;  %s2203_s15 = sld [smem:[#allocation3 + $0x45]]  ;;  %v362_v43 = vstv %s2145_s11 }
  0x36   :  { %3894 = sst [smem:[#allocation31_spill]] %s2147_s7  ;;  %s2205_s13 = sld [smem:[#allocation3 + $0x11]]  ;;  %v2267_v2 = vmul.f32 %v1934_v8, %v362_v43 }
  0x37   :  { %379 = vrot.lane.b32.xlu1 %v1934_v8, %s3742_s16  ;;  %377 = vrot.lane.b32.xlu0 %v1939_v9, %s3742_s16  ;;  %3897 = sst [smem:[#allocation32_spill]] %s2159_s12  ;;  %s2215_s9 = sld [smem:[#allocation3 + $0x2c]]  ;;  %v367_v52 = vstv %s2157_s10 }
  0x38   :  { %s2217_s19 = sld [smem:[#allocation3 + $0x46]]  ;;  %s2225_s18 = sld [smem:[#allocation3 + $0x12]]  ;;  %v372_v20 = vstv %s2169_s14  ;;  %v2284_v19 = vmul.f32 %v1934_v8, %v367_v52 }
  0x39   :  { %s2233_s30 = sld [smem:[#allocation3 + $0x13]]  ;;  %s2235_s20 = sld [smem:[#allocation3 + $0x2e]]  ;;  %v2287_v16 = vmul.f32 %v1934_v8, %v372_v20  ;;  %v2299_v59 = vmul.f32 %v1939_v9, %v372_v20 }
  0x3a   :  { %3899 = sst [smem:[#allocation33_spill]] %s2179_s21  ;;  %s2247_s26 = sld [smem:[#allocation3 + $0x2d]] }
  0x3b   :  { %400 = vrot.lane.b32.xlu1 %v1952_v10, %s3744_s0  ;;  %398 = vrot.lane.b32.xlu0 %v1957_v11, %s3744_s0  ;;  %3900 = sst [smem:[#allocation34_spill]] %s2181_s17  ;;  %s2259_s25 = sld [smem:[#allocation3 + $0x48]] }
  0x3c   :  { %s2249_s11 = sld [smem:[#allocation3 + $0x49]]  ;;  %s2261_s4 = sld [smem:[#allocation3 + $0x14]] }
  0x3d   :  { %3901 = sst [smem:[#allocation35_spill]] %s2215_s9  ;;  %s2269_s28 = sld [smem:[#allocation3 + $0x2f]] }
  0x3e   :  { %s2271_s22 = sld [smem:[#allocation3 + $0x16]]  ;;  %s2279_s10 = sld [smem:[#allocation3 + $0x31]] }
  0x3f   :  { %434 = vrot.lane.b32.xlu1 %v1952_v10, %s3742_s16  ;;  %432 = vrot.lane.b32.xlu0 %v1957_v11, %s3742_s16  ;;  %s2281_s14 = sld [smem:[#allocation3 + $0x4c]]  ;;  %s2303_s7 = sld [smem:[#allocation3 + $0x30]]  ;;  %v473_v20 = vstv %s2233_s30  ;;  %v478_v55 = vstv %s2235_s20 }
  0x40   :  { %3902 = sst [smem:[#allocation36_spill]] %s2247_s26  ;;  %s2319_s17 = sld [smem:[#allocation3 + $0x17]]  ;;  %v2349_v44 = vmul.f32 %v1970_v12, %v473_v20 }
  0x41   :  { %s2305_s12 = sld [smem:[#allocation3 + $0x4b]]  ;;  %s2321_s21 = sld [smem:[#allocation3 + $0x32]] }
  0x42   :  { %v483_v46 = vstv %s2249_s11  ;;  %s2333_s9 = sld [smem:[#allocation3 + $0x34]]  ;;  %s2343_s20 = sld [smem:[#allocation3 + $0x4d]]  ;;  %3906 = vst [vmem:[#allocation40_spill] sm:$0xff] %v2349_v44 }
  0x43   :  { %456 = vrot.lane.b32.xlu1 %v1970_v12, %s3744_s0  ;;  %454 = vrot.lane.b32.xlu0 %v1975_v13, %s3744_s0  ;;  %s2345_s30 = sld [smem:[#allocation3 + $0x18]]  ;;  %s2357_s11 = sld [smem:[#allocation3 + $0x33]]  ;;  %v2374_v23 = vmul.f32 %v1975_v13, %v483_v46 }
  0x44   :  { %s2359_s26 = sld [smem:[#allocation3 + $0x4e]]  ;;  %v533_v54 = vstv %s2279_s10  ;;  %s3916_s10 = sld [smem:[#allocation13_spill]] }
  0x45   :  { %3913 = vst [vmem:[#allocation47_spill] sm:$0xff] %v2374_v23  ;;  %v2396_v39 = vmul.f32 %v1993_v15, %v533_v54  ;;  %v3939_v23 = vstv %s2035_s3  ;;  %s3950_s3 = sld [smem:[#allocation19_spill]] }
  0x46   :  { %3904 = sst [smem:[#allocation38_spill]] %s2319_s17  ;;  %s3927_s17 = sld [smem:[#allocation11_spill]] }
  0x47   :  { %490 = vrot.lane.b32.xlu1 %v1970_v12, %s3742_s16  ;;  %488 = vrot.lane.b32.xlu0 %v1975_v13, %s3742_s16  ;;  %3903 = sst [smem:[#allocation37_spill]] %s2305_s12  ;;  %s3921_s12 = sld [smem:[#allocation9_spill]]  ;;  %3922 = vst [vmem:[#allocation52_spill] sm:$0xff] %v2396_v39 }
  0x48   :  { %3905 = sst [smem:[#allocation39_spill]] %s2321_s21  ;;  %s3925_s21 = sld [smem:[#allocation10_spill]] }
  0x49   :  { %3909 = sst [smem:[#allocation43_spill]] %s2357_s11 }
  0x4a   :  { %3910 = sst [smem:[#allocation44_spill]] %s2359_s26  ;;  %s3936_s26 = sld [smem:[#allocation15_spill]] }
  0x4b   :  { %511 = vrot.lane.b32.xlu1 %v1988_v14, %s3744_s0  ;;  %509 = vrot.lane.b32.xlu0 %v1993_v15, %s3744_s0  ;;  %s3938_s11 = sld [smem:[#allocation16_spill]] }
  0x4f   :  { %545 = vrot.lane.b32.xlu1 %v1988_v14, %s3742_s16  ;;  %543 = vrot.lane.b32.xlu0 %v1993_v15, %s3742_s16 }
  0x53   :  { %566 = vrot.lane.b32.xlu1 %v2006_v17, %s3744_s0  ;;  %564 = vrot.lane.b32.xlu0 %v2011_v18, %s3744_s0  ;;  %s2078_s0 = sld [smem:[#allocation3 + $0x3d]] }
  0x57   :  { %600 = vrot.lane.b32.xlu1 %v2006_v17, %s3742_s16  ;;  %598 = vrot.lane.b32.xlu0 %v2011_v18, %s3742_s16  ;;  %s2075_s16 = sld [smem:[#allocation3 + $0x23]] }
  0x59   :  { %v261_v56 = vstv %s2078_s0  ;;  %s2193_s0 = sld [smem:[#allocation3 + $0x2b]] }
  0x5a   :  { %v2208_v1 = vmul.f32 %v261_v56, %v1898_v4  ;;  %v2212_v3 = vmul.f32 %v261_v56, %v1903_v5  ;;  %v2255_v5 = vmul.f32 %v1921_v7, %v317_v36  ;;  %v417_v36 = vstv %s2191_s23  ;;  %s2293_s23 = sld [smem:[#allocation3 + $0x4a]] }
  0x5b   :  { %v2325_v8 = vmul.f32 %v1957_v11, %v417_v36 }
  0x5d   :  { %3888 = sst [smem:[#allocation25_spill]] %s2075_s16  ;;  %s2093_s16 = sld [smem:[#allocation3 + $0xa]] }
  0x5f   :  { %v422_v62 = vstv %s2193_s0  ;;  %s2295_s0 = sld [smem:[#allocation3 + $0x15]] }
  0x60   :  { %v2328_v50 = vmul.f32 %v1957_v11, %v422_v62 }
  0x63   :  { %v307_v0 = vstv %s2093_s16  ;;  %s2223_s16 = sld [smem:[#allocation3 + $0x47]] }
  0x64   :  { %v2228_v4 = vmul.f32 %v1916_v6, %v307_v0  ;;  %v2242_v56 = vmul.f32 %v1921_v7, %v307_v0  ;;  %v2275_v7 = vmul.f32 %v1939_v9, %v362_v43  ;;  %v2291_v43 = vmul.f32 %v1939_v9, %v367_v52 }
  0x65   :  { %v2309_v52 = vmul.f32 %v1952_v10, %v417_v36  ;;  %v2312_v6 = vmul.f32 %v1952_v10, %v422_v62  ;;  %v427_v0 = vstv %s2217_s19  ;;  %s2331_s19 = sld [smem:[#allocation3 + $0x19]]  ;;  %v528_v62 = vstv %s2271_s22  ;;  %s3914_s22 = sld [smem:[#allocation12_spill]] }
  0x66   :  { %v2336_v9 = vmul.f32 %v1952_v10, %v427_v0  ;;  %v2339_v57 = vmul.f32 %v1957_v11, %v427_v0  ;;  %v2352_v10 = vmul.f32 %v1970_v12, %v478_v55  ;;  %v2355_v11 = vmul.f32 %v1975_v13, %v473_v20 }
  0x67   :  { %v2362_v0 = vmul.f32 %v1970_v12, %v483_v46  ;;  %v538_v36 = vstv %s2281_s14  ;;  %v2371_v20 = vmul.f32 %v1975_v13, %v478_v55  ;;  %v2380_v38 = vmul.f32 %v1988_v14, %v528_v62  ;;  %s3918_s14 = sld [smem:[#allocation14_spill]] }
  0x68   :  { %3907 = vst [vmem:[#allocation41_spill] sm:$0xff] %v2352_v10  ;;  %3908 = vst [vmem:[#allocation42_spill] sm:$0xff] %v2355_v11  ;;  %v2383_v55 = vmul.f32 %v1988_v14, %v533_v54  ;;  %v2386_v13 = vmul.f32 %v1988_v14, %v538_v36  ;;  %v2389_v46 = vmul.f32 %v1993_v15, %v528_v62  ;;  %v3926_v54 = vstv %s3916_s10 }
  0x69   :  { %3911 = vst [vmem:[#allocation45_spill] sm:$0xff] %v2362_v0  ;;  %3912 = vst [vmem:[#allocation46_spill] sm:$0xff] %v2371_v20  ;;  %v2408_v22 = vmul.f32 %v1993_v15, %v538_v36 }
  0x6a   :  { %3915 = vst [vmem:[#allocation48_spill] sm:$0xff] %v2380_v38  ;;  %3917 = vst [vmem:[#allocation49_spill] sm:$0xff] %v2383_v55 }
  0x6b   :  { %3919 = vst [vmem:[#allocation50_spill] sm:$0xff] %v2386_v13  ;;  %3920 = vst [vmem:[#allocation51_spill] sm:$0xff] %v2389_v46  ;;  %v3813_v14 = vstv %s2331_s19  ;;  %v3816_v13 = vstv %s2333_s9  ;;  %v3923_v62 = vstv %s3914_s22 }
  0x6c   :  { %3924 = vst [vmem:[#allocation53_spill] sm:$0xff] %v2408_v22  ;;  %v2423_v12 = vmul.f32 %v2006_v17, %v3813_v14  ;;  %v3937_v14 = vstv %s3921_s12 }
  0x6d   :  { %v3945_v0 = vstv %s3918_s14 }
  0x6e   :  { %3930 = vst [vmem:[#allocation54_spill] sm:$0xff] %v2423_v12 }
  0x85   :  { %v157_v37 = vpop.permute.xlu1 %156  ;;  %v123_v41 = vpop.permute.xlu0 %122 }
  0x86   :  { %v127_v21 = vmul.f32 %v3804_v25, %v123_v41  ;;  %v132_v33 = vmul.f32 %v3809_v26, %v123_v41  ;;  %v137_v29 = vmul.f32 %v3810_v30, %v123_v41  ;;  %v3928_v26 = vstv %s3918_s14  ;;  %s3976_s14 = sld [smem:[#allocation27_spill]] }
  0x87   :  { %v3929_v25 = vstv %s3921_s12  ;;  %s3953_s12 = sld [smem:[#allocation20_spill]] }
  0x88   :  { %v129_v46 = vadd.f32 %v127_v21, %v3923_v62  ;;  %v134_v39 = vadd.f32 %v132_v33, %v3926_v54  ;;  %v139_v55 = vadd.f32 %v137_v29, %v3928_v26  ;;  %v161_v15 = vmul.f32 %v3929_v25, %v157_v37 }
  0x89   :  { %v159_v41 = vpop.permute.xlu1 %158  ;;  %v125_v30 = vpop.permute.xlu0 %124  ;;  %v2428_v26 = vmul.f32 %v2006_v17, %v3816_v13  ;;  %v3932_v54 = vstv %s2027_s27  ;;  %v3933_v21 = vstv %s2031_s29  ;;  %v3934_v25 = vstv %s3925_s21  ;;  %s3943_s27 = sld [smem:[#allocation17_spill]]  ;;  %s3947_s29 = sld [smem:[#allocation18_spill]] }
  0x8a   :  { %v144_v36 = vadd.f32 %v2098_v27, %v129_v46  ;;  %v149_v29 = vadd.f32 %v2110_v31, %v134_v39  ;;  %v154_v33 = vadd.f32 %v2121_v34, %v139_v55  ;;  %v128_v62 = vmul.f32 %v3932_v54, %v125_v30  ;;  %s3958_s21 = sld [smem:[#allocation22_spill]] }
  0x8b   :  { %3931 = vst [vmem:[#allocation55_spill] sm:$0xff] %v2428_v26  ;;  %v133_v22 = vmul.f32 %v3933_v21, %v125_v30  ;;  %v166_v38 = vmul.f32 %v3934_v25, %v157_v37  ;;  %v3935_v27 = vstv %s3927_s17  ;;  %v162_v12 = vmul.f32 %v3937_v14, %v159_v41  ;;  %s3956_s17 = sld [smem:[#allocation21_spill]] }
  0x8c   :  { %v171_v46 = vmul.f32 %v3935_v27, %v157_v37  ;;  %v138_v20 = vmul.f32 %v3939_v23, %v125_v30  ;;  %v3940_v13 = vmov %v3934_v25  ;;  %v3941_v31 = vmov %v3935_v27 }
  0x8d   :  { %v167_v26 = vmul.f32 %v3940_v13, %v159_v41  ;;  %v172_v34 = vmul.f32 %v3941_v31, %v159_v41  ;;  %v3942_v39 = vstv %s3914_s22  ;;  %v3944_v21 = vstv %s3916_s10  ;;  %v180_v25 = vpop.permute.xlu1 %179  ;;  %v178_v11 = vpop.permute.xlu0 %177  ;;  %s3969_s22 = sld [smem:[#allocation25_spill]]  ;;  %s3974_s10 = sld [smem:[#allocation26_spill]] }
  0x8e   :  { %v130_v55 = vadd.f32 %v128_v62, %v3942_v39  ;;  %v135_v54 = vadd.f32 %v133_v22, %v3944_v21  ;;  %v140_v37 = vadd.f32 %v138_v20, %v3945_v0  ;;  %v163_v27 = vadd.f32 %v161_v15, %v144_v36 }
  0x8f   :  { %v168_v10 = vadd.f32 %v166_v38, %v149_v29  ;;  %v173_v14 = vadd.f32 %v171_v46, %v154_v33  ;;  %v3946_v13 = vstv %s3936_s26  ;;  %v3948_v31 = vstv %s3938_s11  ;;  %s3960_s26 = sld [smem:[#allocation23_spill]]  ;;  %s3966_s11 = sld [smem:[#allocation24_spill]] }
  0x90   :  { %v145_v23 = vadd.f32 %v2101_v28, %v130_v55  ;;  %v150_v30 = vadd.f32 %v2113_v32, %v135_v54  ;;  %v182_v41 = vmul.f32 %v3946_v13, %v178_v11  ;;  %v187_v44 = vmul.f32 %v3948_v31, %v178_v11 }
  0x91   :  { %v155_v62 = vadd.f32 %v2124_v35, %v140_v37  ;;  %v3949_v22 = vmov %v3946_v13  ;;  %v3951_v21 = vmov %v3948_v31  ;;  %v3952_v20 = vstv %s3943_s27  ;;  %v214_v32 = vpop.permute.xlu1 %213  ;;  %v212_v33 = vpop.permute.xlu0 %211  ;;  %s3983_s27 = sld [smem:[#allocation28_spill]] }
  0x92   :  { %v183_v39 = vmul.f32 %v3949_v22, %v180_v25  ;;  %v188_v0 = vmul.f32 %v3951_v21, %v180_v25  ;;  %v192_v38 = vmul.f32 %v3952_v20, %v178_v11  ;;  %v164_v15 = vadd.f32 %v162_v12, %v145_v23 }
  0x93   :  { %v169_v36 = vadd.f32 %v167_v26, %v150_v30  ;;  %v184_v28 = vadd.f32 %v182_v41, %v163_v27  ;;  %v189_v29 = vadd.f32 %v187_v44, %v168_v10  ;;  %v174_v46 = vadd.f32 %v172_v34, %v155_v62 }
  0x94   :  { %v3954_v55 = vmov %v3952_v20  ;;  %v194_v35 = vadd.f32 %v192_v38, %v173_v14  ;;  %v3955_v37 = vstv %s3947_s29  ;;  %v185_v31 = vadd.f32 %v183_v39, %v164_v15  ;;  %s3985_s29 = sld [smem:[#allocation29_spill]] }
  0x95   :  { %v193_v54 = vmul.f32 %v3954_v55, %v180_v25  ;;  %v217_v13 = vmul.f32 %v3955_v37, %v214_v32  ;;  %v190_v22 = vadd.f32 %v188_v0, %v169_v36  ;;  %v3957_v11 = vstv %s3950_s3  ;;  %v235_v21 = vpop.permute.xlu1 %234  ;;  %s3987_s3 = sld [smem:[#allocation30_spill]] }
  0x96   :  { %v222_v12 = vmul.f32 %v3957_v11, %v214_v32  ;;  %v199_v26 = vadd.f32 %v2154_v47, %v184_v28  ;;  %v204_v10 = vadd.f32 %v2166_v51, %v189_v29  ;;  %v209_v27 = vadd.f32 %v2174_v53, %v194_v35  ;;  %v233_v47 = vpop.permute.xlu0 %232 }
  0x97   :  { %v195_v44 = vadd.f32 %v193_v54, %v174_v46  ;;  %v3959_v34 = vmov %v3955_v37  ;;  %v200_v25 = vadd.f32 %v2141_v42, %v185_v31  ;;  %v205_v14 = vadd.f32 %v2150_v45, %v190_v22 }
  0x98   :  { %v216_v23 = vmul.f32 %v3959_v34, %v212_v33  ;;  %v3961_v30 = vmov %v3957_v11  ;;  %v3962_v62 = vstv %s3953_s12  ;;  %v3964_v20 = vstv %s3956_s17  ;;  %s4001_s12 = sld [smem:[#allocation32_spill]]  ;;  %s2594_s17 = sld [smem:[#allocation3 + $0x35]] }
  0x99   :  { %v221_v41 = vmul.f32 %v3961_v30, %v212_v33  ;;  %v226_v39 = vmul.f32 %v3962_v62, %v212_v33  ;;  %v210_v51 = vadd.f32 %v2162_v49, %v195_v44  ;;  %v3963_v0 = vmov %v3962_v62  ;;  %v269_v34 = vpop.permute.xlu1 %268 }
  0x9a   :  { %v227_v53 = vmul.f32 %v3963_v0, %v214_v32  ;;  %v238_v38 = vmul.f32 %v3964_v20, %v235_v21  ;;  %v3965_v15 = vstv %s3958_s21  ;;  %v219_v42 = vadd.f32 %v217_v13, %v200_v25  ;;  %v267_v13 = vpop.permute.xlu0 %266  ;;  %s2839_s21 = sld [smem:[#allocation3 + $0x58]] }
  0x9b   :  { %v243_v36 = vmul.f32 %v3965_v15, %v235_v21  ;;  %v224_v28 = vadd.f32 %v222_v12, %v205_v14  ;;  %v218_v45 = vadd.f32 %v216_v23, %v199_v26  ;;  %v223_v29 = vadd.f32 %v221_v41, %v204_v10 }
  0x9c   :  { %v229_v46 = vadd.f32 %v227_v53, %v210_v51  ;;  %v3967_v55 = vstv %s3960_s26  ;;  %v3968_v33 = vmov %v3964_v20  ;;  %v3970_v37 = vmov %v3965_v15  ;;  %s2841_s26 = sld [smem:[#allocation3 + $0x73]] }
  0x9d   :  { %v248_v54 = vmul.f32 %v3967_v55, %v235_v21  ;;  %v237_v35 = vmul.f32 %v3968_v33, %v233_v47  ;;  %v242_v31 = vmul.f32 %v3970_v37, %v233_v47  ;;  %v228_v49 = vadd.f32 %v226_v39, %v209_v27  ;;  %v291_v15 = vpop.permute.xlu1 %290 }
  0x9e   :  { %v240_v32 = vadd.f32 %v238_v38, %v219_v42  ;;  %v245_v22 = vadd.f32 %v243_v36, %v224_v28  ;;  %v3971_v11 = vmov %v3967_v55  ;;  %v3972_v23 = vstv %s3966_s11  ;;  %v289_v36 = vpop.permute.xlu0 %288  ;;  %s2843_s11 = sld [smem:[#allocation3 + $0x8e]] }
  0x9f   :  { %v247_v44 = vmul.f32 %v3971_v11, %v233_v47  ;;  %v250_v12 = vadd.f32 %v248_v54, %v229_v46  ;;  %v239_v26 = vadd.f32 %v237_v35, %v218_v45  ;;  %v244_v10 = vadd.f32 %v242_v31, %v223_v29 }
  0xa0   :  { %v272_v25 = vmul.f32 %v3972_v23, %v269_v34  ;;  %v255_v30 = vadd.f32 %v2185_v58, %v240_v32  ;;  %v260_v27 = vadd.f32 %v2196_v61, %v245_v22  ;;  %v3973_v41 = vstv %s3969_s22  ;;  %s2845_s22 = sld [smem:[#allocation3 + $0x61]] }
  0xa1   :  { %v249_v14 = vadd.f32 %v247_v44, %v228_v49  ;;  %v277_v62 = vmul.f32 %v3973_v41, %v269_v34  ;;  %v265_v39 = vadd.f32 %v2208_v1, %v250_v12  ;;  %v3975_v21 = vstv %s2080_s2  ;;  %s2529_s2 = sld [smem:[#allocation3 + $0x4f]] }
  0xa2   :  { %v282_v47 = vmul.f32 %v3975_v21, %v269_v34  ;;  %v254_v51 = vadd.f32 %v2189_v60, %v239_v26  ;;  %v259_v0 = vadd.f32 %v2200_v63, %v244_v10  ;;  %v274_v53 = vadd.f32 %v272_v25, %v255_v30  ;;  %v325_v10 = vpop.permute.xlu1 %324 }
  0xa3   :  { %v279_v20 = vadd.f32 %v277_v62, %v260_v27  ;;  %v264_v58 = vadd.f32 %v2212_v3, %v249_v14  ;;  %v3977_v38 = vmov %v3972_v23  ;;  %v3978_v1 = vmov %v3973_v41  ;;  %v323_v23 = vpop.permute.xlu0 %322 }
  0xa4   :  { %v271_v61 = vmul.f32 %v3977_v38, %v267_v13  ;;  %v284_v42 = vadd.f32 %v282_v47, %v265_v39  ;;  %v276_v28 = vmul.f32 %v3978_v1, %v267_v13  ;;  %v3979_v45 = vmov %v3975_v21 }
  0xa5   :  { %v281_v29 = vmul.f32 %v3979_v45, %v267_v13  ;;  %v3980_v46 = vstv %s2083_s1  ;;  %v3981_v54 = vstv %s3974_s10  ;;  %v3982_v33 = vstv %s3976_s14  ;;  %s3999_s1 = sld [smem:[#allocation31_spill]]  ;;  %s2847_s10 = sld [smem:[#allocation3 + $0x7c]] }
  0xa6   :  { %v294_v55 = vmul.f32 %v3980_v46, %v291_v15  ;;  %v273_v60 = vadd.f32 %v271_v61, %v254_v51  ;;  %v299_v63 = vmul.f32 %v3981_v54, %v291_v15  ;;  %v304_v35 = vmul.f32 %v3982_v33, %v291_v15  ;;  %s2849_s14 = sld [smem:[#allocation3 + $0x97]] }
  0xa7   :  { %v3984_v37 = vmov %v3980_v46  ;;  %v278_v31 = vadd.f32 %v276_v28, %v259_v0  ;;  %v283_v49 = vadd.f32 %v281_v29, %v264_v58  ;;  %v3986_v22 = vmov %v3981_v54  ;;  %v344_v1 = vpop.permute.xlu0 %343 }
  0xa8   :  { %v293_v3 = vmul.f32 %v3984_v37, %v289_v36  ;;  %v296_v32 = vadd.f32 %v294_v55, %v274_v53  ;;  %v298_v11 = vmul.f32 %v3986_v22, %v289_v36  ;;  %v301_v44 = vadd.f32 %v299_v63, %v279_v20 }
  0xa9   :  { %v306_v34 = vadd.f32 %v304_v35, %v284_v42  ;;  %v3988_v12 = vmov %v3982_v33  ;;  %v3989_v30 = vstv %s3983_s27  ;;  %v3990_v41 = vstv %s3985_s29  ;;  %s2851_s27 = sld [smem:[#allocation3 + $0x6a]]  ;;  %s2853_s29 = sld [smem:[#allocation3 + $0x85]] }
  0xaa   :  { %v295_v13 = vadd.f32 %v293_v3, %v273_v60  ;;  %v303_v26 = vmul.f32 %v3988_v12, %v289_v36  ;;  %v300_v25 = vadd.f32 %v298_v11, %v278_v31  ;;  %v311_v14 = vadd.f32 %v2228_v4, %v296_v32 }
  0xab   :  { %v328_v27 = vmul.f32 %v3989_v30, %v325_v10  ;;  %v333_v62 = vmul.f32 %v3990_v41, %v325_v10  ;;  %v316_v21 = vadd.f32 %v2238_v48, %v301_v44  ;;  %v321_v47 = vadd.f32 %v2252_v40, %v306_v34  ;;  %v346_v40 = vpop.permute.xlu1 %345  ;;  %v378_v12 = vpop.permute.xlu0 %377 }
  0xac   :  { %v305_v39 = vadd.f32 %v303_v26, %v283_v49  ;;  %v3991_v51 = vstv %s3987_s3  ;;  %v310_v20 = vadd.f32 %v2242_v56, %v295_v13  ;;  %v315_v4 = vadd.f32 %v2245_v24, %v300_v25  ;;  %s2855_s3 = sld [smem:[#allocation3 + $0xa0]] }
  0xad   :  { %v338_v0 = vmul.f32 %v3991_v51, %v325_v10  ;;  %v330_v53 = vadd.f32 %v328_v27, %v311_v14  ;;  %v3992_v58 = vmov %v3989_v30  ;;  %v335_v61 = vadd.f32 %v333_v62, %v316_v21 }
  0xae   :  { %v327_v38 = vmul.f32 %v3992_v58, %v323_v23  ;;  %v320_v48 = vadd.f32 %v2255_v5, %v305_v39  ;;  %v3993_v36 = vmov %v3990_v41  ;;  %v3994_v45 = vmov %v3991_v51 }
  0xaf   :  { %v340_v15 = vadd.f32 %v338_v0, %v321_v47  ;;  %v332_v42 = vmul.f32 %v3993_v36, %v323_v23  ;;  %v337_v29 = vmul.f32 %v3994_v45, %v323_v23  ;;  %v3995_v46 = vstv %s2129_s24  ;;  %v380_v13 = vpop.permute.xlu1 %379  ;;  %s4005_s24 = sld [smem:[#allocation33_spill]] }
  0xb0   :  { %v329_v28 = vadd.f32 %v327_v38, %v310_v20  ;;  %v349_v56 = vmul.f32 %v3995_v46, %v346_v40  ;;  %v3996_v55 = vstv %s2135_s5  ;;  %v3997_v54 = vstv %s2137_s6  ;;  %s4007_s5 = sld [smem:[#allocation34_spill]]  ;;  %s2580_s6 = sld [smem:[#allocation3 + $0x1a]] }
  0xb1   :  { %v354_v60 = vmul.f32 %v3996_v55, %v346_v40  ;;  %v334_v24 = vadd.f32 %v332_v42, %v315_v4  ;;  %v359_v63 = vmul.f32 %v3997_v54, %v346_v40  ;;  %v3998_v33 = vmov %v3995_v46 }
  0xb2   :  { %v348_v35 = vmul.f32 %v3998_v33, %v344_v1  ;;  %v4000_v37 = vmov %v3996_v55  ;;  %v339_v3 = vadd.f32 %v337_v29, %v320_v48  ;;  %v351_v31 = vadd.f32 %v349_v56, %v330_v53  ;;  %v399_v48 = vpop.permute.xlu0 %398 }
  0xb3   :  { %v353_v5 = vmul.f32 %v4000_v37, %v344_v1  ;;  %v356_v49 = vadd.f32 %v354_v60, %v335_v61  ;;  %v4002_v32 = vmov %v3997_v54  ;;  %v361_v11 = vadd.f32 %v359_v63, %v340_v15  ;;  %v401_v15 = vpop.permute.xlu1 %400 }
  0xb4   :  { %v358_v22 = vmul.f32 %v4002_v32, %v344_v1  ;;  %v350_v44 = vadd.f32 %v348_v35, %v329_v28  ;;  %v593_v26 = vstv %s2529_s2  ;;  %v366_v23 = vadd.f32 %v2267_v2, %v351_v31  ;;  %s2857_s2 = sld [smem:[#allocation3 + $0x55]] }
  0xb5   :  { %v355_v34 = vadd.f32 %v353_v5, %v334_v24  ;;  %v371_v25 = vadd.f32 %v2284_v19, %v356_v49  ;;  %v4003_v14 = vstv %s3999_s1  ;;  %v376_v27 = vadd.f32 %v2287_v16, %v361_v11  ;;  %s2859_s1 = sld [smem:[#allocation3 + $0x70]] }
  0xb6   :  { %v360_v10 = vadd.f32 %v358_v22, %v339_v3  ;;  %v383_v30 = vmul.f32 %v4003_v14, %v380_v13  ;;  %v4004_v41 = vstv %s4001_s12  ;;  %v4006_v39 = vstv %s2171_s8  ;;  %s4016_s8 = sld [smem:[#allocation35_spill]]  ;;  %v433_v3 = vpop.permute.xlu0 %432  ;;  %s2861_s12 = sld [smem:[#allocation3 + $0x8b]] }
  0xb7   :  { %v388_v62 = vmul.f32 %v4004_v41, %v380_v13  ;;  %v393_v21 = vmul.f32 %v4006_v39, %v380_v13  ;;  %v365_v47 = vadd.f32 %v2275_v7, %v350_v44  ;;  %v370_v0 = vadd.f32 %v2291_v43, %v355_v34  ;;  %v435_v5 = vpop.permute.xlu1 %434 }
  0xb8   :  { %v385_v51 = vadd.f32 %v383_v30, %v366_v23  ;;  %v375_v2 = vadd.f32 %v2299_v59, %v360_v10  ;;  %v4008_v19 = vmov %v4003_v14  ;;  %v4009_v4 = vmov %v4004_v41 }
  0xb9   :  { %v382_v53 = vmul.f32 %v4008_v19, %v378_v12  ;;  %v390_v20 = vadd.f32 %v388_v62, %v371_v25  ;;  %v395_v16 = vadd.f32 %v393_v21, %v376_v27  ;;  %v387_v58 = vmul.f32 %v4009_v4, %v378_v12 }
  0xba   :  { %v4010_v38 = vmov %v4006_v39  ;;  %v4011_v36 = vstv %s4005_s24  ;;  %v4012_v42 = vstv %s4007_s5  ;;  %v4013_v40 = vstv %s2203_s15  ;;  %s4022_s15 = sld [smem:[#allocation36_spill]]  ;;  %s2865_s5 = sld [smem:[#allocation3 + $0x76]] }
  0xbb   :  { %v392_v61 = vmul.f32 %v4010_v38, %v378_v12  ;;  %v384_v7 = vadd.f32 %v382_v53, %v365_v47  ;;  %v404_v43 = vmul.f32 %v4011_v36, %v401_v15  ;;  %v409_v59 = vmul.f32 %v4012_v42, %v401_v15  ;;  %s2863_s24 = sld [smem:[#allocation3 + $0x5b]] }
  0xbc   :  { %v414_v1 = vmul.f32 %v4013_v40, %v401_v15  ;;  %v389_v28 = vadd.f32 %v387_v58, %v370_v0  ;;  %v4014_v29 = vmov %v4011_v36  ;;  %v4015_v56 = vmov %v4012_v42  ;;  %v455_v0 = vpop.permute.xlu0 %454 }
  0xbd   :  { %v394_v45 = vadd.f32 %v392_v61, %v375_v2  ;;  %v403_v46 = vmul.f32 %v4014_v29, %v399_v48  ;;  %v408_v55 = vmul.f32 %v4015_v56, %v399_v48  ;;  %v406_v60 = vadd.f32 %v404_v43, %v385_v51  ;;  %v457_v51 = vpop.permute.xlu1 %456 }
  0xbe   :  { %v411_v24 = vadd.f32 %v409_v59, %v390_v20  ;;  %v416_v54 = vadd.f32 %v414_v1, %v395_v16  ;;  %v4017_v63 = vmov %v4013_v40  ;;  %v2599_v31 = vmul.f32 %v2006_v17, %v593_v26 }
  0xbf   :  { %v413_v33 = vmul.f32 %v4017_v63, %v399_v48  ;;  %v405_v35 = vadd.f32 %v403_v46, %v384_v7  ;;  %v410_v37 = vadd.f32 %v408_v55, %v389_v28  ;;  %v4018_v49 = vstv %s2331_s19  ;;  %v4032_v55 = vld [vmem:[#allocation40_spill] sm:$0xff]  ;;  %s2893_s19 = sld [smem:[#allocation3 + $0x54]] }
  0xc0   :  { %v2604_v32 = vmul.f32 %v2011_v18, %v4018_v49  ;;  %v421_v11 = vadd.f32 %v2309_v52, %v406_v60  ;;  %v426_v44 = vadd.f32 %v2312_v6, %v411_v24  ;;  %v431_v34 = vadd.f32 %v2336_v9, %v416_v54  ;;  %v489_v29 = vpop.permute.xlu0 %488  ;;  %v4033_v24 = vld [vmem:[#allocation41_spill] sm:$0xff] }
  0xc1   :  { %v415_v22 = vadd.f32 %v413_v33, %v394_v45  ;;  %v4019_v13 = vstv %s2205_s13  ;;  %v4020_v10 = vstv %s4016_s8  ;;  %v4021_v17 = vstv %s2223_s16  ;;  %v491_v45 = vpop.permute.xlu1 %490  ;;  %s2637_s13 = sld [smem:[#allocation3 + $0x50]]  ;;  %s2869_s8 = sld [smem:[#allocation3 + $0x5e]] }
  0xc2   :  { %v438_v12 = vmul.f32 %v4019_v13, %v435_v5  ;;  %v443_v23 = vmul.f32 %v4020_v10, %v435_v5  ;;  %v448_v25 = vmul.f32 %v4021_v17, %v435_v5  ;;  %v420_v14 = vadd.f32 %v2325_v8, %v405_v35  ;;  %v4035_v35 = vld [vmem:[#allocation45_spill] sm:$0xff]  ;;  %s2889_s16 = sld [smem:[#allocation3 + $0x88]] }
  0xc3   :  { %v425_v30 = vadd.f32 %v2328_v50, %v410_v37  ;;  %v430_v52 = vadd.f32 %v2339_v57, %v415_v22  ;;  %v4023_v27 = vmov %v4019_v13  ;;  %v4024_v9 = vmov %v4020_v10  ;;  %v4040_v13 = vld [vmem:[#allocation46_spill] sm:$0xff]  ;;  %v4041_v10 = vld [vmem:[#allocation47_spill] sm:$0xff] }
  0xc4   :  { %v437_v6 = vmul.f32 %v4023_v27, %v433_v3  ;;  %v442_v41 = vmul.f32 %v4024_v9, %v433_v3  ;;  %v440_v62 = vadd.f32 %v438_v12, %v421_v11  ;;  %v445_v39 = vadd.f32 %v443_v23, %v426_v44  ;;  %v4039_v11 = vld [vmem:[#allocation42_spill] sm:$0xff] }
  0xc5   :  { %v4025_v21 = vmov %v4021_v17  ;;  %v602_v2 = vstv %s2580_s6  ;;  %v450_v8 = vadd.f32 %v448_v25, %v431_v34  ;;  %v4026_v53 = vstv %s2225_s18  ;;  %s4050_s18 = sld [smem:[#allocation38_spill]]  ;;  %s2867_s6 = sld [smem:[#allocation3 + $0x91]] }
  0xc6   :  { %v447_v47 = vmul.f32 %v4025_v21, %v433_v3  ;;  %v439_v19 = vadd.f32 %v437_v6, %v420_v14  ;;  %v460_v50 = vmul.f32 %v4026_v53, %v457_v51  ;;  %v4027_v20 = vstv %s4022_s15  ;;  %s2873_s15 = sld [smem:[#allocation3 + $0x94]]  ;;  %4085 = sst [smem:[#allocation11_spill]] %s2893_s19 }
  0xc7   :  { %v465_v57 = vmul.f32 %v4027_v20, %v457_v51  ;;  %v444_v16 = vadd.f32 %v442_v41, %v425_v30  ;;  %v4028_v4 = vstv %s2259_s25  ;;  %v4029_v38 = vmov %v4026_v53  ;;  %s4038_s25 = sld [smem:[#allocation37_spill]]  ;;  %v512_v41 = vpop.permute.xlu1 %511  ;;  %s2911_s19 = sld [smem:[#allocation3 + $0x56]] }
  0xc8   :  { %v470_v58 = vmul.f32 %v4028_v4, %v457_v51  ;;  %v459_v61 = vmul.f32 %v4029_v38, %v455_v0  ;;  %v4030_v15 = vmov %v4027_v20  ;;  %v449_v7 = vadd.f32 %v447_v47, %v430_v52  ;;  %4083 = sst [smem:[#allocation9_spill]] %s2889_s16 }
  0xc9   :  { %v464_v48 = vmul.f32 %v4030_v15, %v455_v0  ;;  %v462_v36 = vadd.f32 %v460_v50, %v440_v62  ;;  %v467_v43 = vadd.f32 %v465_v57, %v445_v39  ;;  %v4031_v42 = vmov %v4028_v4  ;;  %v510_v62 = vpop.permute.xlu0 %509 }
  0xca   :  { %v469_v59 = vmul.f32 %v4031_v42, %v455_v0  ;;  %v472_v40 = vadd.f32 %v470_v58, %v450_v8  ;;  %v461_v1 = vadd.f32 %v459_v61, %v439_v19  ;;  %v607_v46 = vstv %s2594_s17  ;;  %s2871_s17 = sld [smem:[#allocation3 + $0x79]] }
  0xcb   :  { %v466_v28 = vadd.f32 %v464_v48, %v444_v16  ;;  %v477_v60 = vadd.f32 %v4032_v55, %v462_v36  ;;  %v482_v54 = vadd.f32 %v4033_v24, %v467_v43  ;;  %v4034_v63 = vstv %s2261_s4  ;;  %v546_v43 = vpop.permute.xlu1 %545  ;;  %s2887_s4 = sld [smem:[#allocation3 + $0x6d]] }
  0xcc   :  { %v471_v56 = vadd.f32 %v469_v59, %v449_v7  ;;  %v494_v33 = vmul.f32 %v4034_v63, %v491_v45  ;;  %v487_v37 = vadd.f32 %v4035_v35, %v472_v40  ;;  %v4036_v5 = vstv %s2269_s28  ;;  %s4051_s28 = sld [smem:[#allocation39_spill]] }
  0xcd   :  { %v499_v3 = vmul.f32 %v4036_v5, %v491_v45  ;;  %v4037_v49 = vstv %s2293_s23  ;;  %v476_v44 = vadd.f32 %v4039_v11, %v461_v1  ;;  %v481_v12 = vadd.f32 %v4040_v13, %v466_v28  ;;  %v544_v42 = vpop.permute.xlu0 %543  ;;  %s4076_s23 = sld [smem:[#allocation56_spill]]  ;;  %4091 = sst [smem:[#allocation20_spill]] %s2911_s19 }
  0xce   :  { %v504_v22 = vmul.f32 %v4037_v49, %v491_v45  ;;  %v496_v34 = vadd.f32 %v494_v33, %v477_v60  ;;  %v486_v23 = vadd.f32 %v4041_v10, %v471_v56  ;;  %v4042_v17 = vmov %v4034_v63  ;;  %v4054_v45 = vld [vmem:[#allocation48_spill] sm:$0xff]  ;;  %v4055_v56 = vld [vmem:[#allocation49_spill] sm:$0xff]  ;;  %v4056_v60 = vld [vmem:[#allocation50_spill] sm:$0xff]  ;;  %s3013_s19 = sld [smem:[#allocation3 + $0x5d]] }
  0xcf   :  { %v493_v25 = vmul.f32 %v4042_v17, %v489_v29  ;;  %v501_v14 = vadd.f32 %v499_v3, %v482_v54  ;;  %v4043_v52 = vmov %v4036_v5  ;;  %v4044_v6 = vmov %v4037_v49  ;;  %v4061_v3 = vld [vmem:[#allocation51_spill] sm:$0xff] }
  0xd0   :  { %v506_v30 = vadd.f32 %v504_v22, %v487_v37  ;;  %v498_v27 = vmul.f32 %v4043_v52, %v489_v29  ;;  %v503_v9 = vmul.f32 %v4044_v6, %v489_v29  ;;  %v4045_v21 = vstv %s2295_s0  ;;  %v4062_v22 = vld [vmem:[#allocation52_spill] sm:$0xff]  ;;  %v567_v52 = vpop.permute.xlu1 %566  ;;  %s2891_s0 = sld [smem:[#allocation3 + $0xa3]] }
  0xd1   :  { %v495_v39 = vadd.f32 %v493_v25, %v476_v44  ;;  %v515_v47 = vmul.f32 %v4045_v21, %v512_v41  ;;  %v4046_v51 = vstv %s2303_s7  ;;  %v4047_v8 = vstv %s4038_s25  ;;  %s4060_s7 = sld [smem:[#allocation43_spill]]  ;;  %v4064_v44 = vld [vmem:[#allocation53_spill] sm:$0xff]  ;;  %4082 = sst [smem:[#allocation14_spill]] %s2887_s4 }
  0xd2   :  { %v520_v0 = vmul.f32 %v4046_v51, %v512_v41  ;;  %v525_v19 = vmul.f32 %v4047_v8, %v512_v41  ;;  %v500_v53 = vadd.f32 %v498_v27, %v481_v12  ;;  %v505_v50 = vadd.f32 %v503_v9, %v486_v23  ;;  %v565_v27 = vpop.permute.xlu0 %564  ;;  %s2877_s25 = sld [smem:[#allocation3 + $0x7f]]  ;;  %s2903_s4 = sld [smem:[#allocation3 + $0x8a]] }
  0xd3   :  { %v4048_v20 = vmov %v4045_v21  ;;  %v4049_v16 = vmov %v4046_v51  ;;  %v517_v58 = vadd.f32 %v515_v47, %v496_v34  ;;  %v4052_v15 = vmov %v4047_v8 }
  0xd4   :  { %v514_v57 = vmul.f32 %v4048_v20, %v510_v62  ;;  %v519_v4 = vmul.f32 %v4049_v16, %v510_v62  ;;  %v522_v38 = vadd.f32 %v520_v0, %v501_v14  ;;  %v527_v61 = vadd.f32 %v525_v19, %v506_v30 }
  0xd5   :  { %v524_v48 = vmul.f32 %v4052_v15, %v510_v62  ;;  %v612_v59 = vstv %s2637_s13  ;;  %v4053_v40 = vstv %s2333_s9  ;;  %v532_v29 = vadd.f32 %v4054_v45, %v517_v58  ;;  %s4063_s9 = sld [smem:[#allocation44_spill]]  ;;  %v601_v15 = vpop.permute.xlu1 %600  ;;  %v1555_v45 = vld [vmem:[%s4076_s23 + $0x90] sm:$0xff]  ;;  %s2875_s13 = sld [smem:[#allocation3 + $0x64]] }
  0xd6   :  { %v516_v7 = vadd.f32 %v514_v57, %v495_v39  ;;  %v521_v36 = vadd.f32 %v519_v4, %v500_v53  ;;  %v589_v1 = vmul.f32 %v2011_v18, %v4053_v40  ;;  %v537_v55 = vadd.f32 %v4055_v56, %v522_v38  ;;  %4084 = sst [smem:[#allocation10_spill]] %s2891_s0 }
  0xd7   :  { %v526_v28 = vadd.f32 %v524_v48, %v505_v50  ;;  %v542_v24 = vadd.f32 %v4056_v60, %v527_v61  ;;  %v4057_v54 = vstv %s4050_s18  ;;  %v4058_v33 = vstv %s4051_s28  ;;  %v599_v48 = vpop.permute.xlu0 %598  ;;  %s2879_s18 = sld [smem:[#allocation3 + $0x9a]]  ;;  %s2881_s28 = sld [smem:[#allocation3 + $0x67]] }
  0xd8   :  { %v549_v63 = vmul.f32 %v4057_v54, %v546_v43  ;;  %v554_v35 = vmul.f32 %v4058_v33, %v546_v43  ;;  %v4059_v37 = vstv %s2343_s20  ;;  %v531_v49 = vadd.f32 %v4061_v3, %v516_v7  ;;  %s4077_s20 = smov 1   ;;  %4090 = sst [smem:[#allocation19_spill]] %s2903_s4 }
  0xd9   :  { %v559_v5 = vmul.f32 %v4059_v37, %v546_v43  ;;  %v536_v11 = vadd.f32 %v4062_v22, %v521_v36  ;;  %v541_v34 = vadd.f32 %v4064_v44, %v526_v28  ;;  %v4065_v13 = vmov %v4057_v54  ;;  %v4074_v36 = vld [vmem:[#allocation54_spill] sm:$0xff]  ;;  %s2913_s0 = sld [smem:[#allocation3 + $0x71]]  ;;  %s3015_s4 = sld [smem:[#allocation3 + $0x78]] }
  0xda   :  { %v548_v12 = vmul.f32 %v4065_v13, %v544_v42  ;;  %v4066_v10 = vmov %v4058_v33  ;;  %v551_v17 = vadd.f32 %v549_v63, %v532_v29  ;;  %v556_v25 = vadd.f32 %v554_v35, %v537_v55 }
  0xdb   :  { %v553_v23 = vmul.f32 %v4066_v10, %v544_v42  ;;  %v4067_v14 = vmov %v4059_v37  ;;  %v594_v6 = vmul.f32 %v2011_v18, %v593_v26  ;;  %v561_v9 = vadd.f32 %v559_v5, %v542_v24  ;;  %v1554_v5 = vld [vmem:[%s4076_s23 + $0x88] sm:$0xff]  ;;  %s2899_s23 = sld [smem:[#allocation3 + $0xa7]] }
  0xdc   :  { %v558_v30 = vmul.f32 %v4067_v14, %v544_v42  ;;  %v550_v41 = vadd.f32 %v548_v12, %v531_v49  ;;  %v4068_v62 = vstv %s2345_s30  ;;  %v4069_v21 = vstv %s4060_s7  ;;  %v4075_v42 = vld [vmem:[#allocation55_spill] sm:$0xff]  ;;  %s4078_s30 = smov 127   ;;  %s2883_s7 = sld [smem:[#allocation3 + $0x82]] }
  0xdd   :  { %v570_v39 = vmul.f32 %v4068_v62, %v567_v52  ;;  %v575_v47 = vmul.f32 %v4069_v21, %v567_v52  ;;  %v555_v51 = vadd.f32 %v553_v23, %v536_v11  ;;  %v4070_v0 = vstv %s4063_s9  ;;  %4080 = sst [smem:[#allocation12_spill]] %s2881_s28  ;;  %s2885_s9 = sld [smem:[#allocation3 + $0x9d]] }
  0xde   :  { %v580_v8 = vmul.f32 %v4070_v0, %v567_v52  ;;  %v4071_v19 = vmov %v4068_v62  ;;  %v4072_v50 = vmov %v4069_v21  ;;  %v560_v57 = vadd.f32 %v558_v30, %v541_v34 }
  0xdf   :  { %v569_v53 = vmul.f32 %v4071_v19, %v565_v27  ;;  %v574_v20 = vmul.f32 %v4072_v50, %v565_v27  ;;  %v572_v16 = vadd.f32 %v570_v39, %v551_v17  ;;  %v577_v4 = vadd.f32 %v575_v47, %v556_v25  ;;  %4092 = sst [smem:[#allocation21_spill]] %s2913_s0  ;;  %s2997_s0 = sld [smem:[#allocation3 + $0x77]] }
  0xe0   :  { %v4073_v58 = vmov %v4070_v0  ;;  %v582_v26 = vadd.f32 %v580_v8, %v561_v9  ;;  %v604_v28 = vmul.f32 %v602_v2, %v601_v15  ;;  %v609_v56 = vmul.f32 %v607_v46, %v601_v15 }
  0xe1   :  { %v579_v18 = vmul.f32 %v4073_v58, %v565_v27  ;;  %v571_v38 = vadd.f32 %v569_v53, %v550_v41  ;;  %v576_v61 = vadd.f32 %v574_v20, %v555_v51  ;;  %v587_v43 = vadd.f32 %v4074_v36, %v572_v16  ;;  %4088 = sst [smem:[#allocation17_spill]] %s2899_s23  ;;  %s2981_s23 = sld [smem:[#allocation3 + $0x75]] }
  0xe2   :  { %v592_v40 = vadd.f32 %v4075_v42, %v577_v4  ;;  %v597_v29 = vadd.f32 %v2599_v31, %v582_v26  ;;  %v614_v55 = vmul.f32 %v612_v59, %v601_v15  ;;  %v603_v33 = vmul.f32 %v602_v2, %v599_v48 }
  0xe3   :  { %v581_v7 = vadd.f32 %v579_v18, %v560_v57  ;;  %v586_v60 = vadd.f32 %v2604_v32, %v571_v38  ;;  %v606_v24 = vadd.f32 %v604_v28, %v587_v43  ;;  %v591_v54 = vadd.f32 %v589_v1, %v576_v61  ;;  %4081 = sst [smem:[#allocation13_spill]] %s2885_s9  ;;  %s2901_s9 = sld [smem:[#allocation3 + $0x6f]] }
  0xe4   :  { %v611_v35 = vadd.f32 %v609_v56, %v592_v40  ;;  %v616_v37 = vadd.f32 %v614_v55, %v597_v29  ;;  %v608_v3 = vmul.f32 %v607_v46, %v599_v48  ;;  %v613_v49 = vmul.f32 %v612_v59, %v599_v48 }
  0xe5   :  { %v596_v63 = vadd.f32 %v594_v6, %v581_v7  ;;  %v2725_v31 = vmul.f32 %v1555_v45, %v606_v24  ;;  %v605_v22 = vadd.f32 %v603_v33, %v586_v60  ;;  %v806_v9 = vstv %s2839_s21  ;;  %s2919_s21 = sld [smem:[#allocation3 + $0x8c]] }
  0xe6   :  { %v2727_v11 = vmul.f32 %v1555_v45, %v611_v35  ;;  %v2729_v32 = vmul.f32 %v1555_v45, %v616_v37  ;;  %v610_v1 = vadd.f32 %v608_v3, %v591_v54  ;;  %v811_v41 = vstv %s2841_s26  ;;  %s4094_s26 = sld [smem:[#allocation13_spill]] }
  0xe7   :  { %v615_v44 = vadd.f32 %v613_v49, %v596_v63  ;;  %636 = vst [vmem:[#allocation2 + $0x10] sm:$0xff] %v2725_v31  ;;  %v2732_v2 = vmul.f32 %v1554_v5, %v605_v22  ;;  %v816_v62 = vstv %s2843_s11  ;;  %v971_v39 = vstv %s2845_s22  ;;  %s4095_s11 = sld [smem:[#allocation14_spill]]  ;;  %s2979_s22 = sld [smem:[#allocation3 + $0x5a]] }
  0xe8   :  { %639 = vst [vmem:[#allocation2 + $0x30] sm:$0xff] %v2727_v11  ;;  %642 = vst [vmem:[#allocation2 + $0x50] sm:$0xff] %v2729_v32  ;;  %v2736_v34 = vmul.f32 %v1554_v5, %v610_v1  ;;  %v976_v21 = vstv %s2847_s10  ;;  %v981_v47 = vstv %s2849_s14  ;;  %v751_v51 = vstv %s2857_s2  ;;  %s4097_s10 = sld [smem:[#allocation11_spill]]  ;;  %s2929_s14 = sld [smem:[#allocation3 + $0x57]] }
  0xe9   :  { %v2738_v46 = vmul.f32 %v1554_v5, %v615_v44  ;;  %635 = vst [vmem:[#allocation2 + $0x8] sm:$0xff] %v2732_v2  ;;  %4089 = sst [smem:[#allocation18_spill]] %s2901_s9  ;;  %v1136_v0 = vstv %s2851_s27  ;;  %v1141_v8 = vstv %s2853_s29  ;;  %v1146_v19 = vstv %s2855_s3  ;;  %s2935_s27 = sld [smem:[#allocation3 + $0x72]] }
  0xea   :  { %638 = vst [vmem:[#allocation2 + $0x28] sm:$0xff] %v2736_v34  ;;  %v756_v53 = vstv %s2859_s1  ;;  %v761_v50 = vstv %s2861_s12  ;;  %v861_v20 = vstv %s2863_s24  ;;  %v866_v57 = vstv %s2865_s5  ;;  %s2937_s29 = sld [smem:[#allocation3 + $0x8d]]  ;;  %s2950_s3 = sld [smem:[#allocation3 + $0x59]] }
  0xeb   :  { %641 = vst [vmem:[#allocation2 + $0x48] sm:$0xff] %v2738_v46  ;;  %4093 = sst [smem:[#allocation22_spill]] %s2919_s21  ;;  %v871_v16 = vstv %s2867_s6  ;;  %v916_v4 = vstv %s2869_s8  ;;  %v921_v58 = vstv %s2871_s17  ;;  %v926_v18 = vstv %s2873_s15  ;;  %s2999_s21 = sld [smem:[#allocation3 + $0x92]] }
  0xec   :  { %v1026_v26 = vstv %s2875_s13  ;;  %v1031_v38 = vstv %s2877_s25  ;;  %v1036_v61 = vstv %s2879_s18  ;;  %v1081_v15 = vstv %s2881_s28  ;;  %s2955_s28 = sld [smem:[#allocation3 + $0x74]]  ;;  %s3121_s2 = sld [smem:[#allocation3 + $0x7d]] }
  0xed   :  { %v1086_v48 = vstv %s2883_s7  ;;  %v1091_v7 = vstv %s4094_s26  ;;  %v3849_v36 = vstv %s4095_s11  ;;  %v3854_v43 = vstv %s2889_s16  ;;  %s2957_s26 = sld [smem:[#allocation3 + $0x8f]]  ;;  %s3109_s11 = sld [smem:[#allocation3 + $0x96]] }
  0xee   :  { %v2763_v12 = vld [vmem:[#allocation2 + $0x11] sm:$0xff]  ;;  %4098 = sst [smem:[#allocation23_spill]] %s2929_s14  ;;  %v736_v29 = vstv %s4097_s10  ;;  %v741_v56 = vstv %s2901_s9  ;;  %v2953_v60 = vmul.f32 %v806_v9, %v2725_v31  ;;  %v2960_v24 = vmul.f32 %v811_v41, %v2725_v31  ;;  %s3037_s9 = sld [smem:[#allocation3 + $0x93]] }
  0xef   :  { %v2795_v25 = vld [vmem:[#allocation2 + $0x31] sm:$0xff]  ;;  %4099 = sst [smem:[#allocation24_spill]] %s2935_s27  ;;  %v2963_v54 = vmul.f32 %v816_v62, %v2725_v31  ;;  %v2966_v63 = vmul.f32 %v971_v39, %v2727_v11  ;;  %v2969_v33 = vmul.f32 %v976_v21, %v2727_v11  ;;  %v2974_v5 = vmul.f32 %v806_v9, %v2732_v2  ;;  %s3053_s27 = sld [smem:[#allocation3 + $0x95]] }
  0xf0   :  { %v2743_v59 = vld [vmem:[#allocation2 + $0xf] sm:$0xff]  ;;  %v2745_v13 = vld [vmem:[#allocation2 + $0x7] sm:$0xff]  ;;  %4100 = sst [smem:[#allocation25_spill]] %s2937_s29  ;;  %v2977_v3 = vmul.f32 %v811_v41, %v2732_v2  ;;  %v2992_v22 = vmul.f32 %v981_v47, %v2727_v11  ;;  %v2995_v1 = vmul.f32 %v971_v39, %v2736_v34  ;;  %v3002_v44 = vmul.f32 %v976_v21, %v2736_v34  ;;  %s3039_s10 = sld [smem:[#allocation3 + $0x5f]] }
  0xf1   :  { %734 = vrot.lane.b32.xlu1 %v2743_v59, %s4077_s20  ;;  %732 = vrot.lane.b32.xlu0 %v2745_v13, %s4077_s20  ;;  %v2765_v10 = vld [vmem:[#allocation2 + $0x9] sm:$0xff]  ;;  %v2827_v27 = vld [vmem:[#allocation2 + $0x51] sm:$0xff]  ;;  %v3011_v9 = vmul.f32 %v1141_v8, %v2729_v32  ;;  %v3018_v41 = vmul.f32 %v1146_v19, %v2729_v32  ;;  %v3027_v39 = vmul.f32 %v1146_v19, %v2738_v46  ;;  %s3051_s29 = sld [smem:[#allocation3 + $0x7a]]  ;;  %s3075_s14 = sld [smem:[#allocation3 + $0x60]] }
  0xf2   :  { %v2775_v23 = vld [vmem:[#allocation2 + $0x2f] sm:$0xff]  ;;  %v2777_v17 = vld [vmem:[#allocation2 + $0x27] sm:$0xff]  ;;  %4101 = sst [smem:[#allocation26_spill]] %s2955_s28  ;;  %v3063_v19 = vmul.f32 %v1031_v38, %v2795_v25  ;;  %v3073_v45 = vmul.f32 %v756_v53, %v2743_v59  ;;  %v3087_v21 = vmul.f32 %v3849_v36, %v2827_v27  ;;  %v3092_v49 = vmul.f32 %v761_v50, %v2743_v59  ;;  %s3123_s1 = sld [smem:[#allocation3 + $0x98]] }
  0xf3   :  { %v2797_v14 = vld [vmem:[#allocation2 + $0x29] sm:$0xff]  ;;  %4102 = sst [smem:[#allocation27_spill]] %s2957_s26  ;;  %4104 = vst [vmem:[#allocation45_spill] sm:$0xff] %v3011_v9  ;;  %4105 = vst [vmem:[#allocation42_spill] sm:$0xff] %v3018_v41  ;;  %v3097_v37 = vmul.f32 %v751_v51, %v2745_v13  ;;  %v3102_v35 = vmul.f32 %v756_v53, %v2745_v13  ;;  %v3119_v53 = vmul.f32 %v861_v20, %v2765_v10  ;;  %s3145_s24 = sld [smem:[#allocation3 + $0x63]] }
  0xf4   :  { %v2807_v30 = vld [vmem:[#allocation2 + $0x4f] sm:$0xff]  ;;  %v2809_v52 = vld [vmem:[#allocation2 + $0x47] sm:$0xff]  ;;  %4108 = vst [vmem:[#allocation48_spill] sm:$0xff] %v3027_v39  ;;  %4109 = sst [smem:[#allocation28_spill]] %s3037_s9  ;;  %4114 = vst [vmem:[#allocation49_spill] sm:$0xff] %v3087_v21  ;;  %s3147_s5 = sld [smem:[#allocation3 + $0x7e]]  ;;  %v3167_v36 = vmul.f32 %v926_v18, %v2777_v17 }
  0xf5   :  { %768 = vrot.lane.b32.xlu1 %v2743_v59, %s4078_s30  ;;  %766 = vrot.lane.b32.xlu0 %v2745_v13, %s4078_s30  ;;  %v2829_v6 = vld [vmem:[#allocation2 + $0x49] sm:$0xff]  ;;  %4112 = sst [smem:[#allocation31_spill]] %s3053_s27  ;;  %s3077_s27 = sld [smem:[#allocation3 + $0x7b]] }
  0xf6   :  { %4079 = vst [vmem:[#allocation40_spill] sm:$0xff] %v2829_v6  ;;  %4110 = sst [smem:[#allocation29_spill]] %s3039_s10  ;;  %s3169_s26 = sld [smem:[#allocation3 + $0x99]] }
  0xf7   :  { %4111 = sst [smem:[#allocation30_spill]] %s3051_s29  ;;  %s3190_s8 = sld [smem:[#allocation3 + $0x80]] }
  0xf8   :  { %s3171_s28 = sld [smem:[#allocation3 + $0x65]]  ;;  %s3192_s17 = sld [smem:[#allocation3 + $0x9b]] }
  0xf9   :  { %789 = vrot.lane.b32.xlu1 %v2725_v31, %s4077_s20  ;;  %787 = vrot.lane.b32.xlu0 %v2732_v2, %s4077_s20  ;;  %s4120_s15 = sld [smem:[#allocation31_spill]]  ;;  %s3230_s18 = sld [smem:[#allocation3 + $0x81]] }
  0xfa   :  { %4116 = sst [smem:[#allocation33_spill]] %s3147_s5  ;;  %s3228_s25 = sld [smem:[#allocation3 + $0x66]] }
  0xfb   :  { %4113 = sst [smem:[#allocation32_spill]] %s3077_s27  ;;  %s3111_s27 = sld [smem:[#allocation3 + $0x62]] }
  0xfc   :  { %4118 = sst [smem:[#allocation34_spill]] %s3169_s26  ;;  %s4121_s13 = sld [smem:[#allocation32_spill]] }
  0xfd   :  { %823 = vrot.lane.b32.xlu1 %v2725_v31, %s4078_s30  ;;  %821 = vrot.lane.b32.xlu0 %v2732_v2, %s4078_s30  ;;  %v2985_v31 = vmul.f32 %v816_v62, %v2732_v2  ;;  %v3005_v2 = vmul.f32 %v981_v47, %v2736_v34  ;;  %v3024_v62 = vmul.f32 %v1141_v8, %v2738_v46  ;;  %s4126_s6 = sld [smem:[#allocation19_spill]]  ;;  %s3249_s9 = sld [smem:[#allocation3 + $0x9c]] }
  0xfe   :  { %v3058_v8 = vmul.f32 %v1026_v26, %v2795_v25  ;;  %v3082_v47 = vmul.f32 %v1036_v61, %v2795_v25  ;;  %4119 = sst [smem:[#allocation35_spill]] %s3171_s28  ;;  %s4129_s29 = sld [smem:[#allocation17_spill]] }
  0xff   :  { %4107 = vst [vmem:[#allocation47_spill] sm:$0xff] %v3024_v62  ;;  %s4133_s26 = sld [smem:[#allocation20_spill]]  ;;  %s4135_s28 = sld [smem:[#allocation21_spill]] }
 0x100   :  { %s4137_s5 = sld [smem:[#allocation22_spill]]  ;;  %s3277_s7 = sld [smem:[#allocation3 + $0x68]] }
 0x101   :  { %844 = vrot.lane.b32.xlu1 %v2763_v12, %s4077_s20  ;;  %842 = vrot.lane.b32.xlu0 %v2765_v10, %s4077_s20  ;;  %s3285_s12 = sld [smem:[#allocation3 + $0x83]] }
 0x105   :  { %878 = vrot.lane.b32.xlu1 %v2763_v12, %s4078_s30  ;;  %876 = vrot.lane.b32.xlu0 %v2765_v10, %s4078_s30 }
 0x109   :  { %899 = vrot.lane.b32.xlu1 %v2775_v23, %s4077_s20  ;;  %897 = vrot.lane.b32.xlu0 %v2777_v17, %s4077_s20 }
 0x10d   :  { %933 = vrot.lane.b32.xlu1 %v2775_v23, %s4078_s30  ;;  %931 = vrot.lane.b32.xlu0 %v2777_v17, %s4078_s30 }
 0x111   :  { %954 = vrot.lane.b32.xlu1 %v2727_v11, %s4077_s20  ;;  %952 = vrot.lane.b32.xlu0 %v2736_v34, %s4077_s20 }
 0x115   :  { %988 = vrot.lane.b32.xlu1 %v2727_v11, %s4078_s30  ;;  %986 = vrot.lane.b32.xlu0 %v2736_v34, %s4078_s30  ;;  %v3008_v11 = vmul.f32 %v1136_v0, %v2729_v32  ;;  %v3021_v34 = vmul.f32 %v1136_v0, %v2738_v46  ;;  %v3049_v0 = vmul.f32 %v871_v16, %v2763_v12 }
 0x117   :  { %4103 = vst [vmem:[#allocation41_spill] sm:$0xff] %v3008_v11  ;;  %4106 = vst [vmem:[#allocation46_spill] sm:$0xff] %v3021_v34  ;;  %v4136_v34 = vstv %s4129_s29  ;;  %s4146_s29 = sld [smem:[#allocation25_spill]] }
 0x119   :  { %1009 = vrot.lane.b32.xlu1 %v2795_v25, %s4077_s20  ;;  %1007 = vrot.lane.b32.xlu0 %v2797_v14, %s4077_s20 }
 0x11d   :  { %1043 = vrot.lane.b32.xlu1 %v2795_v25, %s4078_s30  ;;  %1041 = vrot.lane.b32.xlu0 %v2797_v14, %s4078_s30  ;;  %v3107_v25 = vmul.f32 %v761_v50, %v2745_v13  ;;  %v3128_v13 = vmul.f32 %v866_v57, %v2765_v10  ;;  %v3133_v50 = vmul.f32 %v871_v16, %v2765_v10 }
 0x11e   :  { %v3157_v10 = vmul.f32 %v916_v4, %v2777_v17  ;;  %v3162_v16 = vmul.f32 %v921_v58, %v2777_v17  ;;  %v3187_v17 = vmul.f32 %v1036_v61, %v2797_v14 }
 0x121   :  { %1064 = vrot.lane.b32.xlu1 %v2807_v30, %s4077_s20  ;;  %1062 = vrot.lane.b32.xlu0 %v2809_v52, %s4077_s20 }
 0x125   :  { %1098 = vrot.lane.b32.xlu1 %v2807_v30, %s4078_s30  ;;  %1096 = vrot.lane.b32.xlu0 %v2809_v52, %s4078_s30 }
 0x129   :  { %1119 = vrot.lane.b32.xlu1 %v2729_v32, %s4077_s20  ;;  %1117 = vrot.lane.b32.xlu0 %v2738_v46, %s4077_s20 }
 0x12d   :  { %1153 = vrot.lane.b32.xlu1 %v2729_v32, %s4078_s30  ;;  %1151 = vrot.lane.b32.xlu0 %v2738_v46, %s4078_s30  ;;  %v3035_v32 = vmul.f32 %v861_v20, %v2763_v12  ;;  %v3044_v46 = vmul.f32 %v866_v57, %v2763_v12  ;;  %v3068_v12 = vmul.f32 %v751_v51, %v2743_v59 }
 0x12e   :  { %v3138_v20 = vmul.f32 %v916_v4, %v2775_v23  ;;  %v3143_v51 = vmul.f32 %v921_v58, %v2775_v23  ;;  %v3152_v57 = vmul.f32 %v926_v18, %v2775_v23  ;;  %v3177_v4 = vmul.f32 %v1026_v26, %v2797_v14 }
 0x12f   :  { %v3182_v58 = vmul.f32 %v1031_v38, %v2797_v14  ;;  %v3197_v26 = vmul.f32 %v1081_v15, %v2807_v30  ;;  %v3202_v38 = vmul.f32 %v1086_v48, %v2807_v30  ;;  %v3207_v14 = vmul.f32 %v1091_v7, %v2807_v30 }
 0x130   :  { %v3213_v18 = vmul.f32 %v1081_v15, %v2809_v52  ;;  %v3218_v23 = vmul.f32 %v1086_v48, %v2809_v52  ;;  %v3223_v59 = vmul.f32 %v1091_v7, %v2809_v52  ;;  %v3235_v15 = vmul.f32 %v3854_v43, %v2827_v27 }
 0x131   :  { %1174 = vrot.lane.b32.xlu1 %v2827_v27, %s4077_s20  ;;  %1172 = vrot.lane.b32.xlu0 %v2829_v6, %s4077_s20  ;;  %s2895_s20 = sld [smem:[#allocation3 + $0xa5]]  ;;  %v4130_v52 = vstv %s4126_s6  ;;  %s3322_s6 = sld [smem:[#allocation3 + $0x69]] }
 0x132   :  { %4122 = vst [vmem:[#allocation50_spill] sm:$0xff] %v3223_v59  ;;  %4123 = vst [vmem:[#allocation51_spill] sm:$0xff] %v3235_v15  ;;  %v4131_v21 = vmov %v4130_v52  ;;  %v4152_v59 = vstv %s4146_s29 }
 0x135   :  { %1208 = vrot.lane.b32.xlu1 %v2827_v27, %s4078_s30  ;;  %1206 = vrot.lane.b32.xlu0 %v2829_v6, %s4078_s30  ;;  %s2897_s30 = sld [smem:[#allocation3 + $0xa6]] }
 0x137   :  { %4086 = sst [smem:[#allocation15_spill]] %s2895_s20  ;;  %s2989_s20 = sld [smem:[#allocation3 + $0x5c]] }
 0x138   :  { %s4127_s16 = sld [smem:[#allocation15_spill]] }
 0x13b   :  { %4087 = sst [smem:[#allocation16_spill]] %s2897_s30  ;;  %s2987_s30 = sld [smem:[#allocation3 + $0x90]] }
 0x13c   :  { %s4128_s10 = sld [smem:[#allocation16_spill]] }
 0x13e   :  { %v4132_v39 = vstv %s4127_s16  ;;  %s4144_s16 = sld [smem:[#allocation23_spill]] }
 0x13f   :  { %v4138_v9 = vmov %v4132_v39 }
 0x142   :  { %v4134_v55 = vstv %s4128_s10  ;;  %s4145_s10 = sld [smem:[#allocation24_spill]] }
 0x144   :  { %v4150_v61 = vstv %s4144_s16 }
 0x163   :  { %v735_v7 = vpop.permute.xlu1 %734  ;;  %v733_v28 = vpop.permute.xlu0 %732 }
 0x164   :  { %v738_v27 = vmul.f32 %v736_v29, %v735_v7  ;;  %v743_v43 = vmul.f32 %v741_v56, %v735_v7  ;;  %v748_v40 = vmul.f32 %v4130_v52, %v735_v7  ;;  %v737_v48 = vmul.f32 %v736_v29, %v733_v28 }
 0x165   :  { %v742_v15 = vmul.f32 %v741_v56, %v733_v28  ;;  %v747_v6 = vmul.f32 %v4131_v21, %v733_v28  ;;  %v4139_v29 = vmov %v4134_v55  ;;  %v4140_v56 = vmov %v4136_v34 }
 0x166   :  { %v740_v42 = vadd.f32 %v738_v27, %v4132_v39  ;;  %v745_v62 = vadd.f32 %v743_v43, %v4134_v55  ;;  %v750_v41 = vadd.f32 %v748_v40, %v4136_v34  ;;  %v739_v52 = vadd.f32 %v737_v48, %v4138_v9 }
 0x167   :  { %v744_v7 = vadd.f32 %v742_v15, %v4139_v29  ;;  %v749_v28 = vadd.f32 %v747_v6, %v4140_v56  ;;  %v769_v21 = vpop.permute.xlu1 %768  ;;  %v767_v30 = vpop.permute.xlu0 %766  ;;  %v4141_v9 = vstv %s4133_s26  ;;  %v4142_v15 = vstv %s4135_s28  ;;  %s4156_s28 = sld [smem:[#allocation26_spill]]  ;;  %s4157_s26 = sld [smem:[#allocation27_spill]] }
 0x168   :  { %v755_v43 = vadd.f32 %v3068_v12, %v740_v42  ;;  %v760_v40 = vadd.f32 %v3073_v45, %v745_v62  ;;  %v765_v55 = vadd.f32 %v3092_v49, %v750_v41  ;;  %v772_v34 = vmul.f32 %v4141_v9, %v769_v21 }
 0x169   :  { %v777_v48 = vmul.f32 %v4142_v15, %v769_v21  ;;  %v4143_v6 = vstv %s4137_s5  ;;  %v754_v56 = vadd.f32 %v3097_v37, %v739_v52  ;;  %v759_v27 = vadd.f32 %v3102_v35, %v744_v7  ;;  %s3319_s5 = sld [smem:[#allocation3 + $0x9e]] }
 0x16a   :  { %v782_v29 = vmul.f32 %v4143_v6, %v769_v21  ;;  %v764_v39 = vadd.f32 %v3107_v25, %v749_v28  ;;  %v4147_v42 = vmov %v4141_v9  ;;  %v4148_v62 = vmov %v4142_v15 }
 0x16b   :  { %v771_v45 = vmul.f32 %v4147_v42, %v767_v30  ;;  %v776_v49 = vmul.f32 %v4148_v62, %v767_v30  ;;  %v774_v12 = vadd.f32 %v772_v34, %v755_v43  ;;  %v779_v9 = vadd.f32 %v777_v48, %v760_v40  ;;  %v790_v37 = vpop.permute.xlu1 %789  ;;  %v788_v52 = vpop.permute.xlu0 %787 }
 0x16c   :  { %v784_v21 = vadd.f32 %v782_v29, %v765_v55  ;;  %v4149_v15 = vmov %v4143_v6  ;;  %v793_v25 = vmul.f32 %v4150_v61, %v790_v37  ;;  %v4151_v28 = vstv %s4145_s10 }
 0x16d   :  { %v781_v6 = vmul.f32 %v4149_v15, %v767_v30  ;;  %v773_v35 = vadd.f32 %v771_v45, %v754_v56  ;;  %v778_v7 = vadd.f32 %v776_v49, %v759_v27  ;;  %v798_v42 = vmul.f32 %v4151_v28, %v790_v37 }
 0x16e   :  { %v803_v62 = vmul.f32 %v4152_v59, %v790_v37  ;;  %v4153_v41 = vmov %v4150_v61  ;;  %v4154_v34 = vmov %v4151_v28  ;;  %v795_v55 = vadd.f32 %v793_v25, %v774_v12 }
 0x16f   :  { %v783_v11 = vadd.f32 %v781_v6, %v764_v39  ;;  %v792_v43 = vmul.f32 %v4153_v41, %v788_v52  ;;  %v797_v40 = vmul.f32 %v4154_v34, %v788_v52  ;;  %v800_v48 = vadd.f32 %v798_v42, %v779_v9  ;;  %v824_v49 = vpop.permute.xlu1 %823  ;;  %v822_v39 = vpop.permute.xlu0 %821 }
 0x170   :  { %v4155_v30 = vmov %v4152_v59  ;;  %v1100_v27 = vstv %s3277_s7  ;;  %v805_v56 = vadd.f32 %v803_v62, %v784_v21  ;;  %v1105_v59 = vstv %s3285_s12 }
 0x171   :  { %v802_v29 = vmul.f32 %v4155_v30, %v788_v52  ;;  %v794_v61 = vadd.f32 %v792_v43, %v773_v35  ;;  %v799_v45 = vadd.f32 %v797_v40, %v778_v7  ;;  %v810_v12 = vadd.f32 %v2953_v60, %v795_v55 }
 0x172   :  { %v815_v9 = vadd.f32 %v2960_v24, %v800_v48  ;;  %v4158_v15 = vstv %s2950_s3  ;;  %v820_v21 = vadd.f32 %v2963_v54, %v805_v56  ;;  %v4159_v37 = vstv %s4156_s28  ;;  %s3354_s3 = sld [smem:[#allocation3 + $0x84]] }
 0x173   :  { %v804_v41 = vadd.f32 %v802_v29, %v783_v11  ;;  %v827_v6 = vmul.f32 %v4158_v15, %v824_v49  ;;  %v832_v52 = vmul.f32 %v4159_v37, %v824_v49  ;;  %v4160_v35 = vstv %s4157_s26  ;;  %v845_v48 = vpop.permute.xlu1 %844  ;;  %v843_v30 = vpop.permute.xlu0 %842 }
 0x174   :  { %v837_v7 = vmul.f32 %v4160_v35, %v824_v49  ;;  %v809_v25 = vadd.f32 %v2974_v5, %v794_v61  ;;  %v814_v11 = vadd.f32 %v2977_v3, %v799_v45  ;;  %v4161_v24 = vmov %v4158_v15 }
 0x175   :  { %v829_v28 = vadd.f32 %v827_v6, %v810_v12  ;;  %v819_v60 = vadd.f32 %v2985_v31, %v804_v41  ;;  %v826_v42 = vmul.f32 %v4161_v24, %v822_v39  ;;  %v834_v62 = vadd.f32 %v832_v52, %v815_v9 }
 0x176   :  { %v839_v43 = vadd.f32 %v837_v7, %v820_v21  ;;  %v4162_v54 = vmov %v4159_v37  ;;  %v4163_v40 = vmov %v4160_v35  ;;  %v4164_v5 = vstv %s2979_s22  ;;  %s3357_s22 = sld [smem:[#allocation3 + $0x9f]] }
 0x177   :  { %v831_v34 = vmul.f32 %v4162_v54, %v822_v39  ;;  %v836_v55 = vmul.f32 %v4163_v40, %v822_v39  ;;  %v828_v29 = vadd.f32 %v826_v42, %v809_v25  ;;  %v848_v56 = vmul.f32 %v4164_v5, %v845_v48  ;;  %v879_v24 = vpop.permute.xlu1 %878 }
 0x178   :  { %v4165_v61 = vstv %s2981_s23  ;;  %v4166_v45 = vstv %s2987_s30  ;;  %v4167_v12 = vmov %v4164_v5  ;;  %v1121_v42 = vstv %s3322_s6  ;;  %s4173_s23 = sld [smem:[#allocation28_spill]] }
 0x179   :  { %v853_v3 = vmul.f32 %v4165_v61, %v845_v48  ;;  %v858_v49 = vmul.f32 %v4166_v45, %v845_v48  ;;  %v833_v31 = vadd.f32 %v831_v34, %v814_v11  ;;  %v838_v41 = vadd.f32 %v836_v55, %v819_v60  ;;  %v877_v11 = vpop.permute.xlu0 %876  ;;  %s3392_s30 = sld [smem:[#allocation3 + $0x6b]] }
 0x17a   :  { %v847_v9 = vmul.f32 %v4167_v12, %v843_v30  ;;  %v4168_v15 = vmov %v4165_v61  ;;  %v850_v21 = vadd.f32 %v848_v56, %v829_v28  ;;  %v4169_v52 = vmov %v4166_v45 }
 0x17b   :  { %v852_v6 = vmul.f32 %v4168_v15, %v843_v30  ;;  %v855_v39 = vadd.f32 %v853_v3, %v834_v62  ;;  %v860_v37 = vadd.f32 %v858_v49, %v839_v43  ;;  %v857_v35 = vmul.f32 %v4169_v52, %v843_v30 }
 0x17c   :  { %v849_v7 = vadd.f32 %v847_v9, %v828_v29  ;;  %v1110_v60 = vstv %s3319_s5  ;;  %v865_v62 = vadd.f32 %v3035_v32, %v850_v21  ;;  %v4170_v34 = vstv %s2989_s20  ;;  %v900_v9 = vpop.permute.xlu1 %899  ;;  %s4184_s20 = sld [smem:[#allocation30_spill]] }
 0x17d   :  { %v854_v25 = vadd.f32 %v852_v6, %v833_v31  ;;  %v859_v28 = vadd.f32 %v857_v35, %v838_v41  ;;  %v870_v43 = vadd.f32 %v3044_v46, %v855_v39  ;;  %v875_v54 = vadd.f32 %v3049_v0, %v860_v37 }
 0x17e   :  { %v882_v40 = vmul.f32 %v4170_v34, %v879_v24  ;;  %v4171_v55 = vstv %s2997_s0  ;;  %v4172_v30 = vstv %s2999_s21  ;;  %v864_v5 = vadd.f32 %v3119_v53, %v849_v7  ;;  %v898_v53 = vpop.permute.xlu0 %897  ;;  %s4182_s0 = sld [smem:[#allocation29_spill]] }
 0x17f   :  { %v887_v48 = vmul.f32 %v4171_v55, %v879_v24  ;;  %v892_v29 = vmul.f32 %v4172_v30, %v879_v24  ;;  %v869_v56 = vadd.f32 %v3128_v13, %v854_v25  ;;  %v874_v32 = vadd.f32 %v3133_v50, %v859_v28  ;;  %s3430_s21 = sld [smem:[#allocation3 + $0x6c]] }
 0x180   :  { %v4174_v61 = vmov %v4170_v34  ;;  %v4175_v0 = vmov %v4171_v55  ;;  %v884_v45 = vadd.f32 %v882_v40, %v865_v62  ;;  %v4176_v41 = vmov %v4172_v30  ;;  %v934_v30 = vpop.permute.xlu1 %933 }
 0x181   :  { %v881_v46 = vmul.f32 %v4174_v61, %v877_v11  ;;  %v886_v3 = vmul.f32 %v4175_v0, %v877_v11  ;;  %v889_v49 = vadd.f32 %v887_v48, %v870_v43  ;;  %v894_v31 = vadd.f32 %v892_v29, %v875_v54 }
 0x182   :  { %v891_v12 = vmul.f32 %v4176_v41, %v877_v11  ;;  %v4177_v13 = vstv %s3013_s19  ;;  %v4178_v50 = vstv %s3015_s4  ;;  %v4179_v52 = vstv %s4173_s23  ;;  %v932_v29 = vpop.permute.xlu0 %931  ;;  %s3394_s4 = sld [smem:[#allocation3 + $0x86]]  ;;  %s3426_s19 = sld [smem:[#allocation3 + $0xa1]] }
 0x183   :  { %v883_v15 = vadd.f32 %v881_v46, %v864_v5  ;;  %v888_v6 = vadd.f32 %v886_v3, %v869_v56  ;;  %v903_v21 = vmul.f32 %v4177_v13, %v900_v9  ;;  %v908_v39 = vmul.f32 %v4178_v50, %v900_v9 }
 0x184   :  { %v893_v37 = vadd.f32 %v891_v12, %v874_v32  ;;  %v913_v35 = vmul.f32 %v4179_v52, %v900_v9  ;;  %v4180_v7 = vmov %v4177_v13  ;;  %v4181_v24 = vmov %v4178_v50 }
 0x185   :  { %v902_v25 = vmul.f32 %v4180_v7, %v898_v53  ;;  %v907_v28 = vmul.f32 %v4181_v24, %v898_v53  ;;  %v905_v62 = vadd.f32 %v903_v21, %v884_v45  ;;  %v910_v43 = vadd.f32 %v908_v39, %v889_v49 }
 0x186   :  { %v4183_v11 = vmov %v4179_v52  ;;  %v1126_v34 = vstv %s3354_s3  ;;  %v915_v40 = vadd.f32 %v913_v35, %v894_v31  ;;  %v1131_v5 = vstv %s3357_s22  ;;  %v953_v52 = vpop.permute.xlu0 %952 }
 0x187   :  { %v912_v54 = vmul.f32 %v4183_v11, %v898_v53  ;;  %v904_v55 = vadd.f32 %v902_v25, %v883_v15  ;;  %v909_v48 = vadd.f32 %v907_v28, %v888_v6  ;;  %v920_v32 = vadd.f32 %v3138_v20, %v905_v62 }
 0x188   :  { %v925_v61 = vadd.f32 %v3143_v51, %v910_v43  ;;  %v4185_v46 = vstv %s4182_s0  ;;  %v930_v3 = vadd.f32 %v3152_v57, %v915_v40  ;;  %v4186_v45 = vstv %s4184_s20 }
 0x189   :  { %v914_v56 = vadd.f32 %v912_v54, %v893_v37  ;;  %v937_v0 = vmul.f32 %v4185_v46, %v934_v30  ;;  %v942_v49 = vmul.f32 %v4186_v45, %v934_v30  ;;  %v4187_v31 = vstv %s4120_s15  ;;  %v955_v37 = vpop.permute.xlu1 %954  ;;  %s4233_s15 = sld [smem:[#allocation10_spill]] }
 0x18a   :  { %v947_v41 = vmul.f32 %v4187_v31, %v934_v30  ;;  %v919_v12 = vadd.f32 %v3157_v10, %v904_v55  ;;  %v924_v53 = vadd.f32 %v3162_v16, %v909_v48  ;;  %v4188_v20 = vmov %v4185_v46 }
 0x18b   :  { %v939_v9 = vadd.f32 %v937_v0, %v920_v32  ;;  %v929_v51 = vadd.f32 %v3167_v36, %v914_v56  ;;  %v936_v15 = vmul.f32 %v4188_v20, %v932_v29  ;;  %v944_v6 = vadd.f32 %v942_v49, %v925_v61  ;;  %v987_v0 = vpop.permute.xlu0 %986 }
 0x18c   :  { %v949_v13 = vadd.f32 %v947_v41, %v930_v3  ;;  %v4189_v57 = vmov %v4186_v45  ;;  %v4190_v50 = vmov %v4187_v31  ;;  %v4191_v10 = vstv %s3075_s14  ;;  %s4201_s14 = sld [smem:[#allocation34_spill]] }
 0x18d   :  { %v941_v21 = vmul.f32 %v4189_v57, %v932_v29  ;;  %v946_v39 = vmul.f32 %v4190_v50, %v932_v29  ;;  %v938_v35 = vadd.f32 %v936_v15, %v919_v12  ;;  %v958_v7 = vmul.f32 %v4191_v10, %v955_v37  ;;  %v989_v46 = vpop.permute.xlu1 %988 }
 0x18e   :  { %v4192_v25 = vstv %s4121_s13  ;;  %v4193_v24 = vstv %s3109_s11  ;;  %v4194_v43 = vmov %v4191_v10  ;;  %v1155_v3 = vstv %s3392_s30  ;;  %s4200_s11 = sld [smem:[#allocation33_spill]] }
 0x18f   :  { %v963_v16 = vmul.f32 %v4192_v25, %v955_v37  ;;  %v968_v36 = vmul.f32 %v4193_v24, %v955_v37  ;;  %v943_v28 = vadd.f32 %v941_v21, %v924_v53  ;;  %v948_v62 = vadd.f32 %v946_v39, %v929_v51 }
 0x190   :  { %v957_v11 = vmul.f32 %v4194_v43, %v953_v52  ;;  %v4195_v54 = vmov %v4192_v25  ;;  %v960_v55 = vadd.f32 %v958_v7, %v939_v9  ;;  %v4196_v29 = vmov %v4193_v24 }
 0x191   :  { %v962_v40 = vmul.f32 %v4195_v54, %v953_v52  ;;  %v965_v48 = vadd.f32 %v963_v16, %v944_v6  ;;  %v970_v30 = vadd.f32 %v968_v36, %v949_v13  ;;  %v967_v56 = vmul.f32 %v4196_v29, %v953_v52  ;;  %v1010_v7 = vpop.permute.xlu1 %1009 }
 0x192   :  { %v959_v32 = vadd.f32 %v957_v11, %v938_v35  ;;  %v1160_v45 = vstv %s3394_s4  ;;  %v975_v31 = vadd.f32 %v2966_v63, %v960_v55  ;;  %v4197_v9 = vstv %s3111_s27  ;;  %s4210_s27 = sld [smem:[#allocation35_spill]] }
 0x193   :  { %v964_v61 = vadd.f32 %v962_v40, %v943_v28  ;;  %v969_v49 = vadd.f32 %v967_v56, %v948_v62  ;;  %v980_v41 = vadd.f32 %v2969_v33, %v965_v48  ;;  %v985_v12 = vadd.f32 %v2992_v22, %v970_v30 }
 0x194   :  { %v992_v53 = vmul.f32 %v4197_v9, %v989_v46  ;;  %v4198_v51 = vstv %s3121_s2  ;;  %v4199_v15 = vstv %s3123_s1  ;;  %v974_v13 = vadd.f32 %v2995_v1, %v959_v32  ;;  %v1008_v1 = vpop.permute.xlu0 %1007  ;;  %s3463_s2 = sld [smem:[#allocation3 + $0x87]]  ;;  %s3465_s1 = sld [smem:[#allocation3 + $0xa2]] }
 0x195   :  { %v997_v20 = vmul.f32 %v4198_v51, %v989_v46  ;;  %v1002_v6 = vmul.f32 %v4199_v15, %v989_v46  ;;  %v979_v57 = vadd.f32 %v3002_v44, %v964_v61  ;;  %v984_v63 = vadd.f32 %v3005_v2, %v969_v49  ;;  %v1044_v49 = vpop.permute.xlu1 %1043 }
 0x196   :  { %v4202_v21 = vmov %v4197_v9  ;;  %v4203_v22 = vmov %v4198_v51  ;;  %v994_v39 = vadd.f32 %v992_v53, %v975_v31  ;;  %v4204_v35 = vmov %v4199_v15 }
 0x197   :  { %v991_v33 = vmul.f32 %v4202_v21, %v987_v0  ;;  %v996_v50 = vmul.f32 %v4203_v22, %v987_v0  ;;  %v999_v37 = vadd.f32 %v997_v20, %v980_v41  ;;  %v1004_v52 = vadd.f32 %v1002_v6, %v985_v12 }
 0x198   :  { %v1001_v10 = vmul.f32 %v4204_v35, %v987_v0  ;;  %v4205_v44 = vstv %s3145_s24  ;;  %v4206_v36 = vstv %s4200_s11  ;;  %v4207_v62 = vstv %s4201_s14  ;;  %v1042_v31 = vpop.permute.xlu0 %1041  ;;  %s3498_s24 = sld [smem:[#allocation3 + $0x6e]]  ;;  %s1737_s11 = sld [smem:[#allocation3 + $0xa8]] }
 0x199   :  { %v993_v25 = vadd.f32 %v991_v33, %v974_v13  ;;  %v998_v16 = vadd.f32 %v996_v50, %v979_v57  ;;  %v1013_v24 = vmul.f32 %v4205_v44, %v1010_v7  ;;  %v1018_v2 = vmul.f32 %v4206_v36, %v1010_v7 }
 0x19a   :  { %v1003_v28 = vadd.f32 %v1001_v10, %v984_v63  ;;  %v1023_v43 = vmul.f32 %v4207_v62, %v1010_v7  ;;  %v4208_v11 = vmov %v4205_v44  ;;  %v4209_v40 = vmov %v4206_v36  ;;  %v1065_v7 = vpop.permute.xlu1 %1064 }
 0x19b   :  { %v1012_v54 = vmul.f32 %v4208_v11, %v1008_v1  ;;  %v1017_v55 = vmul.f32 %v4209_v40, %v1008_v1  ;;  %v1015_v48 = vadd.f32 %v1013_v24, %v994_v39  ;;  %v1020_v30 = vadd.f32 %v1018_v2, %v999_v37 }
 0x19c   :  { %v4211_v29 = vmov %v4207_v62  ;;  %v1165_v32 = vstv %s3426_s19  ;;  %v1025_v61 = vadd.f32 %v1023_v43, %v1004_v52  ;;  %v1176_v41 = vstv %s3430_s21 }
 0x19d   :  { %v1022_v56 = vmul.f32 %v4211_v29, %v1008_v1  ;;  %v1014_v46 = vadd.f32 %v1012_v54, %v993_v25  ;;  %v1019_v0 = vadd.f32 %v1017_v55, %v998_v16  ;;  %v1030_v9 = vadd.f32 %v3058_v8, %v1015_v48  ;;  %v1063_v1 = vpop.permute.xlu0 %1062 }
 0x19e   :  { %v1035_v53 = vadd.f32 %v3063_v19, %v1020_v30  ;;  %v4212_v51 = vstv %s4210_s27  ;;  %v1040_v15 = vadd.f32 %v3082_v47, %v1025_v61  ;;  %v4213_v6 = vstv %s3190_s8  ;;  %v1099_v61 = vpop.permute.xlu1 %1098  ;;  %s3502_s8 = sld [smem:[#allocation3 + $0x89]]  ;;  %s1733_s27 = sld [smem:[#allocation3 + $0xa4]] }
 0x19f   :  { %v1024_v12 = vadd.f32 %v1022_v56, %v1003_v28  ;;  %v1047_v20 = vmul.f32 %v4212_v51, %v1044_v49  ;;  %v1052_v13 = vmul.f32 %v4213_v6, %v1044_v49  ;;  %v4214_v57 = vstv %s3192_s17  ;;  %s4232_s17 = sld [smem:[#allocation9_spill]] }
 0x1a0   :  { %v1057_v63 = vmul.f32 %v4214_v57, %v1044_v49  ;;  %v1029_v21 = vadd.f32 %v3177_v4, %v1014_v46  ;;  %v1034_v22 = vadd.f32 %v3182_v58, %v1019_v0  ;;  %v4215_v19 = vmov %v4212_v51 }
 0x1a1   :  { %v1049_v33 = vadd.f32 %v1047_v20, %v1030_v9  ;;  %v1039_v8 = vadd.f32 %v3187_v17, %v1024_v12  ;;  %v1046_v50 = vmul.f32 %v4215_v19, %v1042_v31  ;;  %v1054_v39 = vadd.f32 %v1052_v13, %v1035_v53  ;;  %v1097_v46 = vpop.permute.xlu0 %1096 }
 0x1a2   :  { %v1059_v37 = vadd.f32 %v1057_v63, %v1040_v15  ;;  %v4216_v47 = vmov %v4213_v6  ;;  %v4217_v35 = vmov %v4214_v57  ;;  %v4218_v4 = vstv %s3228_s25  ;;  %v4224_v57 = vld [vmem:[#allocation50_spill] sm:$0xff] }
 0x1a3   :  { %v1051_v52 = vmul.f32 %v4216_v47, %v1042_v31  ;;  %v1056_v10 = vmul.f32 %v4217_v35, %v1042_v31  ;;  %v1048_v25 = vadd.f32 %v1046_v50, %v1029_v21  ;;  %v1068_v16 = vmul.f32 %v4218_v4, %v1065_v7 }
 0x1a4   :  { %v4219_v44 = vstv %s3230_s18  ;;  %v4220_v24 = vstv %s3249_s9  ;;  %v4221_v28 = vmov %v4218_v4  ;;  %v1181_v0 = vstv %s3463_s2  ;;  %s4231_s9 = sld [smem:[#allocation14_spill]]  ;;  %s4240_s18 = sld [smem:[#allocation56_spill]] }
 0x1a5   :  { %v1073_v58 = vmul.f32 %v4219_v44, %v1065_v7  ;;  %v1078_v17 = vmul.f32 %v4220_v24, %v1065_v7  ;;  %v1053_v36 = vadd.f32 %v1051_v52, %v1034_v22  ;;  %v1058_v2 = vadd.f32 %v1056_v10, %v1039_v8  ;;  %v1120_v8 = vpop.permute.xlu1 %1119 }
 0x1a6   :  { %v1067_v62 = vmul.f32 %v4221_v28, %v1063_v1  ;;  %v4222_v43 = vmov %v4219_v44  ;;  %v1070_v54 = vadd.f32 %v1068_v16, %v1049_v33  ;;  %v4223_v48 = vmov %v4220_v24 }
 0x1a7   :  { %v1072_v11 = vmul.f32 %v4222_v43, %v1063_v1  ;;  %v1075_v40 = vadd.f32 %v1073_v58, %v1054_v39  ;;  %v1080_v55 = vadd.f32 %v1078_v17, %v1059_v37  ;;  %v1077_v30 = vmul.f32 %v4223_v48, %v1063_v1  ;;  %v4228_v43 = vld [vmem:[#allocation46_spill] sm:$0xff]  ;;  %v4230_v48 = vld [vmem:[#allocation48_spill] sm:$0xff] }
 0x1a8   :  { %v1069_v29 = vadd.f32 %v1067_v62, %v1048_v25  ;;  %v1186_v49 = vstv %s3465_s1  ;;  %v1085_v12 = vadd.f32 %v3197_v26, %v1070_v54  ;;  %v1102_v51 = vmul.f32 %v1100_v27, %v1099_v61 }
 0x1a9   :  { %v1074_v56 = vadd.f32 %v1072_v11, %v1053_v36  ;;  %v1079_v31 = vadd.f32 %v1077_v30, %v1058_v2  ;;  %v1090_v9 = vadd.f32 %v3202_v38, %v1075_v40  ;;  %v1095_v53 = vadd.f32 %v3207_v14, %v1080_v55  ;;  %v1154_v4 = vpop.permute.xlu1 %1153  ;;  %v4227_v2 = vld [vmem:[#allocation42_spill] sm:$0xff]  ;;  %v4229_v40 = vld [vmem:[#allocation47_spill] sm:$0xff] }
 0x1aa   :  { %v1107_v20 = vmul.f32 %v1105_v59, %v1099_v61  ;;  %v1112_v15 = vmul.f32 %v1110_v60, %v1099_v61  ;;  %v1084_v6 = vadd.f32 %v3213_v18, %v1069_v29  ;;  %v1101_v38 = vmul.f32 %v1100_v27, %v1097_v46  ;;  %v1118_v18 = vpop.permute.xlu0 %1117 }
 0x1ab   :  { %v1089_v13 = vadd.f32 %v3218_v23, %v1074_v56  ;;  %v1094_v26 = vadd.f32 %v4224_v57, %v1079_v31  ;;  %v1106_v14 = vmul.f32 %v1105_v59, %v1097_v46  ;;  %v1104_v63 = vadd.f32 %v1102_v51, %v1085_v12 }
 0x1ac   :  { %v1109_v21 = vadd.f32 %v1107_v20, %v1090_v9  ;;  %v1114_v33 = vadd.f32 %v1112_v15, %v1095_v53  ;;  %v1111_v22 = vmul.f32 %v1110_v60, %v1097_v46  ;;  %v1103_v19 = vadd.f32 %v1101_v38, %v1084_v6 }
 0x1ad   :  { %v1108_v50 = vadd.f32 %v1106_v14, %v1089_v13  ;;  %v1123_v23 = vmul.f32 %v1121_v42, %v1120_v8  ;;  %v1128_v39 = vmul.f32 %v1126_v34, %v1120_v8  ;;  %v1133_v27 = vmul.f32 %v1131_v5, %v1120_v8  ;;  %v1175_v12 = vpop.permute.xlu1 %1174 }
 0x1ae   :  { %v1113_v37 = vadd.f32 %v1111_v22, %v1094_v26  ;;  %v1122_v59 = vmul.f32 %v1121_v42, %v1118_v18  ;;  %v1127_v47 = vmul.f32 %v1126_v34, %v1118_v18  ;;  %v1132_v35 = vmul.f32 %v1131_v5, %v1118_v18  ;;  %v1152_v16 = vpop.permute.xlu0 %1151  ;;  %v4225_v42 = vld [vmem:[#allocation41_spill] sm:$0xff]  ;;  %v4226_v34 = vld [vmem:[#allocation45_spill] sm:$0xff] }
 0x1af   :  { %v1125_v52 = vadd.f32 %v1123_v23, %v1104_v63  ;;  %v1130_v60 = vadd.f32 %v1128_v39, %v1109_v21  ;;  %v1210_v10 = vstv %s3498_s24  ;;  %v1135_v7 = vadd.f32 %v1133_v27, %v1114_v33  ;;  %v4234_v33 = vld [vmem:[#allocation40_spill] sm:$0xff]  ;;  %v4238_v39 = vld [vmem:[#allocation51_spill] sm:$0xff] }
 0x1b0   :  { %v1124_v1 = vadd.f32 %v1122_v59, %v1103_v19  ;;  %v1129_v25 = vadd.f32 %v1127_v47, %v1108_v50  ;;  %v1215_v44 = vstv %s3502_s8  ;;  %v1134_v58 = vadd.f32 %v1132_v35, %v1113_v37  ;;  %v1805_v27 = vld [vmem:[#allocation2 + $0x49] sm:$0xff] }
 0x1b1   :  { %v1140_v24 = vadd.f32 %v4225_v42, %v1125_v52  ;;  %v1145_v17 = vadd.f32 %v4226_v34, %v1130_v60  ;;  %v1157_v36 = vmul.f32 %v1155_v3, %v1154_v4  ;;  %v1150_v5 = vadd.f32 %v4227_v2, %v1135_v7  ;;  %v3568_v21 = vpop.permute.xlu1 %1208  ;;  %v3596_v34 = vld [vmem:[%s4240_s18 + $0x90] sm:$0xff] }
 0x1b2   :  { %v1162_v28 = vmul.f32 %v1160_v45, %v1154_v4  ;;  %v1167_v62 = vmul.f32 %v1165_v32, %v1154_v4  ;;  %v1139_v11 = vadd.f32 %v4228_v43, %v1124_v1  ;;  %v1144_v55 = vadd.f32 %v4229_v40, %v1129_v25  ;;  %v1173_v9 = vpop.permute.xlu0 %1172 }
 0x1b3   :  { %v1159_v54 = vadd.f32 %v1157_v36, %v1140_v24  ;;  %v1149_v30 = vadd.f32 %v4230_v48, %v1134_v58  ;;  %v1156_v29 = vmul.f32 %v1155_v3, %v1152_v16  ;;  %v1161_v46 = vmul.f32 %v1160_v45, %v1152_v16  ;;  %v3591_v24 = vld [vmem:[%s4240_s18 + $0xb0] sm:$0xff]  ;;  %v3610_v36 = vld [vmem:[%s4240_s18 + $0x88] sm:$0xff] }
 0x1b4   :  { %v1164_v56 = vadd.f32 %v1162_v28, %v1145_v17  ;;  %v1169_v61 = vadd.f32 %v1167_v62, %v1150_v5  ;;  %v1166_v31 = vmul.f32 %v1165_v32, %v1152_v16  ;;  %v1178_v51 = vmul.f32 %v1176_v41, %v1175_v12 }
 0x1b5   :  { %v1158_v53 = vadd.f32 %v1156_v29, %v1139_v11  ;;  %v1183_v20 = vmul.f32 %v1181_v0, %v1175_v12  ;;  %v1188_v15 = vmul.f32 %v1186_v49, %v1175_v12  ;;  %v1163_v6 = vadd.f32 %v1161_v46, %v1144_v55 }
 0x1b6   :  { %v1168_v3 = vadd.f32 %v1166_v31, %v1149_v30  ;;  %v1177_v13 = vmul.f32 %v1176_v41, %v1173_v9  ;;  %v1182_v45 = vmul.f32 %v1181_v0, %v1173_v9  ;;  %v1180_v57 = vadd.f32 %v1178_v51, %v1159_v54  ;;  %v3576_v41 = vpop.permute.xlu0 %1206  ;;  %v4237_v0 = vld [vmem:[#allocation49_spill] sm:$0xff] }
 0x1b7   :  { %v1185_v32 = vadd.f32 %v1183_v20, %v1164_v56  ;;  %v3564_v26 = vadd.f32 %v1188_v15, %v1169_v61  ;;  %v1187_v38 = vmul.f32 %v1186_v49, %v1173_v9  ;;  %v4235_v22 = vstv %s4231_s9 }
 0x1b8   :  { %v1179_v14 = vadd.f32 %v1177_v13, %v1158_v53  ;;  %v1184_v63 = vadd.f32 %v1182_v45, %v1163_v6  ;;  %v1192_v8 = vmul.f32 %v4235_v22, %v4234_v33  ;;  %v4236_v18 = vstv %s4232_s17 }
 0x1b9   :  { %v1197_v19 = vmul.f32 %v4236_v18, %v4234_v33  ;;  %v1189_v50 = vadd.f32 %v1187_v38, %v1168_v3  ;;  %v1195_v23 = vadd.f32 %v4237_v0, %v1180_v57  ;;  %v1200_v37 = vadd.f32 %v4238_v39, %v1185_v32 }
 0x1ba   :  { %v4239_v59 = vstv %s4233_s15  ;;  %v1212_v47 = vmul.f32 %v1210_v10, %v3568_v21  ;;  %v1217_v52 = vmul.f32 %v1215_v44, %v3568_v21  ;;  %v1194_v60 = vadd.f32 %v1192_v8, %v1179_v14 }
 0x1bb   :  { %v1202_v49 = vmul.f32 %v1805_v27, %v4239_v59  ;;  %v1199_v35 = vadd.f32 %v1197_v19, %v1184_v63  ;;  %v1211_v1 = vmul.f32 %v1210_v10, %v3576_v41  ;;  %v1216_v25 = vmul.f32 %v1215_v44, %v3576_v41  ;;  %v3605_v44 = vld [vmem:[%s4240_s18 + $0xa8] sm:$0xff] }
 0x1bc   :  { %v1214_v4 = vadd.f32 %v1212_v47, %v1195_v23  ;;  %v1219_v16 = vadd.f32 %v1217_v52, %v1200_v37  ;;  %v3624_v3 = vsub.f32 %v3610_v36, %v3605_v44  ;;  %v3628_v13 = vsub.f32 %v3596_v34, %v3591_v24 }
 0x1bd   :  { %v3584_v7 = vadd.f32 %v1202_v49, %v1189_v50  ;;  %v1213_v58 = vadd.f32 %v1211_v1, %v1194_v60  ;;  %v1218_v42 = vadd.f32 %v1216_v25, %v1199_v35 }
 0x1be   :  { %v3599_v17 = vmul.f32 %v3596_v34, %v1219_v16  ;;  %v1226_v10 = vmul.f32 %v3596_v34, %v1214_v4 }
 0x1bf   :  { %v3613_v2 = vmul.f32 %v3610_v36, %v1218_v42  ;;  %v1225_v5 = vmul.f32 %v3610_v36, %v1213_v58 }
 0x1c0   :  { %v1232_v28 = vmul.f32 %v3591_v24, %v1226_v10  ;;  %v1319_v54 = vmul.f32 %v3591_v24, %v3599_v17 }
 0x1c1   :  { %v1243_v62 = vadd.f32 %v1226_v10, %v1225_v5  ;;  %v1231_v43 = vmul.f32 %v3605_v44, %v1225_v5  ;;  %v1318_v11 = vmul.f32 %v3605_v44, %v3613_v2  ;;  %v1330_v27 = vadd.f32 %v3599_v17, %v3613_v2 }
 0x1c3   :  { %1244 = vadd.xlane.f32.xlu1 %v1243_v62  ;;  %v1233_v40 = vadd.f32 %v1232_v28, %v1231_v43  ;;  %v1320_v55 = vadd.f32 %v1319_v54, %v1318_v11 }
 0x1c5   :  { %1234 = vadd.xlane.f32.xlu0 %v1233_v40 }
 0x1c7   :  { %1321 = vadd.xlane.f32.xlu1 %v1320_v55 }
 0x250   :  { %v1245_v48 = vpop.xlane.xlu1 %1244 }
 0x251   :  { %v1246_v30 = vrot.slane %v1245_v48, 4 }
 0x252   :  { %v1235_v29 = vpop.xlane.xlu0 %1234 }
 0x253   :  { %v1247_v56 = vadd.f32 %v1246_v30, %v1245_v48  ;;  %v1236_v61 = vrot.slane %v1235_v29, 4 }
 0x254   :  { %v1322_v28 = vpop.xlane.xlu1 %1321 }
 0x255   :  { %v1248_v46 = vrot.slane %v1247_v56, 2  ;;  %v1237_v31 = vadd.f32 %v1236_v61, %v1235_v29  ;;  %v1323_v43 = vrot.slane %v1322_v28, 4 }
 0x257   :  { %v1238_v12 = vrot.slane %v1237_v31, 2  ;;  %v1249_v9 = vadd.f32 %v1248_v46, %v1247_v56  ;;  %v1324_v40 = vadd.f32 %v1323_v43, %v1322_v28 }
 0x259   :  { %v1239_v53 = vadd.f32 %v1238_v12, %v1237_v31  ;;  %v1250_v51 = vrot.slane %v1249_v9, 1  ;;  %v1325_v48 = vrot.slane %v1324_v40, 2 }
 0x25b   :  { %v1240_v20 = vrot.slane %v1239_v53, 1  ;;  %v1251_v6 = vadd.f32 %v1250_v51, %v1249_v9  ;;  %v1326_v56 = vadd.f32 %v1325_v48, %v1324_v40 }
 0x25d   :  { %v1241_v15 = vadd.f32 %v1240_v20, %v1239_v53  ;;  %v1327_v31 = vrot.slane %v1326_v56, 1 }
 0x25f   :  { %1749 = vpush %v1241_v15  ;;  %v1328_v53 = vadd.f32 %v1327_v31, %v1326_v56  ;;  %v1808_v15 = vld [vmem:[#allocation2 + $0x51] sm:$0xff] }
 0x260   :  { %1751 = vpush %v1251_v6  ;;  %v4241_v6 = vstv %s4233_s15 }
 0x290   :  { %s1750_s26 = spop %1749 }
 0x291   :  { %s1253_s5 = smul.f32 0.001953125, %s1750_s26  ;;  %s1752_s6 = spop %1751 }
 0x292   :  { %s1254_s3 = ssub.f32 %s1752_s6, %s1750_s26  ;;  %s1739_s26 = sld [smem:[#allocation3 + $0xa9]] }
 0x293   :  { %v1256_v45 = vstv %s1253_s5  ;;  %s1738_s5 = sld [smem:[#allocation3 + $0xab]]  ;;  %s1744_s6 = sld [smem:[#allocation3 + $0xae]] }
 0x294   :  { %s1255_s22 = smul.f32 0.001953125, %s1254_s3  ;;  %v1257_v32 = vmul.f32 %v3605_v44, %v1256_v45  ;;  %v1258_v38 = vmul.f32 %v3591_v24, %v1256_v45  ;;  %v1203_v45 = vmul.f32 %v1808_v15, %v4241_v6 }
 0x296   :  { %v1259_v57 = vstv %s1255_s22  ;;  %s3688_s22 = sld [smem:[#allocation3 + $0xb1]] }
 0x297   :  { %v1260_v14 = vmul.f32 %v1259_v57, %v3624_v3  ;;  %v1261_v63 = vmul.f32 %v1259_v57, %v3628_v13  ;;  %v1220_v57 = vstv %s1733_s27 }
 0x299   :  { %v1262_v33 = vadd.f32 %v1260_v14, %v1257_v32  ;;  %v1263_v22 = vadd.f32 %v1261_v63, %v1258_v38 }
 0x29b   :  { %v3634_v8 = vsub.f32 %v1225_v5, %v1262_v33  ;;  %v3636_v18 = vsub.f32 %v1226_v10, %v1263_v22  ;;  %v1205_v22 = vadd.f32 %v1203_v45, %v3564_v26 }
 0x29d   :  { %v1266_v19 = vmul.f32 %v3634_v8, %v3634_v8  ;;  %v1267_v50 = vmul.f32 %v3636_v18, %v3636_v18 }
 0x29f   :  { %v1268_v0 = vmul.f32 %v3605_v44, %v1266_v19  ;;  %v1269_v23 = vmul.f32 %v3591_v24, %v1267_v50  ;;  %v1280_v37 = vadd.f32 %v1267_v50, %v1266_v19  ;;  %v1222_v50 = vmul.f32 %v1220_v57, %v3568_v21 }
 0x2a1   :  { %v1270_v39 = vadd.f32 %v1269_v23, %v1268_v0  ;;  %v1221_v0 = vmul.f32 %v1220_v57, %v3576_v41  ;;  %v1224_v26 = vadd.f32 %v1222_v50, %v1205_v22 }
 0x2a3   :  { %1271 = vadd.xlane.f32.xlu0 %v1270_v39 }
 0x2a7   :  { %1281 = vadd.xlane.f32.xlu0 %v1280_v37 }
 0x2ab   :  { %1331 = vadd.xlane.f32.xlu0 %v1330_v27 }
 0x330   :  { %v1272_v59 = vpop.xlane.xlu0 %1271 }
 0x331   :  { %v1273_v49 = vrot.slane %v1272_v59, 4 }
 0x333   :  { %v1274_v47 = vadd.f32 %v1273_v49, %v1272_v59 }
 0x334   :  { %v1282_v52 = vpop.xlane.xlu0 %1281 }
 0x335   :  { %v1275_v60 = vrot.slane %v1274_v47, 2  ;;  %v1283_v35 = vrot.slane %v1282_v52, 4 }
 0x337   :  { %v1284_v1 = vadd.f32 %v1283_v35, %v1282_v52  ;;  %v1276_v25 = vadd.f32 %v1275_v60, %v1274_v47  ;;  %v1223_v52 = vadd.f32 %v1221_v0, %v3584_v7 }
 0x338   :  { %v1332_v62 = vpop.xlane.xlu0 %1331 }
 0x339   :  { %v1285_v4 = vrot.slane %v1284_v1, 2  ;;  %v1277_v16 = vrot.slane %v1276_v25, 1  ;;  %v1333_v11 = vrot.slane %v1332_v62, 4 }
 0x33b   :  { %v1278_v58 = vadd.f32 %v1277_v16, %v1276_v25  ;;  %v1286_v42 = vadd.f32 %v1285_v4, %v1284_v1  ;;  %v1334_v55 = vadd.f32 %v1333_v11, %v1332_v62  ;;  %v3675_v4 = vmul.f32 %v3610_v36, %v1223_v52 }
 0x33c   :  { %v3678_v16 = vmul.f32 %v3596_v34, %v1224_v26 }
 0x33d   :  { %1753 = vpush %v1278_v58  ;;  %v1287_v10 = vrot.slane %v1286_v42, 1  ;;  %v1335_v30 = vrot.slane %v1334_v55, 2 }
 0x33e   :  { %v1417_v36 = vadd.f32 %v3678_v16, %v3675_v4 }
 0x33f   :  { %v1288_v5 = vadd.f32 %v1287_v10, %v1286_v42  ;;  %v1336_v61 = vadd.f32 %v1335_v30, %v1334_v55  ;;  %v1405_v42 = vmul.f32 %v3605_v44, %v3675_v4  ;;  %v1406_v10 = vmul.f32 %v3591_v24, %v3678_v16 }
 0x341   :  { %1755 = vpush %v1288_v5  ;;  %v1337_v12 = vrot.slane %v1336_v61, 1  ;;  %v1407_v34 = vadd.f32 %v1406_v10, %v1405_v42 }
 0x343   :  { %v1338_v51 = vadd.f32 %v1337_v12, %v1336_v61 }
 0x36e   :  { %s1754_s23 = spop %1753 }
 0x36f   :  { %s1290_s0 = smul.f32 0.001953125, %s1754_s23 }
 0x371   :  { %s1291_s20 = sadd.f32 1e-05, %s1290_s0  ;;  %s3694_s0 = sld [smem:[#allocation3 + $0xac]] }
 0x372   :  { %s1756_s30 = spop %1755 }
 0x373   :  { %v1292_v54 = vstv %s1291_s20  ;;  %s1295_s4 = ssub.f32 %s1756_s30, %s1754_s23  ;;  %s3696_s30 = sld [smem:[#allocation3 + $0xaf]] }
 0x374   :  { %1793 = vrsqrt.f32 %v1292_v54 }
 0x375   :  { %s1296_s19 = smul.f32 0.001953125, %s1295_s4 }
 0x377   :  { %s1297_s21 = sadd.f32 1e-05, %s1296_s19 }
 0x379   :  { %v1298_v29 = vstv %s1297_s21 }
 0x37a   :  { %1795 = vrsqrt.f32 %v1298_v29 }
 0x37e   :  { %v1794_v46 = vpop.eup %1793 }
 0x37f   :  { %1757 = vpush %v1794_v46 }
 0x384   :  { %v1796_v9 = vpop.eup %1795 }
 0x385   :  { %1759 = vpush %v1796_v9 }
 0x386   :  { %1761 = vpush %v1328_v53 }
 0x387   :  { %1763 = vpush %v1338_v51 }
 0x3b0   :  { %s1758_s14 = spop %1757 }
 0x3b1   :  { %s1302_s2 = smul.f32 %s1758_s14, %s1737_s11 }
 0x3b3   :  { %v1303_v20 = vstv %s1302_s2 }
 0x3b4   :  { %v1304_v38 = vmul.f32 %v3605_v44, %v1303_v20  ;;  %v1305_v14 = vmul.f32 %v3591_v24, %v1303_v20 }
 0x3b6   :  { %s1760_s1 = spop %1759 }
 0x3b7   :  { %s1306_s24 = smul.f32 %s1760_s1, %s1737_s11  ;;  %s1762_s8 = spop %1761 }
 0x3b8   :  { %s1340_s9 = smul.f32 0.001953125, %s1762_s8  ;;  %s1764_s17 = spop %1763 }
 0x3b9   :  { %v1307_v32 = vstv %s1306_s24  ;;  %s1341_s13 = ssub.f32 %s1764_s17, %s1762_s8 }
 0x3ba   :  { %v1308_v63 = vmul.f32 %v1307_v32, %v3624_v3  ;;  %v1309_v33 = vmul.f32 %v1307_v32, %v3628_v13  ;;  %v1343_v19 = vstv %s1340_s9 }
 0x3bb   :  { %s1342_s25 = smul.f32 0.001953125, %s1341_s13  ;;  %v1344_v27 = vmul.f32 %v3605_v44, %v1343_v19  ;;  %v1345_v59 = vmul.f32 %v3591_v24, %v1343_v19 }
 0x3bc   :  { %v3655_v23 = vadd.f32 %v1308_v63, %v1304_v38  ;;  %v3657_v39 = vadd.f32 %v1309_v33, %v1305_v14 }
 0x3bd   :  { %v1346_v37 = vstv %s1342_s25  ;;  %s1741_s25 = sld [smem:[#allocation3 + $0xaa]] }
 0x3be   :  { %v1347_v49 = vmul.f32 %v1346_v37, %v3624_v3  ;;  %v1348_v47 = vmul.f32 %v1346_v37, %v3628_v13  ;;  %v1312_v0 = vmul.f32 %v3655_v23, %v3634_v8  ;;  %v1313_v37 = vmul.f32 %v3657_v39, %v3636_v18 }
 0x3bf   :  { %v1495_v18 = vstv %s1744_s6 }
 0x3c0   :  { %v1349_v60 = vadd.f32 %v1347_v49, %v1344_v27  ;;  %v1350_v21 = vadd.f32 %v1348_v47, %v1345_v59  ;;  %v1315_v27 = vstv %s1738_s5 }
 0x3c1   :  { %v1316_v49 = vadd.f32 %v1315_v27, %v1312_v0  ;;  %v1317_v47 = vadd.f32 %v1315_v27, %v1313_v37 }
 0x3c2   :  { %v3665_v41 = vsub.f32 %v3613_v2, %v1349_v60  ;;  %v3668_v35 = vsub.f32 %v3599_v17, %v1350_v21  ;;  %v1493_v21 = vstv %s3688_s22 }
 0x3c4   :  { %v1353_v1 = vmul.f32 %v3665_v41, %v3665_v41  ;;  %v1354_v25 = vmul.f32 %v3668_v35, %v3668_v35 }
 0x3c6   :  { %v1367_v7 = vadd.f32 %v1354_v25, %v1353_v1  ;;  %v1355_v58 = vmul.f32 %v3605_v44, %v1353_v1  ;;  %v1356_v2 = vmul.f32 %v3591_v24, %v1354_v25 }
 0x3c8   :  { %1368 = vadd.xlane.f32.xlu0 %v1367_v7  ;;  %v1357_v17 = vadd.f32 %v1356_v2, %v1355_v58  ;;  %v1497_v7 = vmul.f32 %v1495_v18, %v1317_v47  ;;  %v1496_v58 = vmul.f32 %v1495_v18, %v1316_v49  ;;  %v1402_v2 = vstv %s3694_s0 }
 0x3ca   :  { %1358 = vadd.xlane.f32.xlu1 %v1357_v17 }
 0x3cc   :  { %1418 = vadd.xlane.f32.xlu0 %v1417_v36 }
 0x3ce   :  { %1408 = vadd.xlane.f32.xlu1 %v1407_v34 }
 0x455   :  { %v1369_v5 = vpop.xlane.xlu0 %1368 }
 0x456   :  { %v1370_v28 = vrot.slane %v1369_v5, 4 }
 0x457   :  { %v1359_v62 = vpop.xlane.xlu1 %1358 }
 0x458   :  { %v1371_v43 = vadd.f32 %v1370_v28, %v1369_v5  ;;  %v1360_v11 = vrot.slane %v1359_v62, 4 }
 0x459   :  { %v1419_v12 = vpop.xlane.xlu0 %1418 }
 0x45a   :  { %v1372_v54 = vrot.slane %v1371_v43, 2  ;;  %v1361_v40 = vadd.f32 %v1360_v11, %v1359_v62  ;;  %v1420_v53 = vrot.slane %v1419_v12, 4  ;;  %v1501_v62 = vstv %s3696_s30 }
 0x45b   :  { %v1409_v31 = vpop.xlane.xlu1 %1408 }
 0x45c   :  { %v1362_v55 = vrot.slane %v1361_v40, 2  ;;  %v1373_v48 = vadd.f32 %v1372_v54, %v1371_v43  ;;  %v1410_v9 = vrot.slane %v1409_v31, 4  ;;  %v1421_v20 = vadd.f32 %v1420_v53, %v1419_v12 }
 0x45e   :  { %v1363_v30 = vadd.f32 %v1362_v55, %v1361_v40  ;;  %v1374_v29 = vrot.slane %v1373_v48, 1  ;;  %v1411_v51 = vadd.f32 %v1410_v9, %v1409_v31  ;;  %v1422_v45 = vrot.slane %v1421_v20, 2 }
 0x45f   :  { %v1499_v55 = vadd.f32 %v1497_v7, %v1493_v21 }
 0x460   :  { %v1364_v56 = vrot.slane %v1363_v30, 1  ;;  %v1375_v46 = vadd.f32 %v1374_v29, %v1373_v48  ;;  %v1412_v6 = vrot.slane %v1411_v51, 2  ;;  %v1423_v38 = vadd.f32 %v1422_v45, %v1421_v20 }
 0x461   :  { %v1498_v48 = vadd.f32 %v1496_v58, %v1493_v21 }
 0x462   :  { %v1365_v61 = vadd.f32 %v1364_v56, %v1363_v30  ;;  %v1413_v32 = vadd.f32 %v1412_v6, %v1411_v51  ;;  %v1424_v33 = vrot.slane %v1423_v38, 1 }
 0x464   :  { %1765 = vpush %v1365_v61  ;;  %v1414_v14 = vrot.slane %v1413_v32, 1  ;;  %v1425_v50 = vadd.f32 %v1424_v33, %v1423_v38 }
 0x465   :  { %1767 = vpush %v1375_v46 }
 0x466   :  { %v1415_v19 = vadd.f32 %v1414_v14, %v1413_v32 }
 0x495   :  { %s1766_s15 = spop %1765 }
 0x496   :  { %s1377_s7 = smul.f32 0.001953125, %s1766_s15  ;;  %s1768_s12 = spop %1767 }
 0x497   :  { %s1382_s16 = ssub.f32 %s1768_s12, %s1766_s15  ;;  %s1742_s12 = sld [smem:[#allocation3 + $0xad]] }
 0x498   :  { %s1378_s10 = sadd.f32 1e-05, %s1377_s7 }
 0x499   :  { %s1383_s29 = smul.f32 0.001953125, %s1382_s16 }
 0x49a   :  { %v1379_v15 = vstv %s1378_s10 }
 0x49b   :  { %1797 = vrsqrt.f32 %v1379_v15  ;;  %s1384_s28 = sadd.f32 1e-05, %s1383_s29  ;;  %s1746_s29 = sld [smem:[#allocation3 + $0xb0]] }
 0x49d   :  { %v1385_v57 = vstv %s1384_s28  ;;  %s1839_s28 = smov 92  }
 0x49e   :  { %1799 = vrsqrt.f32 %v1385_v57 }
 0x4a5   :  { %v1798_v63 = vpop.eup %1797 }
 0x4a6   :  { %1769 = vpush %v1798_v63 }
 0x4a8   :  { %v1800_v22 = vpop.eup %1799 }
 0x4a9   :  { %1771 = vpush %v1800_v22 }
 0x4aa   :  { %1773 = vpush %v1415_v19 }
 0x4ab   :  { %1775 = vpush %v1425_v50 }
 0x4d7   :  { %s1770_s3 = spop %1769 }
 0x4d8   :  { %s1389_s23 = smul.f32 %s1770_s3, %s1739_s26 }
 0x4da   :  { %v1390_v59 = vstv %s1389_s23  ;;  %s1772_s20 = spop %1771 }
 0x4db   :  { %s1393_s4 = smul.f32 %s1772_s20, %s1739_s26  ;;  %s1774_s19 = spop %1773  ;;  %v1391_v8 = vmul.f32 %v3605_v44, %v1390_v59  ;;  %v1392_v39 = vmul.f32 %v3591_v24, %v1390_v59 }
 0x4dc   :  { %s1427_s21 = smul.f32 0.001953125, %s1774_s19  ;;  %s1776_s11 = spop %1775 }
 0x4dd   :  { %v1394_v23 = vstv %s1393_s4  ;;  %s1428_s14 = ssub.f32 %s1776_s11, %s1774_s19  ;;  %s4242_s20 = sld [smem:[#allocation57_spill]] }
 0x4de   :  { %v1395_v26 = vmul.f32 %v1394_v23, %v3624_v3  ;;  %v1396_v52 = vmul.f32 %v1394_v23, %v3628_v13  ;;  %v1430_v60 = vstv %s1427_s21 }
 0x4df   :  { %s1429_s27 = smul.f32 0.001953125, %s1428_s14  ;;  %v1431_v17 = vmul.f32 %v3605_v44, %v1430_v60  ;;  %v1432_v42 = vmul.f32 %v3591_v24, %v1430_v60 }
 0x4e0   :  { %v1397_v1 = vadd.f32 %v1395_v26, %v1391_v8  ;;  %v1398_v25 = vadd.f32 %v1396_v52, %v1392_v39  ;;  %v1489_v52 = vstv %s1742_s12 }
 0x4e1   :  { %v1433_v10 = vstv %s1429_s27 }
 0x4e2   :  { %v1399_v36 = vmul.f32 %v1397_v1, %v3665_v41  ;;  %v1400_v34 = vmul.f32 %v1398_v25, %v3668_v35  ;;  %v1434_v5 = vmul.f32 %v1433_v10, %v3624_v3  ;;  %v1435_v28 = vmul.f32 %v1433_v10, %v3628_v13  ;;  %v1747_v10 = vld [vmem:[%s4240_s18 + $0x68] sm:$0xff] }
 0x4e3   :  { %v1507_v1 = vstv %s1746_s29  ;;  %s1821_s30 = scalar_lea.hbm %s4242_s20, 16 }
 0x4e4   :  { %v1403_v43 = vadd.f32 %v1402_v2, %v1399_v36  ;;  %v1404_v11 = vadd.f32 %v1402_v2, %v1400_v34  ;;  %v1436_v54 = vadd.f32 %v1434_v5, %v1431_v17  ;;  %v1437_v40 = vadd.f32 %v1435_v28, %v1432_v42  ;;  %p1822_p5 = scmp.ne.s32.totalorder %s4242_s20, %s1821_s30  ;;  %p1825_p6 = scmp.lt.u32.totalorder %s1821_s30, %s4242_s20 }
 0x4e6   :  { %v1438_v30 = vsub.f32 %v3675_v4, %v1436_v54  ;;  %v1439_v29 = vsub.f32 %v3678_v16, %v1437_v40  ;;  %v1503_v56 = vmul.f32 %v1501_v62, %v1404_v11  ;;  %v1502_v61 = vmul.f32 %v1501_v62, %v1403_v43  ;;  %p1827_p7 = pnand %p1825_p6, %p1822_p5 }
 0x4e8   :  { %v1440_v41 = vmul.f32 %v1438_v30, %v1438_v30  ;;  %v1441_v46 = vmul.f32 %v1439_v29, %v1439_v29  ;;  %v1505_v35 = vadd.f32 %v1503_v56, %v1499_v55  ;;  %v1504_v31 = vadd.f32 %v1502_v61, %v1498_v48 }
 0x4ea   :  { %v1454_v12 = vadd.f32 %v1441_v46, %v1440_v41  ;;  %v1442_v9 = vmul.f32 %v3605_v44, %v1440_v41  ;;  %v1443_v53 = vmul.f32 %v3591_v24, %v1441_v46 }
 0x4ec   :  { %1455 = vadd.xlane.f32.xlu0 %v1454_v12  ;;  %v1444_v51 = vadd.f32 %v1443_v53, %v1442_v9 }
 0x4ee   :  { %1445 = vadd.xlane.f32.xlu1 %v1444_v51 }
 0x579   :  { %v1456_v20 = vpop.xlane.xlu0 %1455 }
 0x57a   :  { %v1457_v15 = vrot.slane %v1456_v20, 4 }
 0x57b   :  { %v1446_v6 = vpop.xlane.xlu1 %1445 }
 0x57c   :  { %v1458_v4 = vadd.f32 %v1457_v15, %v1456_v20  ;;  %v1447_v45 = vrot.slane %v1446_v6, 4 }
 0x57e   :  { %v1459_v16 = vrot.slane %v1458_v4, 2  ;;  %v1448_v57 = vadd.f32 %v1447_v45, %v1446_v6 }
 0x580   :  { %v1449_v32 = vrot.slane %v1448_v57, 2  ;;  %v1460_v38 = vadd.f32 %v1459_v16, %v1458_v4 }
 0x582   :  { %v1450_v14 = vadd.f32 %v1449_v32, %v1448_v57  ;;  %v1461_v63 = vrot.slane %v1460_v38, 1 }
 0x584   :  { %v1451_v33 = vrot.slane %v1450_v14, 1  ;;  %v1462_v19 = vadd.f32 %v1461_v63, %v1460_v38 }
 0x586   :  { %v1452_v22 = vadd.f32 %v1451_v33, %v1450_v14 }
 0x588   :  { %1777 = vpush %v1452_v22 }
 0x589   :  { %1779 = vpush %v1462_v19 }
 0x5b9   :  { %s1778_s2 = spop %1777 }
 0x5ba   :  { %s1464_s1 = smul.f32 0.001953125, %s1778_s2  ;;  %s1780_s24 = spop %1779 }
 0x5bb   :  { %s1469_s8 = ssub.f32 %s1780_s24, %s1778_s2 }
 0x5bc   :  { %s1465_s9 = sadd.f32 1e-05, %s1464_s1 }
 0x5bd   :  { %s1470_s17 = smul.f32 0.001953125, %s1469_s8 }
 0x5be   :  { %v1466_v50 = vstv %s1465_s9 }
 0x5bf   :  { %1801 = vrsqrt.f32 %v1466_v50  ;;  %s1471_s13 = sadd.f32 1e-05, %s1470_s17 }
 0x5c1   :  { %v1472_v0 = vstv %s1471_s13 }
 0x5c2   :  { %1803 = vrsqrt.f32 %v1472_v0 }
 0x5c9   :  { %v1802_v37 = vpop.eup %1801 }
 0x5ca   :  { %1781 = vpush %v1802_v37 }
 0x5cc   :  { %v1804_v27 = vpop.eup %1803 }
 0x5cd   :  { %1783 = vpush %v1804_v27 }
 0x5fb   :  { %s1782_s15 = spop %1781 }
 0x5fc   :  { %s1476_s7 = smul.f32 %s1782_s15, %s1741_s25 }
 0x5fe   :  { %s1784_s16 = spop %1783  ;;  %v1477_v59 = vstv %s1476_s7 }
 0x5ff   :  { %s1480_s10 = smul.f32 %s1784_s16, %s1741_s25  ;;  %v1478_v47 = vmul.f32 %v3605_v44, %v1477_v59  ;;  %v1479_v8 = vmul.f32 %v3591_v24, %v1477_v59 }
 0x601   :  { %v1481_v49 = vstv %s1480_s10 }
 0x602   :  { %v1482_v23 = vmul.f32 %v1481_v49, %v3624_v3  ;;  %v1483_v18 = vmul.f32 %v1481_v49, %v3628_v13  ;;  %v1748_v3 = vld [vmem:[%s4240_s18 + $0x70] sm:$0xff] }
 0x604   :  { %v1484_v39 = vadd.f32 %v1482_v23, %v1478_v47  ;;  %v1485_v26 = vadd.f32 %v1483_v18, %v1479_v8 }
 0x606   :  { %v1486_v60 = vmul.f32 %v1484_v39, %v1438_v30  ;;  %v1487_v21 = vmul.f32 %v1485_v26, %v1439_v29 }
 0x608   :  { %v1491_v25 = vadd.f32 %v1489_v52, %v1487_v21  ;;  %v1490_v7 = vadd.f32 %v1489_v52, %v1486_v60 }
 0x60a   :  { %v1509_v58 = vmul.f32 %v1507_v1, %v1491_v25  ;;  %v1508_v2 = vmul.f32 %v1507_v1, %v1490_v7 }
 0x60c   :  { %v1511_v17 = vadd.f32 %v1509_v58, %v1505_v35  ;;  %v1510_v42 = vadd.f32 %v1508_v2, %v1504_v31 }
 0x60e   :  { %1514 = vrot.lane.b32.xlu0 %v1511_v17, %s1839_s28  ;;  %1512 = vrot.lane.b32.xlu1 %v1510_v42, %s1839_s28 }
 0x680   :  { %v1515_v13 = vpop.permute.xlu0 %1514  ;;  %v1513_v36 = vpop.permute.xlu1 %1512 }
 0x681   :  { %v1520_v34 = vadd.f32 %v1515_v13, %v1511_v17  ;;  %v1519_v5 = vadd.f32 %v1513_v36, %v1510_v42 }
 0x683   :  { %v1522_v28 = vsub.f32 %v1520_v34, %v1748_v3  ;;  %v1521_v62 = vsub.f32 %v1519_v5, %v1747_v10 }
 0x685   :  { %v1524_v43 = vand.u32 2147483647, %v1522_v28  ;;  %v1523_v11 = vand.u32 2147483647, %v1521_v62 }
 0x687   :  { %v1525_v54 = vmul.f32 %v3605_v44, %v1523_v11  ;;  %v1526_v40 = vmul.f32 %v3591_v24, %v1524_v43 }
 0x689   :  { %v1527_v55 = vadd.f32 %v1526_v40, %v1525_v54 }
 0x68b   :  { %1528 = vadd.xlane.f32.xlu1 %v1527_v55 }
 0x718   :  { %v1529_v48 = vpop.xlane.xlu1 %1528 }
 0x719   :  { %v1530_v30 = vrot.slane %v1529_v48, 4 }
 0x71b   :  { %v1531_v29 = vadd.f32 %v1530_v30, %v1529_v48 }
 0x71d   :  { %v1532_v56 = vrot.slane %v1531_v29, 2 }
 0x71f   :  { %v1533_v61 = vadd.f32 %v1532_v56, %v1531_v29 }
 0x721   :  { %v1534_v41 = vrot.slane %v1533_v61, 1 }
 0x723   :  { %v1535_v46 = vadd.f32 %v1534_v41, %v1533_v61 }
 0x725   :  { %1785 = vpush %v1535_v46 }
 0x756   :  { %s1786_s18 = spop %1785 }
 0x757   :  { %s1537_s22 = smul.f32 0.001953125, %s1786_s18 }
 0x759   :  { %1539 = sst [smem:[#allocation6]] %s1537_s22 }
 0x75a   :  { %1830 = shalt.err (!%p1827_p7)
}
 0x75b   :  { %s1840_s14 = smov [#allocation6]  }
 0x75c   :  { %1547 = dma.smem_to_hbm %s1840_s14, 16, %s4242_s20, [#allocation4]  }
 0x75d   :  { %1833 = dma.done.wait [#allocation4], 16  }
 0x75e   :  { %1834 = vsyncadd [#allocation4], 4294967280 }
 0x75f   :  { %1551 = sfence }
 0x760   :  { %1552 = vsyncpa [#allocation4], 1 }
 0x761   :  { %1553 = vsyncpa [#allocation5], 1 }

</bundles_post_ra>
